<compile_context>
chip_gen: v7x
topology: tpu7x:2x2x1
jax: 0.10.0
libtpu: 0.0.40
codegen_flags: <defaults>
</compile_context>

<pallas_src>
import jax
import jax.numpy as jnp
from jax.experimental import pallas as pl
from jax.experimental.pallas import tpu as pltpu

EPS = 1e-5


def bn_relu_kernel(x_ref, gb_ref, o_ref):
    # x_ref : (TC, L)  channel tile on sublanes, spatial (N*H*W) on lanes.
    # gb_ref: (TC, 2)  column 0 = gamma, column 1 = beta.
    inv_n = 1.0 / x_ref.shape[1]

    # Single reduction pass: per-channel sum and sum-of-squares.  Only the
    # (TC, 1) accumulators stay live afterwards -- no (TC, L) derived value
    # (such as x - mean) is carried into the normalize step, so nothing
    # spills out of the vreg file.
    x = x_ref[...]
    mean = jnp.sum(x, axis=1, keepdims=True) * inv_n        # (TC, 1)
    ex2 = jnp.sum(x * x, axis=1, keepdims=True) * inv_n     # (TC, 1)
    var = ex2 - mean * mean                                  # biased variance

    gamma = gb_ref[:, 0:1]
    beta = gb_ref[:, 1:2]
    scale = jax.lax.rsqrt(var + EPS) * gamma                 # (TC, 1)
    shift = beta - mean * scale                              # mean folded in

    # One elementwise pass over the tile: mul + add + max.
    y = x_ref[...] * scale + shift
    o_ref[...] = jnp.maximum(y, 0.0).astype(o_ref.dtype)


def batchnorm_relu(x_nchw, gamma, beta, *, channel_tile=512):
    N, C, H, W = x_nchw.shape
    L = N * H * W
    if channel_tile > C:
        channel_tile = C
    assert C % channel_tile == 0 and channel_tile % 8 == 0, (
        "channel_tile must divide C and be a multiple of 8")

    # Native-layout view: for N == 1, NCHW -> (C, H*W) is a pure reshape
    # (no data movement). Channels -> sublanes, spatial -> lanes.
    if N == 1:
        x2d = x_nchw.reshape(C, L)
    else:
        # Rare fallback (the module uses N == 1): make channels major once.
        x2d = jnp.transpose(x_nchw, (1, 0, 2, 3)).reshape(C, L)

    # Pack gamma/beta into one (C, 2) array: one DMA descriptor per step.
    gb = jnp.stack([gamma, beta], axis=1).astype(jnp.float32)

    # Advisory cost hint so XLA can schedule around this tiny call.
    flops = 6 * C * L                       # ~2 reduce passes + mul/add/max
    bytes_accessed = 2 * C * L * x2d.dtype.itemsize + gb.size * 4

    grid = (C // channel_tile,)  # (2,) for C=1024, tile=512
    out2d = pl.pallas_call(
        bn_relu_kernel,
        out_shape=jax.ShapeDtypeStruct((C, L), x2d.dtype),
        grid_spec=pltpu.PrefetchScalarGridSpec(
            num_scalar_prefetch=0,
            grid=grid,
            in_specs=[
                pl.BlockSpec((channel_tile, L), lambda c: (c, 0)),
                pl.BlockSpec((channel_tile, 2), lambda c: (c, 0)),
            ],
            out_specs=pl.BlockSpec((channel_tile, L), lambda c: (c, 0)),
        ),
        compiler_params=pltpu.CompilerParams(
            dimension_semantics=("parallel",),
        ),
        cost_estimate=pl.CostEstimate(
            flops=flops, transcendentals=C, bytes_accessed=bytes_accessed),
        input_output_aliases={0: 0},
    )(x2d, gb)

    if N == 1:
        return out2d.reshape(N, C, H, W)
    return jnp.transpose(out2d.reshape(C, N, H, W), (1, 0, 2, 3))


if __name__ == "__main__":
    # Shape matching the module: x251 = torch.randn([1, 1024, 14, 14])
    N, C, H, W = 1, 1024, 14, 14

    key = jax.random.PRNGKey(0)
    kx, kg, kb = jax.random.split(key, 3)
    x = jax.random.normal(kx, (N, C, H, W), dtype=jnp.float32)
    # Deterministic, non-trivial affine params (BatchNorm2d weight/bias).
    gamma = 1.0 + 0.1 * jax.random.normal(kg, (C,), dtype=jnp.float32)
    beta = 0.1 * jax.random.normal(kb, (C,), dtype=jnp.float32)

    out = batchnorm_relu(x, gamma, beta)
    out = jax.block_until_ready(out)

    # Pure-JAX reference (training-mode BN + ReLU).
    mean = jnp.mean(x, axis=(0, 2, 3), keepdims=True)
    var = jnp.mean((x - mean) ** 2, axis=(0, 2, 3), keepdims=True)
    ref = (x - mean) * jax.lax.rsqrt(var + EPS)
    ref = ref * gamma.reshape(1, C, 1, 1) + beta.reshape(1, C, 1, 1)
    ref = jnp.maximum(ref, 0.0)
    assert jnp.allclose(out, ref, atol=1e-4, rtol=1e-4), "mismatch vs reference"

    print("KERNEL_OK")
</pallas_src>

<mosaic_0001>
module attributes {stable_mosaic.version = 11 : i64} {
  func.func @bn_relu_kernel(%arg0: i32, %arg1: memref<512x196xf32, #tpu.memory_space<vmem>>, %arg2: memref<512x2xf32, #tpu.memory_space<vmem>>, %arg3: memref<512x196xf32, #tpu.memory_space<vmem>>) attributes {dimension_semantics = [#tpu.dimension_semantics<parallel>], iteration_bounds = array<i64: 2>, scalar_prefetch = 0 : i64, scratch_operands = 0 : i64, tpu.core_type = #tpu.core_type<tc>, window_params = [{transform_indices = @transform_0, window_bounds = array<i64: 512, 196>}, {transform_indices = @transform_1, window_bounds = array<i64: 512, 2>}, {transform_indices = @transform_2, window_bounds = array<i64: 512, 196>}]} {
    %c0 = arith.constant 0 : index
    %c0_0 = arith.constant 0 : index
    %0 = vector.load %arg1[%c0, %c0_0] : memref<512x196xf32, #tpu.memory_space<vmem>>, vector<512x196xf32>
    %cst = arith.constant dense<0.000000e+00> : vector<512xf32>
    %1 = vector.multi_reduction <add>, %0, %cst [1] : vector<512x196xf32> to vector<512xf32>
    %2 = vector.shape_cast %1 : vector<512xf32> to vector<512x1xf32>
    %cst_1 = arith.constant 0.00510204071 : f32
    %3 = vector.broadcast %cst_1 : f32 to vector<512x1xf32>
    %4 = arith.mulf %2, %3 : vector<512x1xf32>
    %5 = arith.mulf %0, %0 : vector<512x196xf32>
    %cst_2 = arith.constant dense<0.000000e+00> : vector<512xf32>
    %6 = vector.multi_reduction <add>, %5, %cst_2 [1] : vector<512x196xf32> to vector<512xf32>
    %7 = vector.shape_cast %6 : vector<512xf32> to vector<512x1xf32>
    %cst_3 = arith.constant 0.00510204071 : f32
    %8 = vector.broadcast %cst_3 : f32 to vector<512x1xf32>
    %9 = arith.mulf %7, %8 : vector<512x1xf32>
    %10 = arith.mulf %4, %4 : vector<512x1xf32>
    %11 = arith.subf %9, %10 : vector<512x1xf32>
    %c0_4 = arith.constant 0 : index
    %c0_5 = arith.constant 0 : index
    %12 = vector.load %arg2[%c0_4, %c0_5] : memref<512x2xf32, #tpu.memory_space<vmem>>, vector<512x1xf32>
    %c0_6 = arith.constant 0 : index
    %c1 = arith.constant 1 : index
    %13 = vector.load %arg2[%c0_6, %c1] : memref<512x2xf32, #tpu.memory_space<vmem>>, vector<512x1xf32>
    %cst_7 = arith.constant 9.99999974E-6 : f32
    %14 = vector.broadcast %cst_7 : f32 to vector<512x1xf32>
    %15 = arith.addf %11, %14 : vector<512x1xf32>
    %16 = math.rsqrt %15 : vector<512x1xf32>
    %17 = arith.mulf %16, %12 : vector<512x1xf32>
    %18 = arith.mulf %4, %17 : vector<512x1xf32>
    %19 = arith.subf %13, %18 : vector<512x1xf32>
    %c0_8 = arith.constant 0 : index
    %c0_9 = arith.constant 0 : index
    %20 = vector.load %arg1[%c0_8, %c0_9] : memref<512x196xf32, #tpu.memory_space<vmem>>, vector<512x196xf32>
    %21 = vector.broadcast %17 : vector<512x1xf32> to vector<512x196xf32>
    %22 = arith.mulf %20, %21 : vector<512x196xf32>
    %23 = vector.broadcast %19 : vector<512x1xf32> to vector<512x196xf32>
    %24 = arith.addf %22, %23 : vector<512x196xf32>
    %cst_10 = arith.constant 0.000000e+00 : f32
    %25 = vector.broadcast %cst_10 : f32 to vector<512x196xf32>
    %26 = arith.maximumf %24, %25 : vector<512x196xf32>
    %c0_11 = arith.constant 0 : index
    %c0_12 = arith.constant 0 : index
    %27 = vector.load %arg3[%c0_11, %c0_12] : memref<512x196xf32, #tpu.memory_space<vmem>>, vector<512x196xf32>
    tpu.vector_store %arg3[%c0_11, %c0_12], %26 {strides = array<i32>} : memref<512x196xf32, #tpu.memory_space<vmem>>, vector<512x196xf32>,
    return
  }
  func.func @transform_0(%arg0: i32) -> (i32, i32) {
    %c0_i32 = arith.constant 0 : i32
    %c0_i32_0 = arith.constant 0 : i32
    return %arg0, %c0_i32 : i32, i32
  }
  func.func @transform_1(%arg0: i32) -> (i32, i32) {
    %c0_i32 = arith.constant 0 : i32
    %c0_i32_0 = arith.constant 0 : i32
    return %arg0, %c0_i32 : i32, i32
  }
  func.func @transform_2(%arg0: i32) -> (i32, i32) {
    %c0_i32 = arith.constant 0 : i32
    %c0_i32_0 = arith.constant 0 : i32
    return %arg0, %c0_i32 : i32, i32
  }
}

</mosaic_0001>

<bundles_post_ra>
// kernel: tpu_custom_call.1
= control target key start
LH: loop header
LB: loop body
LE: loop exit
PB: predicated region body
PF: predicated region fallthrough
CT: control target
= control target key end

     0   :  { %s3291_s9 = smov 0   ;;  %s6027_s0 = inlined_call_operand.vmem [shape: f32[1024,196], index: 0, kind: input, shape index: {}, may-alias: {0,2}]   ;;  %s6028_s1 = inlined_call_operand.vmem [shape: f32[1024,2], index: 1, kind: input, shape index: {}]   ;;  %s6029_s2 = inlined_call_operand.vmem [shape: f32[1024,196], index: 2, kind: output, shape index: {}, may-alias: {0,2}]  }
   0x1 LB: > { %s3061_s10 = sadd.s32 4294967295, %s3271_s9   ;;  %p3065_p0 = scmp.ge.s32.totalorder %s3271_s9, 1  ;;  %s3271_s9 = sphi %s3291_s9, %s12_s9  }
   0x2   : > { %p125_p1 = scmp.lt.s32.totalorder %s3271_s9, 3 }
   0x4   : > { %p126_p2 = pnand %p3065_p0, %p125_p1 }
   0x6   : > { %129 = sbr.rel (%p126_p2) target bundleno = 837 (0x345), region = 28 }
   0xd   : > { %s3066_s11 = sshll.u32 %s3061_s10, 6  ;;  %vm302_vm0 = vcmask 556032   ;;  %s3273_s20 = smov 1  }
   0xe   : > { %p155_p3 = scmp.lt.s32.totalorder %s3066_s11, 127 }
  0x10   : > { %s6808_s11 = smov (!%p155_p3, %s3066_s11), 127 }
  0x11   : > { %s3076_s12 = sshll.u32 %s6808_s11, 4  ;;  %s3070_s16 = sshll.u32 %s6808_s11, 3 }
  0x12   : > { %s3307_s15 = scalar_lea.vmem %s6027_s0, %s3076_s12  ;;  %s4376_s19 = scalar_lea.vmem %s6028_s1, %s3070_s16 }
  0x13   : > { %v3310_v0 = vld [vmem:[%s3307_s15 + $0x20] sm:$0xff]  ;;  %v3313_v1 = vld [vmem:[%s3307_s15 + $0x28] sm:$0xff]  ;;  %v3324_v5 = vld [vmem:[%s3307_s15 + $0x30] sm:$0xff]  ;;  %s5576_s23 = scalar_lea.vmem %s6029_s2, %s3076_s12 }
  0x14   : > { %6293 = vst [vmem:[#allocation2_spill] sm:$0xff] %v3310_v0  ;;  %6294 = vst [vmem:[#allocation3_spill] sm:$0xff] %v3313_v1  ;;  %v3316_v2 = vld [vmem:[%s3307_s15] sm:$0xff]  ;;  %v311_v3 = vsel %vm302_vm0, %v3313_v1, 0.0  ;;  %v3321_v4 = vld [vmem:[%s3307_s15 + $0x8] sm:$0xff] }
  0x15   : > { %6295 = vst [vmem:[#allocation4_spill] sm:$0xff] %v3324_v5  ;;  %v3327_v6 = vld [vmem:[%s3307_s15 + $0x38] sm:$0xff]  ;;  %v312_v7 = vadd.f32 %v311_v3, %v3310_v0  ;;  %v303_v8 = vsel %vm302_vm0, %v3321_v4, 0.0  ;;  %v3335_v10 = vld [vmem:[%s3307_s15 + $0x10] sm:$0xff]  ;;  %v3347_v15 = vld [vmem:[%s3307_s15 + $0x48] sm:$0xff] }
  0x16   : > { %6296 = vst [vmem:[#allocation5_spill] sm:$0xff] %v3327_v6  ;;  %v315_v9 = vsel %vm302_vm0, %v3327_v6, 0.0  ;;  %v3338_v11 = vld [vmem:[%s3307_s15 + $0x18] sm:$0xff]  ;;  %v304_v12 = vadd.f32 %v303_v8, %v3316_v2  ;;  %v3352_v18 = vld [vmem:[%s3307_s15 + $0x50] sm:$0xff]  ;;  %v3357_v20 = vld [vmem:[%s3307_s15 + $0x40] sm:$0xff]  ;;  %v319_v21 = vsel %vm302_vm0, %v3347_v15, 0.0 }
  0x17   : > { %v307_v13 = vsel %vm302_vm0, %v3338_v11, 0.0  ;;  %v3344_v14 = vld [vmem:[%s3307_s15 + $0x58] sm:$0xff]  ;;  %313 = vadd.xlane.f32.xlu1 %v312_v7  ;;  %v316_v16 = vadd.f32 %v315_v9, %v3324_v5  ;;  %6298 = vst [vmem:[#allocation7_spill] sm:$0xff] %v3352_v18  ;;  %v3365_v23 = vld [vmem:[%s3307_s15 + $0x68] sm:$0xff]  ;;  %v320_v25 = vadd.f32 %v319_v21, %v3357_v20  ;;  %v3370_v26 = vld [vmem:[%s3307_s15 + $0x70] sm:$0xff] }
  0x18   : > { %6297 = vst [vmem:[#allocation6_spill] sm:$0xff] %v3344_v14  ;;  %305 = vadd.xlane.f32.xlu0 %v304_v12  ;;  %v308_v17 = vadd.f32 %v307_v13, %v3335_v10  ;;  %v323_v19 = vsel %vm302_vm0, %v3344_v14, 0.0  ;;  %v3362_v22 = vld [vmem:[%s3307_s15 + $0x78] sm:$0xff]  ;;  %6300 = vst [vmem:[#allocation9_spill] sm:$0xff] %v3365_v23  ;;  %v3375_v28 = vld [vmem:[%s3307_s15 + $0x60] sm:$0xff]  ;;  %v327_v29 = vsel %vm302_vm0, %v3365_v23, 0.0 }
  0x19   : > { %6299 = vst [vmem:[#allocation8_spill] sm:$0xff] %v3362_v22  ;;  %v324_v24 = vadd.f32 %v323_v19, %v3352_v18  ;;  %6301 = vst [vmem:[#allocation10_spill] sm:$0xff] %v3370_v26  ;;  %v331_v27 = vsel %vm302_vm0, %v3362_v22, 0.0  ;;  %v3380_v30 = vld [vmem:[%s3307_s15 + $0x98] sm:$0xff]  ;;  %v3383_v31 = vld [vmem:[%s3307_s15 + $0x88] sm:$0xff]  ;;  %v328_v33 = vadd.f32 %v327_v29, %v3375_v28 }
  0x1a   : > { %6302 = vst [vmem:[#allocation11_spill] sm:$0xff] %v3375_v28  ;;  %6303 = vst [vmem:[#allocation12_spill] sm:$0xff] %v3380_v30  ;;  %v332_v32 = vadd.f32 %v331_v27, %v3370_v26  ;;  %v3388_v34 = vld [vmem:[%s3307_s15 + $0x90] sm:$0xff]  ;;  %v339_v35 = vsel %vm302_vm0, %v3380_v30, 0.0  ;;  %v3393_v36 = vld [vmem:[%s3307_s15 + $0x80] sm:$0xff]  ;;  %v335_v37 = vsel %vm302_vm0, %v3383_v31, 0.0 }
  0x1b   : > { %317 = vadd.xlane.f32.xlu1 %v316_v16  ;;  %6304 = vst [vmem:[#allocation13_spill] sm:$0xff] %v3383_v31  ;;  %6305 = vst [vmem:[#allocation14_spill] sm:$0xff] %v3388_v34  ;;  %v3398_v38 = vld [vmem:[%s3307_s15 + $0xb8] sm:$0xff]  ;;  %v3401_v39 = vld [vmem:[%s3307_s15 + $0xa8] sm:$0xff]  ;;  %v340_v40 = vadd.f32 %v339_v35, %v3388_v34  ;;  %v336_v41 = vadd.f32 %v335_v37, %v3393_v36 }
  0x1c   : > { %309 = vadd.xlane.f32.xlu0 %v308_v17  ;;  %6306 = vst [vmem:[#allocation15_spill] sm:$0xff] %v3393_v36  ;;  %6307 = vst [vmem:[#allocation16_spill] sm:$0xff] %v3398_v38  ;;  %v3406_v42 = vld [vmem:[%s3307_s15 + $0xb0] sm:$0xff]  ;;  %v347_v43 = vsel %vm302_vm0, %v3398_v38, 0.0  ;;  %v3411_v44 = vld [vmem:[%s3307_s15 + $0xa0] sm:$0xff]  ;;  %v343_v45 = vsel %vm302_vm0, %v3401_v39, 0.0 }
  0x1d   : > { %6308 = vst [vmem:[#allocation17_spill] sm:$0xff] %v3401_v39  ;;  %6309 = vst [vmem:[#allocation18_spill] sm:$0xff] %v3406_v42  ;;  %v3416_v46 = vld [vmem:[%s3307_s15 + $0xd8] sm:$0xff]  ;;  %v3419_v47 = vld [vmem:[%s3307_s15 + $0xc8] sm:$0xff]  ;;  %v348_v48 = vadd.f32 %v347_v43, %v3406_v42  ;;  %v344_v49 = vadd.f32 %v343_v45, %v3411_v44 }
  0x1e   : > { %6310 = vst [vmem:[#allocation19_spill] sm:$0xff] %v3411_v44  ;;  %6311 = vst [vmem:[#allocation20_spill] sm:$0xff] %v3416_v46  ;;  %v3424_v50 = vld [vmem:[%s3307_s15 + $0xd0] sm:$0xff]  ;;  %v355_v51 = vsel %vm302_vm0, %v3416_v46, 0.0  ;;  %v3429_v52 = vld [vmem:[%s3307_s15 + $0xc0] sm:$0xff]  ;;  %v351_v53 = vsel %vm302_vm0, %v3419_v47, 0.0 }
  0x1f   : > { %325 = vadd.xlane.f32.xlu1 %v324_v24  ;;  %6312 = vst [vmem:[#allocation21_spill] sm:$0xff] %v3419_v47  ;;  %6313 = vst [vmem:[#allocation22_spill] sm:$0xff] %v3424_v50  ;;  %v3434_v54 = vld [vmem:[%s3307_s15 + $0xf8] sm:$0xff]  ;;  %v3437_v55 = vld [vmem:[%s3307_s15 + $0xe8] sm:$0xff]  ;;  %v356_v56 = vadd.f32 %v355_v51, %v3424_v50  ;;  %v352_v57 = vadd.f32 %v351_v53, %v3429_v52 }
  0x20   : > { %321 = vadd.xlane.f32.xlu0 %v320_v25  ;;  %6314 = vst [vmem:[#allocation23_spill] sm:$0xff] %v3429_v52  ;;  %6315 = vst [vmem:[#allocation24_spill] sm:$0xff] %v3434_v54  ;;  %v3442_v58 = vld [vmem:[%s3307_s15 + $0xf0] sm:$0xff]  ;;  %v363_v59 = vsel %vm302_vm0, %v3434_v54, 0.0  ;;  %v3447_v60 = vld [vmem:[%s3307_s15 + $0xe0] sm:$0xff]  ;;  %v359_v61 = vsel %vm302_vm0, %v3437_v55, 0.0 }
  0x21   : > { %6316 = vst [vmem:[#allocation25_spill] sm:$0xff] %v3437_v55  ;;  %6317 = vst [vmem:[#allocation26_spill] sm:$0xff] %v3442_v58  ;;  %v3452_v62 = vld [vmem:[%s3307_s15 + $0x118] sm:$0xff]  ;;  %v3455_v63 = vld [vmem:[%s3307_s15 + $0x108] sm:$0xff]  ;;  %v364_v3 = vadd.f32 %v363_v59, %v3442_v58  ;;  %v360_v7 = vadd.f32 %v359_v61, %v3447_v60 }
  0x22   : > { %6318 = vst [vmem:[#allocation27_spill] sm:$0xff] %v3447_v60  ;;  %6319 = vst [vmem:[#allocation28_spill] sm:$0xff] %v3452_v62  ;;  %v3460_v8 = vld [vmem:[%s3307_s15 + $0x110] sm:$0xff]  ;;  %v371_v9 = vsel %vm302_vm0, %v3452_v62, 0.0  ;;  %v3465_v12 = vld [vmem:[%s3307_s15 + $0x100] sm:$0xff]  ;;  %v367_v13 = vsel %vm302_vm0, %v3455_v63, 0.0 }
  0x23   : > { %333 = vadd.xlane.f32.xlu1 %v332_v32  ;;  %6320 = vst [vmem:[#allocation29_spill] sm:$0xff] %v3455_v63  ;;  %6321 = vst [vmem:[#allocation30_spill] sm:$0xff] %v3460_v8  ;;  %v3470_v16 = vld [vmem:[%s3307_s15 + $0x138] sm:$0xff]  ;;  %v3473_v17 = vld [vmem:[%s3307_s15 + $0x128] sm:$0xff]  ;;  %v372_v19 = vadd.f32 %v371_v9, %v3460_v8  ;;  %v368_v21 = vadd.f32 %v367_v13, %v3465_v12 }
  0x24   : > { %329 = vadd.xlane.f32.xlu0 %v328_v33  ;;  %6322 = vst [vmem:[#allocation31_spill] sm:$0xff] %v3465_v12  ;;  %6323 = vst [vmem:[#allocation32_spill] sm:$0xff] %v3470_v16  ;;  %v3478_v24 = vld [vmem:[%s3307_s15 + $0x130] sm:$0xff]  ;;  %v379_v25 = vsel %vm302_vm0, %v3470_v16, 0.0  ;;  %v3483_v27 = vld [vmem:[%s3307_s15 + $0x120] sm:$0xff]  ;;  %v375_v29 = vsel %vm302_vm0, %v3473_v17, 0.0 }
  0x25   : > { %6324 = vst [vmem:[#allocation33_spill] sm:$0xff] %v3473_v17  ;;  %6325 = vst [vmem:[#allocation34_spill] sm:$0xff] %v3478_v24  ;;  %v3488_v32 = vld [vmem:[%s3307_s15 + $0x158] sm:$0xff]  ;;  %v3491_v33 = vld [vmem:[%s3307_s15 + $0x148] sm:$0xff]  ;;  %v380_v35 = vadd.f32 %v379_v25, %v3478_v24  ;;  %v376_v37 = vadd.f32 %v375_v29, %v3483_v27 }
  0x26   : > { %6326 = vst [vmem:[#allocation35_spill] sm:$0xff] %v3483_v27  ;;  %6327 = vst [vmem:[#allocation36_spill] sm:$0xff] %v3488_v32  ;;  %v3501_v43 = vld [vmem:[%s3307_s15 + $0x140] sm:$0xff]  ;;  %v383_v45 = vsel %vm302_vm0, %v3491_v33, 0.0 }
  0x27   : > { %341 = vadd.xlane.f32.xlu1 %v340_v40  ;;  %6328 = vst [vmem:[#allocation37_spill] sm:$0xff] %v3491_v33  ;;  %v3496_v40 = vld [vmem:[%s3307_s15 + $0x150] sm:$0xff]  ;;  %6330 = vst [vmem:[#allocation39_spill] sm:$0xff] %v3501_v43  ;;  %v384_v53 = vadd.f32 %v383_v45, %v3501_v43  ;;  %v3519_v59 = vld [vmem:[%s3307_s15 + $0x160] sm:$0xff] }
  0x28   : > { %337 = vadd.xlane.f32.xlu0 %v336_v41  ;;  %6329 = vst [vmem:[#allocation38_spill] sm:$0xff] %v3496_v40  ;;  %v387_v41 = vsel %vm302_vm0, %v3488_v32, 0.0  ;;  %6334 = vst [vmem:[#allocation43_spill] sm:$0xff] %v3519_v59  ;;  %v3537_v25 = vld [vmem:[%s3307_s15 + $0x180] sm:$0xff] }
  0x29   : > { %v388_v51 = vadd.f32 %v387_v41, %v3496_v40  ;;  %6338 = vst [vmem:[#allocation47_spill] sm:$0xff] %v3537_v25 }
  0x2b   : > { %349 = vadd.xlane.f32.xlu1 %v348_v48  ;;  %v3506_v48 = vld [vmem:[%s3307_s15 + $0x178] sm:$0xff] }
  0x2c   : > { %345 = vadd.xlane.f32.xlu0 %v344_v49  ;;  %6331 = vst [vmem:[#allocation40_spill] sm:$0xff] %v3506_v48  ;;  %v3509_v49 = vld [vmem:[%s3307_s15 + $0x168] sm:$0xff] }
  0x2d   : > { %6332 = vst [vmem:[#allocation41_spill] sm:$0xff] %v3509_v49  ;;  %v391_v61 = vsel %vm302_vm0, %v3509_v49, 0.0 }
  0x2e   : > { %v392_v13 = vadd.f32 %v391_v61, %v3519_v59 }
  0x2f   : > { %357 = vadd.xlane.f32.xlu1 %v356_v56  ;;  %v3514_v56 = vld [vmem:[%s3307_s15 + $0x170] sm:$0xff] }
  0x30   : > { %353 = vadd.xlane.f32.xlu0 %v352_v57  ;;  %6333 = vst [vmem:[#allocation42_spill] sm:$0xff] %v3514_v56  ;;  %v395_v57 = vsel %vm302_vm0, %v3506_v48, 0.0 }
  0x31   : > { %v396_v9 = vadd.f32 %v395_v57, %v3514_v56  ;;  %v3555_v57 = vld [vmem:[%s3307_s15 + $0x1a0] sm:$0xff] }
  0x32   : > { %6342 = vst [vmem:[#allocation51_spill] sm:$0xff] %v3555_v57 }
  0x33   : > { %365 = vadd.xlane.f32.xlu1 %v364_v3  ;;  %v3524_v3 = vld [vmem:[%s3307_s15 + $0x198] sm:$0xff] }
  0x34   : > { %361 = vadd.xlane.f32.xlu0 %v360_v7  ;;  %6335 = vst [vmem:[#allocation44_spill] sm:$0xff] %v3524_v3  ;;  %v3527_v7 = vld [vmem:[%s3307_s15 + $0x188] sm:$0xff] }
  0x35   : > { %6336 = vst [vmem:[#allocation45_spill] sm:$0xff] %v3527_v7  ;;  %v399_v29 = vsel %vm302_vm0, %v3527_v7, 0.0  ;;  %v3560_v7 = vld [vmem:[%s3307_s15 + $0x1d8] sm:$0xff] }
  0x36   : > { %v400_v45 = vadd.f32 %v399_v29, %v3537_v25  ;;  %6343 = vst [vmem:[#allocation52_spill] sm:$0xff] %v3560_v7  ;;  %v3568_v29 = vld [vmem:[%s3307_s15 + $0x1d0] sm:$0xff] }
  0x37   : > { %373 = vadd.xlane.f32.xlu1 %v372_v19  ;;  %v3532_v19 = vld [vmem:[%s3307_s15 + $0x190] sm:$0xff]  ;;  %6345 = vst [vmem:[#allocation54_spill] sm:$0xff] %v3568_v29 }
  0x38   : > { %369 = vadd.xlane.f32.xlu0 %v368_v21  ;;  %6337 = vst [vmem:[#allocation46_spill] sm:$0xff] %v3532_v19  ;;  %v403_v21 = vsel %vm302_vm0, %v3524_v3, 0.0  ;;  %v3869_v3 = vld [vmem:[%s3307_s15 + $0x3e8] sm:$0xff] }
  0x39   : > { %v404_v41 = vadd.f32 %v403_v21, %v3532_v19  ;;  %v3578_v19 = vld [vmem:[%s3307_s15 + $0x1f8] sm:$0xff]  ;;  %6412 = vst [vmem:[#allocation121_spill] sm:$0xff] %v3869_v3 }
  0x3a   : > { %6347 = vst [vmem:[#allocation56_spill] sm:$0xff] %v3578_v19 }
  0x3b   : > { %381 = vadd.xlane.f32.xlu1 %v380_v35  ;;  %v3542_v35 = vld [vmem:[%s3307_s15 + $0x1b8] sm:$0xff] }
  0x3c   : > { %377 = vadd.xlane.f32.xlu0 %v376_v37  ;;  %6339 = vst [vmem:[#allocation48_spill] sm:$0xff] %v3542_v35  ;;  %v3545_v37 = vld [vmem:[%s3307_s15 + $0x1a8] sm:$0xff] }
  0x3d   : > { %6340 = vst [vmem:[#allocation49_spill] sm:$0xff] %v3545_v37  ;;  %v407_v61 = vsel %vm302_vm0, %v3545_v37, 0.0  ;;  %v3573_v37 = vld [vmem:[%s3307_s15 + $0x1c0] sm:$0xff] }
  0x3e   : > { %v408_v21 = vadd.f32 %v407_v61, %v3555_v57  ;;  %6346 = vst [vmem:[#allocation55_spill] sm:$0xff] %v3573_v37  ;;  %v3586_v61 = vld [vmem:[%s3307_s15 + $0x1f0] sm:$0xff] }
  0x3f   : > { %389 = vadd.xlane.f32.xlu1 %v388_v51  ;;  %v3550_v51 = vld [vmem:[%s3307_s15 + $0x1b0] sm:$0xff]  ;;  %6349 = vst [vmem:[#allocation58_spill] sm:$0xff] %v3586_v61 }
  0x40   : > { %385 = vadd.xlane.f32.xlu0 %v384_v53  ;;  %6341 = vst [vmem:[#allocation50_spill] sm:$0xff] %v3550_v51  ;;  %v411_v53 = vsel %vm302_vm0, %v3542_v35, 0.0  ;;  %v419_v35 = vsel %vm302_vm0, %v3560_v7, 0.0  ;;  %v427_v7 = vsel %vm302_vm0, %v3578_v19, 0.0 }
  0x43   : > { %397 = vadd.xlane.f32.xlu1 %v396_v9  ;;  %v3563_v9 = vld [vmem:[%s3307_s15 + $0x1c8] sm:$0xff] }
  0x44   : > { %393 = vadd.xlane.f32.xlu0 %v392_v13  ;;  %6344 = vst [vmem:[#allocation53_spill] sm:$0xff] %v3563_v9  ;;  %v412_v13 = vadd.f32 %v411_v53, %v3550_v51  ;;  %v415_v25 = vsel %vm302_vm0, %v3563_v9, 0.0  ;;  %v3591_v9 = vld [vmem:[%s3307_s15 + $0x1e0] sm:$0xff]  ;;  %v3596_v51 = vld [vmem:[%s3307_s15 + $0x218] sm:$0xff] }
  0x45   : > { %v416_v53 = vadd.f32 %v415_v25, %v3573_v37  ;;  %6350 = vst [vmem:[#allocation59_spill] sm:$0xff] %v3591_v9  ;;  %6351 = vst [vmem:[#allocation60_spill] sm:$0xff] %v3596_v51  ;;  %v428_v25 = vadd.f32 %v427_v7, %v3586_v61  ;;  %v435_v19 = vsel %vm302_vm0, %v3596_v51, 0.0  ;;  %v3632_v61 = vld [vmem:[%s3307_s15 + $0x258] sm:$0xff] }
  0x46   : > { %6359 = vst [vmem:[#allocation68_spill] sm:$0xff] %v3632_v61 }
  0x47   : > { %405 = vadd.xlane.f32.xlu1 %v404_v41  ;;  %v3581_v41 = vld [vmem:[%s3307_s15 + $0x1e8] sm:$0xff] }
  0x48   : > { %401 = vadd.xlane.f32.xlu0 %v400_v45  ;;  %6348 = vst [vmem:[#allocation57_spill] sm:$0xff] %v3581_v41  ;;  %v420_v45 = vadd.f32 %v419_v35, %v3568_v29  ;;  %v423_v57 = vsel %vm302_vm0, %v3581_v41, 0.0  ;;  %v3609_v41 = vld [vmem:[%s3307_s15 + $0x200] sm:$0xff]  ;;  %v3614_v29 = vld [vmem:[%s3307_s15 + $0x238] sm:$0xff] }
  0x49   : > { %v424_v35 = vadd.f32 %v423_v57, %v3591_v9  ;;  %6354 = vst [vmem:[#allocation63_spill] sm:$0xff] %v3609_v41  ;;  %6355 = vst [vmem:[#allocation64_spill] sm:$0xff] %v3614_v29  ;;  %v443_v51 = vsel %vm302_vm0, %v3614_v29, 0.0  ;;  %v451_v29 = vsel %vm302_vm0, %v3632_v61, 0.0 }
  0x4b   : > { %413 = vadd.xlane.f32.xlu1 %v412_v13  ;;  %v3599_v13 = vld [vmem:[%s3307_s15 + $0x208] sm:$0xff] }
  0x4c   : > { %409 = vadd.xlane.f32.xlu0 %v408_v21  ;;  %6352 = vst [vmem:[#allocation61_spill] sm:$0xff] %v3599_v13  ;;  %v3604_v21 = vld [vmem:[%s3307_s15 + $0x210] sm:$0xff]  ;;  %v431_v37 = vsel %vm302_vm0, %v3599_v13, 0.0  ;;  %v3627_v13 = vld [vmem:[%s3307_s15 + $0x220] sm:$0xff] }
  0x4d   : > { %6353 = vst [vmem:[#allocation62_spill] sm:$0xff] %v3604_v21  ;;  %v436_v7 = vadd.f32 %v435_v19, %v3604_v21  ;;  %v432_v57 = vadd.f32 %v431_v37, %v3609_v41  ;;  %6358 = vst [vmem:[#allocation67_spill] sm:$0xff] %v3627_v13  ;;  %v3650_v21 = vld [vmem:[%s3307_s15 + $0x278] sm:$0xff] }
  0x4e   : > { %6363 = vst [vmem:[#allocation72_spill] sm:$0xff] %v3650_v21  ;;  %v459_v61 = vsel %vm302_vm0, %v3650_v21, 0.0 }
  0x4f   : > { %421 = vadd.xlane.f32.xlu1 %v420_v45  ;;  %v3617_v45 = vld [vmem:[%s3307_s15 + $0x228] sm:$0xff] }
  0x50   : > { %417 = vadd.xlane.f32.xlu0 %v416_v53  ;;  %6356 = vst [vmem:[#allocation65_spill] sm:$0xff] %v3617_v45  ;;  %v3622_v53 = vld [vmem:[%s3307_s15 + $0x230] sm:$0xff]  ;;  %v439_v9 = vsel %vm302_vm0, %v3617_v45, 0.0  ;;  %v3645_v45 = vld [vmem:[%s3307_s15 + $0x240] sm:$0xff] }
  0x51   : > { %6357 = vst [vmem:[#allocation66_spill] sm:$0xff] %v3622_v53  ;;  %v444_v19 = vadd.f32 %v443_v51, %v3622_v53  ;;  %v440_v37 = vadd.f32 %v439_v9, %v3627_v13  ;;  %6362 = vst [vmem:[#allocation71_spill] sm:$0xff] %v3645_v45  ;;  %v3668_v53 = vld [vmem:[%s3307_s15 + $0x298] sm:$0xff] }
  0x52   : > { %6367 = vst [vmem:[#allocation76_spill] sm:$0xff] %v3668_v53  ;;  %v467_v21 = vsel %vm302_vm0, %v3668_v53, 0.0 }
  0x53   : > { %429 = vadd.xlane.f32.xlu1 %v428_v25  ;;  %v3635_v25 = vld [vmem:[%s3307_s15 + $0x248] sm:$0xff] }
  0x54   : > { %425 = vadd.xlane.f32.xlu0 %v424_v35  ;;  %6360 = vst [vmem:[#allocation69_spill] sm:$0xff] %v3635_v25  ;;  %v3640_v35 = vld [vmem:[%s3307_s15 + $0x250] sm:$0xff]  ;;  %v447_v41 = vsel %vm302_vm0, %v3635_v25, 0.0  ;;  %v3663_v25 = vld [vmem:[%s3307_s15 + $0x260] sm:$0xff] }
  0x55   : > { %6361 = vst [vmem:[#allocation70_spill] sm:$0xff] %v3640_v35  ;;  %v452_v51 = vadd.f32 %v451_v29, %v3640_v35  ;;  %v448_v9 = vadd.f32 %v447_v41, %v3645_v45  ;;  %6366 = vst [vmem:[#allocation75_spill] sm:$0xff] %v3663_v25  ;;  %v3686_v35 = vld [vmem:[%s3307_s15 + $0x2b8] sm:$0xff] }
  0x56   : > { %6371 = vst [vmem:[#allocation80_spill] sm:$0xff] %v3686_v35  ;;  %v475_v53 = vsel %vm302_vm0, %v3686_v35, 0.0 }
  0x57   : > { %437 = vadd.xlane.f32.xlu1 %v436_v7  ;;  %v3653_v7 = vld [vmem:[%s3307_s15 + $0x268] sm:$0xff] }
  0x58   : > { %433 = vadd.xlane.f32.xlu0 %v432_v57  ;;  %6364 = vst [vmem:[#allocation73_spill] sm:$0xff] %v3653_v7  ;;  %v3658_v57 = vld [vmem:[%s3307_s15 + $0x270] sm:$0xff]  ;;  %v455_v13 = vsel %vm302_vm0, %v3653_v7, 0.0  ;;  %v3681_v7 = vld [vmem:[%s3307_s15 + $0x280] sm:$0xff] }
  0x59   : > { %6365 = vst [vmem:[#allocation74_spill] sm:$0xff] %v3658_v57  ;;  %v460_v29 = vadd.f32 %v459_v61, %v3658_v57  ;;  %v456_v41 = vadd.f32 %v455_v13, %v3663_v25  ;;  %6370 = vst [vmem:[#allocation79_spill] sm:$0xff] %v3681_v7  ;;  %v3704_v57 = vld [vmem:[%s3307_s15 + $0x2d8] sm:$0xff] }
  0x5a   : > { %6375 = vst [vmem:[#allocation84_spill] sm:$0xff] %v3704_v57  ;;  %v483_v35 = vsel %vm302_vm0, %v3704_v57, 0.0 }
  0x5b   : > { %445 = vadd.xlane.f32.xlu1 %v444_v19  ;;  %v3671_v19 = vld [vmem:[%s3307_s15 + $0x288] sm:$0xff] }
  0x5c   : > { %441 = vadd.xlane.f32.xlu0 %v440_v37  ;;  %6368 = vst [vmem:[#allocation77_spill] sm:$0xff] %v3671_v19  ;;  %v3676_v37 = vld [vmem:[%s3307_s15 + $0x290] sm:$0xff]  ;;  %v463_v45 = vsel %vm302_vm0, %v3671_v19, 0.0  ;;  %v3699_v19 = vld [vmem:[%s3307_s15 + $0x2a0] sm:$0xff] }
  0x5d   : > { %6369 = vst [vmem:[#allocation78_spill] sm:$0xff] %v3676_v37  ;;  %v468_v61 = vadd.f32 %v467_v21, %v3676_v37  ;;  %v464_v13 = vadd.f32 %v463_v45, %v3681_v7  ;;  %6374 = vst [vmem:[#allocation83_spill] sm:$0xff] %v3699_v19  ;;  %v3722_v37 = vld [vmem:[%s3307_s15 + $0x2f8] sm:$0xff] }
  0x5e   : > { %6379 = vst [vmem:[#allocation88_spill] sm:$0xff] %v3722_v37  ;;  %v491_v57 = vsel %vm302_vm0, %v3722_v37, 0.0 }
  0x5f   : > { %453 = vadd.xlane.f32.xlu1 %v452_v51  ;;  %v3689_v51 = vld [vmem:[%s3307_s15 + $0x2a8] sm:$0xff] }
  0x60   : > { %449 = vadd.xlane.f32.xlu0 %v448_v9  ;;  %6372 = vst [vmem:[#allocation81_spill] sm:$0xff] %v3689_v51  ;;  %v3694_v9 = vld [vmem:[%s3307_s15 + $0x2b0] sm:$0xff]  ;;  %v471_v25 = vsel %vm302_vm0, %v3689_v51, 0.0  ;;  %v3717_v51 = vld [vmem:[%s3307_s15 + $0x2c0] sm:$0xff] }
  0x61   : > { %6373 = vst [vmem:[#allocation82_spill] sm:$0xff] %v3694_v9  ;;  %v476_v21 = vadd.f32 %v475_v53, %v3694_v9  ;;  %v472_v45 = vadd.f32 %v471_v25, %v3699_v19  ;;  %6378 = vst [vmem:[#allocation87_spill] sm:$0xff] %v3717_v51  ;;  %v3740_v9 = vld [vmem:[%s3307_s15 + $0x318] sm:$0xff] }
  0x62   : > { %6383 = vst [vmem:[#allocation92_spill] sm:$0xff] %v3740_v9  ;;  %v499_v37 = vsel %vm302_vm0, %v3740_v9, 0.0 }
  0x63   : > { %461 = vadd.xlane.f32.xlu1 %v460_v29  ;;  %v3707_v29 = vld [vmem:[%s3307_s15 + $0x2c8] sm:$0xff] }
  0x64   : > { %457 = vadd.xlane.f32.xlu0 %v456_v41  ;;  %6376 = vst [vmem:[#allocation85_spill] sm:$0xff] %v3707_v29  ;;  %v3712_v41 = vld [vmem:[%s3307_s15 + $0x2d0] sm:$0xff]  ;;  %v479_v7 = vsel %vm302_vm0, %v3707_v29, 0.0  ;;  %v3735_v29 = vld [vmem:[%s3307_s15 + $0x2e0] sm:$0xff] }
  0x65   : > { %6377 = vst [vmem:[#allocation86_spill] sm:$0xff] %v3712_v41  ;;  %v484_v53 = vadd.f32 %v483_v35, %v3712_v41  ;;  %v480_v25 = vadd.f32 %v479_v7, %v3717_v51  ;;  %6382 = vst [vmem:[#allocation91_spill] sm:$0xff] %v3735_v29  ;;  %v3758_v41 = vld [vmem:[%s3307_s15 + $0x338] sm:$0xff] }
  0x66   : > { %6387 = vst [vmem:[#allocation96_spill] sm:$0xff] %v3758_v41  ;;  %v507_v9 = vsel %vm302_vm0, %v3758_v41, 0.0 }
  0x67   : > { %469 = vadd.xlane.f32.xlu1 %v468_v61  ;;  %v3725_v61 = vld [vmem:[%s3307_s15 + $0x2e8] sm:$0xff] }
  0x68   : > { %465 = vadd.xlane.f32.xlu0 %v464_v13  ;;  %6380 = vst [vmem:[#allocation89_spill] sm:$0xff] %v3725_v61  ;;  %v3730_v13 = vld [vmem:[%s3307_s15 + $0x2f0] sm:$0xff]  ;;  %v487_v19 = vsel %vm302_vm0, %v3725_v61, 0.0  ;;  %v3753_v61 = vld [vmem:[%s3307_s15 + $0x300] sm:$0xff] }
  0x69   : > { %6381 = vst [vmem:[#allocation90_spill] sm:$0xff] %v3730_v13  ;;  %v492_v35 = vadd.f32 %v491_v57, %v3730_v13  ;;  %v488_v7 = vadd.f32 %v487_v19, %v3735_v29  ;;  %6386 = vst [vmem:[#allocation95_spill] sm:$0xff] %v3753_v61  ;;  %v3776_v13 = vld [vmem:[%s3307_s15 + $0x358] sm:$0xff] }
  0x6a   : > { %6391 = vst [vmem:[#allocation100_spill] sm:$0xff] %v3776_v13  ;;  %v515_v41 = vsel %vm302_vm0, %v3776_v13, 0.0 }
  0x6b   : > { %477 = vadd.xlane.f32.xlu1 %v476_v21  ;;  %v3743_v21 = vld [vmem:[%s3307_s15 + $0x308] sm:$0xff] }
  0x6c   : > { %473 = vadd.xlane.f32.xlu0 %v472_v45  ;;  %6384 = vst [vmem:[#allocation93_spill] sm:$0xff] %v3743_v21  ;;  %v3748_v45 = vld [vmem:[%s3307_s15 + $0x310] sm:$0xff]  ;;  %v495_v51 = vsel %vm302_vm0, %v3743_v21, 0.0  ;;  %v3771_v21 = vld [vmem:[%s3307_s15 + $0x320] sm:$0xff] }
  0x6d   : > { %6385 = vst [vmem:[#allocation94_spill] sm:$0xff] %v3748_v45  ;;  %v500_v57 = vadd.f32 %v499_v37, %v3748_v45  ;;  %v496_v19 = vadd.f32 %v495_v51, %v3753_v61  ;;  %6390 = vst [vmem:[#allocation99_spill] sm:$0xff] %v3771_v21  ;;  %v3794_v45 = vld [vmem:[%s3307_s15 + $0x378] sm:$0xff] }
  0x6e   : > { %6395 = vst [vmem:[#allocation104_spill] sm:$0xff] %v3794_v45  ;;  %v523_v13 = vsel %vm302_vm0, %v3794_v45, 0.0 }
  0x6f   : > { %485 = vadd.xlane.f32.xlu1 %v484_v53  ;;  %v3761_v53 = vld [vmem:[%s3307_s15 + $0x328] sm:$0xff] }
  0x70   : > { %481 = vadd.xlane.f32.xlu0 %v480_v25  ;;  %6388 = vst [vmem:[#allocation97_spill] sm:$0xff] %v3761_v53  ;;  %v3766_v25 = vld [vmem:[%s3307_s15 + $0x330] sm:$0xff]  ;;  %v503_v29 = vsel %vm302_vm0, %v3761_v53, 0.0  ;;  %v3789_v53 = vld [vmem:[%s3307_s15 + $0x340] sm:$0xff] }
  0x71   : > { %6389 = vst [vmem:[#allocation98_spill] sm:$0xff] %v3766_v25  ;;  %v508_v37 = vadd.f32 %v507_v9, %v3766_v25  ;;  %v504_v51 = vadd.f32 %v503_v29, %v3771_v21  ;;  %6394 = vst [vmem:[#allocation103_spill] sm:$0xff] %v3789_v53  ;;  %v3812_v25 = vld [vmem:[%s3307_s15 + $0x398] sm:$0xff] }
  0x72   : > { %6399 = vst [vmem:[#allocation108_spill] sm:$0xff] %v3812_v25  ;;  %v531_v45 = vsel %vm302_vm0, %v3812_v25, 0.0 }
  0x73   : > { %493 = vadd.xlane.f32.xlu1 %v492_v35  ;;  %v3779_v35 = vld [vmem:[%s3307_s15 + $0x348] sm:$0xff] }
  0x74   : > { %489 = vadd.xlane.f32.xlu0 %v488_v7  ;;  %6392 = vst [vmem:[#allocation101_spill] sm:$0xff] %v3779_v35  ;;  %v3784_v7 = vld [vmem:[%s3307_s15 + $0x350] sm:$0xff]  ;;  %v511_v61 = vsel %vm302_vm0, %v3779_v35, 0.0  ;;  %v3807_v35 = vld [vmem:[%s3307_s15 + $0x360] sm:$0xff] }
  0x75   : > { %6393 = vst [vmem:[#allocation102_spill] sm:$0xff] %v3784_v7  ;;  %v516_v9 = vadd.f32 %v515_v41, %v3784_v7  ;;  %v512_v29 = vadd.f32 %v511_v61, %v3789_v53  ;;  %6398 = vst [vmem:[#allocation107_spill] sm:$0xff] %v3807_v35  ;;  %v3830_v7 = vld [vmem:[%s3307_s15 + $0x3b8] sm:$0xff] }
  0x76   : > { %6403 = vst [vmem:[#allocation112_spill] sm:$0xff] %v3830_v7  ;;  %v539_v25 = vsel %vm302_vm0, %v3830_v7, 0.0 }
  0x77   : > { %501 = vadd.xlane.f32.xlu1 %v500_v57  ;;  %v3797_v57 = vld [vmem:[%s3307_s15 + $0x368] sm:$0xff] }
  0x78   : > { %497 = vadd.xlane.f32.xlu0 %v496_v19  ;;  %6396 = vst [vmem:[#allocation105_spill] sm:$0xff] %v3797_v57  ;;  %v3802_v19 = vld [vmem:[%s3307_s15 + $0x370] sm:$0xff]  ;;  %v519_v21 = vsel %vm302_vm0, %v3797_v57, 0.0  ;;  %v3825_v57 = vld [vmem:[%s3307_s15 + $0x380] sm:$0xff] }
  0x79   : > { %6397 = vst [vmem:[#allocation106_spill] sm:$0xff] %v3802_v19  ;;  %v524_v41 = vadd.f32 %v523_v13, %v3802_v19  ;;  %v520_v61 = vadd.f32 %v519_v21, %v3807_v35  ;;  %6402 = vst [vmem:[#allocation111_spill] sm:$0xff] %v3825_v57  ;;  %v3848_v19 = vld [vmem:[%s3307_s15 + $0x3d8] sm:$0xff] }
  0x7a   : > { %6407 = vst [vmem:[#allocation116_spill] sm:$0xff] %v3848_v19  ;;  %v547_v7 = vsel %vm302_vm0, %v3848_v19, 0.0  ;;  %v626_v19 = vmul.f32 %v3338_v11, %v3338_v11  ;;  %v623_v11 = vmul.f32 %v3316_v2, %v3316_v2  ;;  %v627_v2 = vmul.f32 %v3310_v0, %v3310_v0 }
  0x7b   : > { %509 = vadd.xlane.f32.xlu1 %v508_v37  ;;  %v3815_v37 = vld [vmem:[%s3307_s15 + $0x388] sm:$0xff] }
  0x7c   : > { %505 = vadd.xlane.f32.xlu0 %v504_v51  ;;  %6400 = vst [vmem:[#allocation109_spill] sm:$0xff] %v3815_v37  ;;  %v3820_v51 = vld [vmem:[%s3307_s15 + $0x390] sm:$0xff]  ;;  %v527_v53 = vsel %vm302_vm0, %v3815_v37, 0.0  ;;  %v3843_v37 = vld [vmem:[%s3307_s15 + $0x3a0] sm:$0xff] }
  0x7d   : > { %6401 = vst [vmem:[#allocation110_spill] sm:$0xff] %v3820_v51  ;;  %v532_v13 = vadd.f32 %v531_v45, %v3820_v51  ;;  %v528_v21 = vadd.f32 %v527_v53, %v3825_v57  ;;  %6406 = vst [vmem:[#allocation115_spill] sm:$0xff] %v3843_v37  ;;  %v3861_v57 = vld [vmem:[%s3307_s15 + $0x3c0] sm:$0xff]  ;;  %v3866_v51 = vld [vmem:[%s3307_s15 + $0x3f8] sm:$0xff] }
  0x7e   : > { %6410 = vst [vmem:[#allocation119_spill] sm:$0xff] %v3861_v57  ;;  %6411 = vst [vmem:[#allocation120_spill] sm:$0xff] %v3866_v51 }
  0x7f   : > { %517 = vadd.xlane.f32.xlu1 %v516_v9  ;;  %v3833_v9 = vld [vmem:[%s3307_s15 + $0x3a8] sm:$0xff] }
  0x80   : > { %513 = vadd.xlane.f32.xlu0 %v512_v29  ;;  %6404 = vst [vmem:[#allocation113_spill] sm:$0xff] %v3833_v9  ;;  %v3838_v29 = vld [vmem:[%s3307_s15 + $0x3b0] sm:$0xff]  ;;  %v535_v35 = vsel %vm302_vm0, %v3833_v9, 0.0 }
  0x81   : > { %6405 = vst [vmem:[#allocation114_spill] sm:$0xff] %v3838_v29  ;;  %v540_v45 = vadd.f32 %v539_v25, %v3838_v29  ;;  %v536_v53 = vadd.f32 %v535_v35, %v3843_v37  ;;  %v3881_v37 = vld [vmem:[%s3307_s15 + $0x3e0] sm:$0xff] }
  0x82   : > { %6414 = vst [vmem:[#allocation123_spill] sm:$0xff] %v3881_v37 }
  0x83   : > { %525 = vadd.xlane.f32.xlu1 %v524_v41  ;;  %v3851_v41 = vld [vmem:[%s3307_s15 + $0x3c8] sm:$0xff] }
  0x84   : > { %521 = vadd.xlane.f32.xlu0 %v520_v61  ;;  %6408 = vst [vmem:[#allocation117_spill] sm:$0xff] %v3851_v41  ;;  %v3856_v61 = vld [vmem:[%s3307_s15 + $0x3d0] sm:$0xff]  ;;  %v543_v9 = vsel %vm302_vm0, %v3851_v41, 0.0  ;;  %v551_v41 = vsel %vm302_vm0, %v3869_v3, 0.0  ;;  %v630_v3 = vmul.f32 %v3327_v6, %v3327_v6 }
  0x85   : > { %6409 = vst [vmem:[#allocation118_spill] sm:$0xff] %v3856_v61  ;;  %v548_v25 = vadd.f32 %v547_v7, %v3856_v61  ;;  %v544_v35 = vadd.f32 %v543_v9, %v3861_v57  ;;  %v625_v9 = vmul.f32 %v3335_v10, %v3335_v10  ;;  %v629_v10 = vmul.f32 %v3324_v5, %v3324_v5  ;;  %v6463_v6 = vld [vmem:[#allocation92_spill] sm:$0xff] }
  0x87   : > { %533 = vadd.xlane.f32.xlu1 %v532_v13  ;;  %v3874_v13 = vld [vmem:[%s3307_s15 + $0x3f0] sm:$0xff] }
  0x88   : > { %529 = vadd.xlane.f32.xlu0 %v528_v21  ;;  %6413 = vst [vmem:[#allocation122_spill] sm:$0xff] %v3874_v13  ;;  %v555_v21 = vsel %vm302_vm0, %v3866_v51, 0.0  ;;  %v755_v51 = vsel %vm302_vm0, %v626_v19, 0.0  ;;  %v763_v19 = vsel %vm302_vm0, %v630_v3, 0.0 }
  0x89   : > { %v556_v7 = vadd.f32 %v555_v21, %v3874_v13 }
  0x8b   : > { %541 = vadd.xlane.f32.xlu1 %v540_v45  ;;  %v624_v45 = vmul.f32 %v3321_v4, %v3321_v4  ;;  %v628_v4 = vmul.f32 %v3313_v1, %v3313_v1  ;;  %v6472_v1 = vld [vmem:[#allocation100_spill] sm:$0xff] }
  0x8c   : > { %537 = vadd.xlane.f32.xlu0 %v536_v53  ;;  %v552_v53 = vadd.f32 %v551_v41, %v3881_v37 }
  0x8d   : > { %v751_v57 = vsel %vm302_vm0, %v624_v45, 0.0  ;;  %v759_v21 = vsel %vm302_vm0, %v628_v4, 0.0  ;;  %v632_v45 = vmul.f32 %v3347_v15, %v3347_v15  ;;  %v636_v15 = vmul.f32 %v3365_v23, %v3365_v23  ;;  %v6467_v23 = vld [vmem:[#allocation96_spill] sm:$0xff] }
  0x8e   : > { %v752_v41 = vadd.f32 %v751_v57, %v623_v11  ;;  %v760_v57 = vadd.f32 %v759_v21, %v627_v2 }
  0x8f   : > { %549 = vadd.xlane.f32.xlu1 %v548_v25  ;;  %v756_v25 = vadd.f32 %v755_v51, %v625_v9  ;;  %v764_v51 = vadd.f32 %v763_v19, %v629_v10  ;;  %v631_v9 = vmul.f32 %v3357_v20, %v3357_v20  ;;  %v767_v11 = vsel %vm302_vm0, %v632_v45, 0.0 }
  0x90   : > { %545 = vadd.xlane.f32.xlu0 %v544_v35  ;;  %v634_v35 = vmul.f32 %v3344_v14, %v3344_v14  ;;  %v635_v20 = vmul.f32 %v3375_v28, %v3375_v28  ;;  %v642_v19 = vmul.f32 %v3380_v30, %v3380_v30  ;;  %v775_v2 = vsel %vm302_vm0, %v636_v15, 0.0  ;;  %v6439_v30 = vld [vmem:[#allocation68_spill] sm:$0xff] }
  0x91   : > { %v768_v10 = vadd.f32 %v767_v11, %v631_v9  ;;  %v641_v45 = vmul.f32 %v3388_v34, %v3388_v34  ;;  %v645_v15 = vmul.f32 %v3406_v42, %v3406_v42  ;;  %v6455_v14 = vld [vmem:[#allocation84_spill] sm:$0xff] }
  0x92   : > { %v771_v3 = vsel %vm302_vm0, %v634_v35, 0.0  ;;  %v640_v35 = vmul.f32 %v3383_v31, %v3383_v31  ;;  %v6459_v31 = vld [vmem:[#allocation88_spill] sm:$0xff] }
  0x93   : > { %557 = vadd.xlane.f32.xlu1 %v556_v7  ;;  %v633_v7 = vmul.f32 %v3352_v18, %v3352_v18 }
  0x94   : > { %553 = vadd.xlane.f32.xlu0 %v552_v53  ;;  %v638_v53 = vmul.f32 %v3362_v22, %v3362_v22  ;;  %v783_v9 = vsel %vm302_vm0, %v640_v35, 0.0  ;;  %v648_v35 = vmul.f32 %v3419_v47, %v3419_v47  ;;  %v6443_v47 = vld [vmem:[#allocation72_spill] sm:$0xff] }
  0x95   : > { %v772_v4 = vadd.f32 %v771_v3, %v633_v7  ;;  %v787_v7 = vsel %vm302_vm0, %v642_v19, 0.0  ;;  %v646_v3 = vmul.f32 %v3398_v38, %v3398_v38  ;;  %v6431_v38 = vld [vmem:[#allocation60_spill] sm:$0xff] }
  0x96   : > { %v788_v11 = vadd.f32 %v787_v7, %v641_v45  ;;  %v649_v45 = vmul.f32 %v3424_v50, %v3424_v50  ;;  %v6447_v22 = vld [vmem:[#allocation76_spill] sm:$0xff] }
  0x97   : > { %757 = vadd.xlane.f32.xlu1 %v756_v25  ;;  %v637_v25 = vmul.f32 %v3370_v26, %v3370_v26 }
  0x98   : > { %753 = vadd.xlane.f32.xlu0 %v752_v41  ;;  %v779_v41 = vsel %vm302_vm0, %v638_v53, 0.0  ;;  %v644_v53 = vmul.f32 %v3401_v39, %v3401_v39  ;;  %v6451_v39 = vld [vmem:[#allocation80_spill] sm:$0xff] }
  0x99   : > { %v780_v21 = vadd.f32 %v779_v41, %v637_v25  ;;  %v643_v41 = vmul.f32 %v3411_v44, %v3411_v44 }
  0x9b   : > { %765 = vadd.xlane.f32.xlu1 %v764_v51  ;;  %v776_v51 = vadd.f32 %v775_v2, %v635_v20  ;;  %v650_v20 = vmul.f32 %v3416_v46, %v3416_v46  ;;  %v791_v2 = vsel %vm302_vm0, %v644_v53, 0.0 }
  0x9c   : > { %761 = vadd.xlane.f32.xlu0 %v760_v57  ;;  %v639_v57 = vmul.f32 %v3393_v36, %v3393_v36  ;;  %v792_v7 = vadd.f32 %v791_v2, %v643_v41 }
  0x9e   : > { %v784_v25 = vadd.f32 %v783_v9, %v639_v57  ;;  %v803_v57 = vsel %vm302_vm0, %v650_v20, 0.0  ;;  %v654_v9 = vmul.f32 %v3434_v54, %v3434_v54  ;;  %v651_v54 = vmul.f32 %v3447_v60, %v3447_v60 }
  0x9f   : > { %773 = vadd.xlane.f32.xlu1 %v772_v4 }
  0xa0   : > { %769 = vadd.xlane.f32.xlu0 %v768_v10  ;;  %v795_v10 = vsel %vm302_vm0, %v646_v3, 0.0  ;;  %v647_v3 = vmul.f32 %v3429_v52, %v3429_v52  ;;  %v811_v2 = vsel %vm302_vm0, %v654_v9, 0.0 }
  0xa3   : > { %781 = vadd.xlane.f32.xlu1 %v780_v21  ;;  %v796_v21 = vadd.f32 %v795_v10, %v645_v15  ;;  %v652_v15 = vmul.f32 %v3437_v55, %v3437_v55  ;;  %v653_v10 = vmul.f32 %v3442_v58, %v3442_v58  ;;  %v6435_v55 = vld [vmem:[#allocation64_spill] sm:$0xff] }
  0xa4   : > { %777 = vadd.xlane.f32.xlu0 %v776_v51  ;;  %v3941_v4 = vpop.xlane.xlu1 %313 }
  0xa5   : > { %v3948_v19 = vpop.xlane.xlu0 %305 }
  0xa7   : > { %789 = vadd.xlane.f32.xlu1 %v788_v11  ;;  %v799_v11 = vsel %vm302_vm0, %v648_v35, 0.0  ;;  %v658_v35 = vmul.f32 %v3452_v62, %v3452_v62  ;;  %v655_v62 = vmul.f32 %v3465_v12, %v3465_v12 }
  0xa8   : > { %785 = vadd.xlane.f32.xlu0 %v784_v25  ;;  %v3955_v51 = vpop.xlane.xlu1 %317  ;;  %v804_v25 = vadd.f32 %v803_v57, %v649_v45  ;;  %v800_v20 = vadd.f32 %v799_v11, %v647_v3  ;;  %v656_v45 = vmul.f32 %v3455_v63, %v3455_v63  ;;  %v657_v57 = vmul.f32 %v3460_v8, %v3460_v8  ;;  %v6427_v63 = vld [vmem:[#allocation56_spill] sm:$0xff] }
  0xa9   : > { %v3962_v53 = vpop.xlane.xlu0 %309  ;;  %v819_v11 = vsel %vm302_vm0, %v658_v35, 0.0 }
  0xab   : > { %797 = vadd.xlane.f32.xlu1 %v796_v21  ;;  %v807_v21 = vsel %vm302_vm0, %v652_v15, 0.0  ;;  %v662_v15 = vmul.f32 %v3470_v16, %v3470_v16  ;;  %v659_v16 = vmul.f32 %v3483_v27, %v3483_v27  ;;  %v6423_v27 = vld [vmem:[#allocation52_spill] sm:$0xff] }
  0xac   : > { %793 = vadd.xlane.f32.xlu0 %v792_v7  ;;  %v3969_v41 = vpop.xlane.xlu1 %325  ;;  %v812_v7 = vadd.f32 %v811_v2, %v653_v10  ;;  %v808_v9 = vadd.f32 %v807_v21, %v651_v54  ;;  %v660_v10 = vmul.f32 %v3473_v17, %v3473_v17  ;;  %v661_v54 = vmul.f32 %v3478_v24, %v3478_v24 }
  0xad   : > { %v3976_v46 = vpop.xlane.xlu0 %321  ;;  %v827_v21 = vsel %vm302_vm0, %v662_v15, 0.0 }
  0xaf   : > { %805 = vadd.xlane.f32.xlu1 %v804_v25  ;;  %v815_v25 = vsel %vm302_vm0, %v656_v45, 0.0  ;;  %v666_v45 = vmul.f32 %v3488_v32, %v3488_v32  ;;  %v663_v32 = vmul.f32 %v3501_v43, %v3501_v43  ;;  %v6419_v43 = vld [vmem:[#allocation48_spill] sm:$0xff] }
  0xb0   : > { %801 = vadd.xlane.f32.xlu0 %v800_v20  ;;  %v3983_v3 = vpop.xlane.xlu1 %333  ;;  %v820_v20 = vadd.f32 %v819_v11, %v657_v57  ;;  %v816_v35 = vadd.f32 %v815_v25, %v655_v62  ;;  %v664_v57 = vmul.f32 %v3491_v33, %v3491_v33  ;;  %v665_v62 = vmul.f32 %v3496_v40, %v3496_v40  ;;  %v6415_v40 = vld [vmem:[#allocation44_spill] sm:$0xff] }
  0xb1   : > { %v3990_v58 = vpop.xlane.xlu0 %329  ;;  %v835_v25 = vsel %vm302_vm0, %v666_v45, 0.0 }
  0xb3   : > { %813 = vadd.xlane.f32.xlu1 %v812_v7  ;;  %v823_v7 = vsel %vm302_vm0, %v660_v10, 0.0  ;;  %v670_v10 = vmul.f32 %v3506_v48, %v3506_v48  ;;  %v667_v48 = vmul.f32 %v3519_v59, %v3519_v59  ;;  %v6418_v59 = vld [vmem:[#allocation47_spill] sm:$0xff] }
  0xb4   : > { %809 = vadd.xlane.f32.xlu0 %v808_v9  ;;  %v3997_v2 = vpop.xlane.xlu1 %341  ;;  %v828_v9 = vadd.f32 %v827_v21, %v661_v54  ;;  %v824_v15 = vadd.f32 %v823_v7, %v659_v16  ;;  %v668_v54 = vmul.f32 %v3509_v49, %v3509_v49  ;;  %v669_v16 = vmul.f32 %v3514_v56, %v3514_v56  ;;  %v6417_v56 = vld [vmem:[#allocation46_spill] sm:$0xff] }
  0xb5   : > { %v4004_v8 = vpop.xlane.xlu0 %337  ;;  %v843_v7 = vsel %vm302_vm0, %v670_v10, 0.0 }
  0xb7   : > { %821 = vadd.xlane.f32.xlu1 %v820_v20  ;;  %v831_v20 = vsel %vm302_vm0, %v664_v57, 0.0  ;;  %v674_v57 = vmul.f32 %v6415_v40, %v6415_v40  ;;  %v671_v40 = vmul.f32 %v6418_v59, %v6418_v59  ;;  %v6422_v59 = vld [vmem:[#allocation51_spill] sm:$0xff] }
  0xb8   : > { %817 = vadd.xlane.f32.xlu0 %v816_v35  ;;  %v4011_v11 = vpop.xlane.xlu1 %349  ;;  %v836_v35 = vadd.f32 %v835_v25, %v665_v62  ;;  %v832_v45 = vadd.f32 %v831_v20, %v663_v32  ;;  %v6416_v62 = vld [vmem:[#allocation45_spill] sm:$0xff]  ;;  %v673_v32 = vmul.f32 %v6417_v56, %v6417_v56  ;;  %v6421_v56 = vld [vmem:[#allocation50_spill] sm:$0xff] }
  0xb9   : > { %v4018_v24 = vpop.xlane.xlu0 %345  ;;  %v672_v25 = vmul.f32 %v6416_v62, %v6416_v62  ;;  %v851_v49 = vsel %vm302_vm0, %v674_v57, 0.0 }
  0xbb   : > { %829 = vadd.xlane.f32.xlu1 %v828_v9  ;;  %v839_v9 = vsel %vm302_vm0, %v668_v54, 0.0  ;;  %v678_v54 = vmul.f32 %v6419_v43, %v6419_v43  ;;  %v675_v43 = vmul.f32 %v6422_v59, %v6422_v59  ;;  %v6426_v59 = vld [vmem:[#allocation55_spill] sm:$0xff] }
  0xbc   : > { %825 = vadd.xlane.f32.xlu0 %v824_v15  ;;  %v4025_v21 = vpop.xlane.xlu1 %357  ;;  %v844_v15 = vadd.f32 %v843_v7, %v669_v16  ;;  %v840_v20 = vadd.f32 %v839_v9, %v667_v48  ;;  %v6420_v16 = vld [vmem:[#allocation49_spill] sm:$0xff]  ;;  %v677_v48 = vmul.f32 %v6421_v56, %v6421_v56  ;;  %v6425_v56 = vld [vmem:[#allocation54_spill] sm:$0xff] }
  0xbd   : > { %v4032_v33 = vpop.xlane.xlu0 %353  ;;  %v676_v7 = vmul.f32 %v6420_v16, %v6420_v16  ;;  %v859_v62 = vsel %vm302_vm0, %v678_v54, 0.0 }
  0xbf   : > { %837 = vadd.xlane.f32.xlu1 %v836_v35  ;;  %v847_v35 = vsel %vm302_vm0, %v672_v25, 0.0  ;;  %v682_v25 = vmul.f32 %v6423_v27, %v6423_v27  ;;  %v679_v27 = vmul.f32 %v6426_v59, %v6426_v59  ;;  %v6430_v59 = vld [vmem:[#allocation59_spill] sm:$0xff] }
  0xc0   : > { %833 = vadd.xlane.f32.xlu0 %v832_v45  ;;  %v4039_v10 = vpop.xlane.xlu1 %365  ;;  %v852_v45 = vadd.f32 %v851_v49, %v673_v32  ;;  %v848_v9 = vadd.f32 %v847_v35, %v671_v40  ;;  %v6424_v49 = vld [vmem:[#allocation53_spill] sm:$0xff]  ;;  %v681_v40 = vmul.f32 %v6425_v56, %v6425_v56  ;;  %v6429_v56 = vld [vmem:[#allocation58_spill] sm:$0xff] }
  0xc1   : > { %v4046_v17 = vpop.xlane.xlu0 %361  ;;  %v680_v32 = vmul.f32 %v6424_v49, %v6424_v49  ;;  %v867_v16 = vsel %vm302_vm0, %v682_v25, 0.0 }
  0xc3   : > { %845 = vadd.xlane.f32.xlu1 %v844_v15  ;;  %v855_v15 = vsel %vm302_vm0, %v676_v7, 0.0  ;;  %v686_v7 = vmul.f32 %v6427_v63, %v6427_v63  ;;  %v683_v63 = vmul.f32 %v6430_v59, %v6430_v59  ;;  %v6434_v59 = vld [vmem:[#allocation63_spill] sm:$0xff] }
  0xc4   : > { %841 = vadd.xlane.f32.xlu0 %v840_v20  ;;  %v4053_v57 = vpop.xlane.xlu1 %373  ;;  %v860_v20 = vadd.f32 %v859_v62, %v677_v48  ;;  %v856_v35 = vadd.f32 %v855_v15, %v675_v43  ;;  %v6428_v62 = vld [vmem:[#allocation57_spill] sm:$0xff]  ;;  %v685_v43 = vmul.f32 %v6429_v56, %v6429_v56  ;;  %v6433_v56 = vld [vmem:[#allocation62_spill] sm:$0xff] }
  0xc5   : > { %v4060_v50 = vpop.xlane.xlu0 %369  ;;  %v684_v48 = vmul.f32 %v6428_v62, %v6428_v62  ;;  %v875_v49 = vsel %vm302_vm0, %v686_v7, 0.0 }
  0xc7   : > { %853 = vadd.xlane.f32.xlu1 %v852_v45  ;;  %v863_v45 = vsel %vm302_vm0, %v680_v32, 0.0  ;;  %v690_v32 = vmul.f32 %v6431_v38, %v6431_v38  ;;  %v687_v38 = vmul.f32 %v6434_v59, %v6434_v59  ;;  %v6438_v59 = vld [vmem:[#allocation67_spill] sm:$0xff] }
  0xc8   : > { %849 = vadd.xlane.f32.xlu0 %v848_v9  ;;  %v4067_v54 = vpop.xlane.xlu1 %381  ;;  %v868_v9 = vadd.f32 %v867_v16, %v681_v40  ;;  %v864_v15 = vadd.f32 %v863_v45, %v679_v27  ;;  %v6432_v16 = vld [vmem:[#allocation61_spill] sm:$0xff]  ;;  %v689_v27 = vmul.f32 %v6433_v56, %v6433_v56  ;;  %v6437_v56 = vld [vmem:[#allocation66_spill] sm:$0xff] }
  0xc9   : > { %v4074_v12 = vpop.xlane.xlu0 %377  ;;  %v688_v40 = vmul.f32 %v6432_v16, %v6432_v16  ;;  %v883_v62 = vsel %vm302_vm0, %v690_v32, 0.0 }
  0xcb   : > { %861 = vadd.xlane.f32.xlu1 %v860_v20  ;;  %v871_v20 = vsel %vm302_vm0, %v684_v48, 0.0  ;;  %v694_v48 = vmul.f32 %v6435_v55, %v6435_v55  ;;  %v691_v55 = vmul.f32 %v6438_v59, %v6438_v59  ;;  %v6442_v59 = vld [vmem:[#allocation71_spill] sm:$0xff] }
  0xcc   : > { %857 = vadd.xlane.f32.xlu0 %v856_v35  ;;  %v4081_v25 = vpop.xlane.xlu1 %389  ;;  %v876_v35 = vadd.f32 %v875_v49, %v685_v43  ;;  %v872_v45 = vadd.f32 %v871_v20, %v683_v63  ;;  %v6436_v49 = vld [vmem:[#allocation65_spill] sm:$0xff]  ;;  %v693_v63 = vmul.f32 %v6437_v56, %v6437_v56  ;;  %v6441_v56 = vld [vmem:[#allocation70_spill] sm:$0xff] }
  0xcd   : > { %v4088_v42 = vpop.xlane.xlu0 %385  ;;  %v692_v43 = vmul.f32 %v6436_v49, %v6436_v49  ;;  %v891_v16 = vsel %vm302_vm0, %v694_v48, 0.0 }
  0xcf   : > { %869 = vadd.xlane.f32.xlu1 %v868_v9  ;;  %v879_v9 = vsel %vm302_vm0, %v688_v40, 0.0  ;;  %v698_v40 = vmul.f32 %v6439_v30, %v6439_v30  ;;  %v695_v30 = vmul.f32 %v6442_v59, %v6442_v59  ;;  %v6446_v59 = vld [vmem:[#allocation75_spill] sm:$0xff] }
  0xd0   : > { %865 = vadd.xlane.f32.xlu0 %v864_v15  ;;  %v4095_v7 = vpop.xlane.xlu1 %397  ;;  %v884_v15 = vadd.f32 %v883_v62, %v689_v27  ;;  %v880_v20 = vadd.f32 %v879_v9, %v687_v38  ;;  %v6440_v62 = vld [vmem:[#allocation69_spill] sm:$0xff]  ;;  %v697_v38 = vmul.f32 %v6441_v56, %v6441_v56  ;;  %v6445_v56 = vld [vmem:[#allocation74_spill] sm:$0xff] }
  0xd1   : > { %v4102_v60 = vpop.xlane.xlu0 %393  ;;  %v696_v27 = vmul.f32 %v6440_v62, %v6440_v62  ;;  %v899_v49 = vsel %vm302_vm0, %v698_v40, 0.0 }
  0xd3   : > { %877 = vadd.xlane.f32.xlu1 %v876_v35  ;;  %v887_v35 = vsel %vm302_vm0, %v692_v43, 0.0  ;;  %v702_v43 = vmul.f32 %v6443_v47, %v6443_v47  ;;  %v699_v47 = vmul.f32 %v6446_v59, %v6446_v59  ;;  %v6450_v59 = vld [vmem:[#allocation79_spill] sm:$0xff] }
  0xd4   : > { %873 = vadd.xlane.f32.xlu0 %v872_v45  ;;  %v4109_v32 = vpop.xlane.xlu1 %405  ;;  %v892_v45 = vadd.f32 %v891_v16, %v693_v63  ;;  %v888_v9 = vadd.f32 %v887_v35, %v691_v55  ;;  %v6444_v16 = vld [vmem:[#allocation73_spill] sm:$0xff]  ;;  %v701_v55 = vmul.f32 %v6445_v56, %v6445_v56  ;;  %v6449_v56 = vld [vmem:[#allocation78_spill] sm:$0xff] }
  0xd5   : > { %v4116_v34 = vpop.xlane.xlu0 %401  ;;  %v700_v63 = vmul.f32 %v6444_v16, %v6444_v16  ;;  %v907_v62 = vsel %vm302_vm0, %v702_v43, 0.0 }
  0xd7   : > { %885 = vadd.xlane.f32.xlu1 %v884_v15  ;;  %v895_v15 = vsel %vm302_vm0, %v696_v27, 0.0  ;;  %v706_v27 = vmul.f32 %v6447_v22, %v6447_v22  ;;  %v703_v22 = vmul.f32 %v6450_v59, %v6450_v59  ;;  %v6454_v59 = vld [vmem:[#allocation83_spill] sm:$0xff] }
  0xd8   : > { %881 = vadd.xlane.f32.xlu0 %v880_v20  ;;  %v4123_v48 = vpop.xlane.xlu1 %413  ;;  %v900_v20 = vadd.f32 %v899_v49, %v697_v38  ;;  %v896_v35 = vadd.f32 %v895_v15, %v695_v30  ;;  %v6448_v49 = vld [vmem:[#allocation77_spill] sm:$0xff]  ;;  %v705_v30 = vmul.f32 %v6449_v56, %v6449_v56  ;;  %v6453_v56 = vld [vmem:[#allocation82_spill] sm:$0xff] }
  0xd9   : > { %v4130_v52 = vpop.xlane.xlu0 %409  ;;  %v704_v38 = vmul.f32 %v6448_v49, %v6448_v49  ;;  %v915_v16 = vsel %vm302_vm0, %v706_v27, 0.0 }
  0xdb   : > { %893 = vadd.xlane.f32.xlu1 %v892_v45  ;;  %v903_v45 = vsel %vm302_vm0, %v700_v63, 0.0  ;;  %v710_v63 = vmul.f32 %v6451_v39, %v6451_v39  ;;  %v707_v39 = vmul.f32 %v6454_v59, %v6454_v59  ;;  %v6458_v59 = vld [vmem:[#allocation87_spill] sm:$0xff] }
  0xdc   : > { %889 = vadd.xlane.f32.xlu0 %v888_v9  ;;  %v4137_v40 = vpop.xlane.xlu1 %421  ;;  %v908_v9 = vadd.f32 %v907_v62, %v701_v55  ;;  %v904_v15 = vadd.f32 %v903_v45, %v699_v47  ;;  %v6452_v62 = vld [vmem:[#allocation81_spill] sm:$0xff]  ;;  %v709_v47 = vmul.f32 %v6453_v56, %v6453_v56  ;;  %v6457_v56 = vld [vmem:[#allocation86_spill] sm:$0xff] }
  0xdd   : > { %v4144_v26 = vpop.xlane.xlu0 %417  ;;  %v708_v55 = vmul.f32 %v6452_v62, %v6452_v62  ;;  %v923_v49 = vsel %vm302_vm0, %v710_v63, 0.0 }
  0xdf   : > { %901 = vadd.xlane.f32.xlu1 %v900_v20  ;;  %v911_v20 = vsel %vm302_vm0, %v704_v38, 0.0  ;;  %v714_v38 = vmul.f32 %v6455_v14, %v6455_v14  ;;  %v711_v14 = vmul.f32 %v6458_v59, %v6458_v59  ;;  %v6462_v59 = vld [vmem:[#allocation91_spill] sm:$0xff] }
  0xe0   : > { %897 = vadd.xlane.f32.xlu0 %v896_v35  ;;  %v4151_v43 = vpop.xlane.xlu1 %429  ;;  %v916_v35 = vadd.f32 %v915_v16, %v705_v30  ;;  %v912_v45 = vadd.f32 %v911_v20, %v703_v22  ;;  %v6456_v16 = vld [vmem:[#allocation85_spill] sm:$0xff]  ;;  %v713_v22 = vmul.f32 %v6457_v56, %v6457_v56  ;;  %v6461_v56 = vld [vmem:[#allocation90_spill] sm:$0xff] }
  0xe1   : > { %v4158_v44 = vpop.xlane.xlu0 %425  ;;  %v712_v30 = vmul.f32 %v6456_v16, %v6456_v16  ;;  %v931_v62 = vsel %vm302_vm0, %v714_v38, 0.0 }
  0xe3   : > { %909 = vadd.xlane.f32.xlu1 %v908_v9  ;;  %v919_v9 = vsel %vm302_vm0, %v708_v55, 0.0  ;;  %v718_v55 = vmul.f32 %v6459_v31, %v6459_v31  ;;  %v715_v31 = vmul.f32 %v6462_v59, %v6462_v59  ;;  %v6466_v59 = vld [vmem:[#allocation95_spill] sm:$0xff] }
  0xe4   : > { %905 = vadd.xlane.f32.xlu0 %v904_v15  ;;  %v4165_v27 = vpop.xlane.xlu1 %437  ;;  %v924_v15 = vadd.f32 %v923_v49, %v709_v47  ;;  %v920_v20 = vadd.f32 %v919_v9, %v707_v39  ;;  %v6460_v49 = vld [vmem:[#allocation89_spill] sm:$0xff]  ;;  %v717_v39 = vmul.f32 %v6461_v56, %v6461_v56  ;;  %v6465_v56 = vld [vmem:[#allocation94_spill] sm:$0xff] }
  0xe5   : > { %v4172_v18 = vpop.xlane.xlu0 %433  ;;  %v716_v47 = vmul.f32 %v6460_v49, %v6460_v49  ;;  %v939_v16 = vsel %vm302_vm0, %v718_v55, 0.0 }
  0xe7   : > { %917 = vadd.xlane.f32.xlu1 %v916_v35  ;;  %v927_v35 = vsel %vm302_vm0, %v712_v30, 0.0  ;;  %v722_v30 = vmul.f32 %v6463_v6, %v6463_v6  ;;  %v719_v6 = vmul.f32 %v6466_v59, %v6466_v59  ;;  %v6471_v59 = vld [vmem:[#allocation99_spill] sm:$0xff] }
  0xe8   : > { %913 = vadd.xlane.f32.xlu0 %v912_v45  ;;  %v4179_v63 = vpop.xlane.xlu1 %445  ;;  %v932_v45 = vadd.f32 %v931_v62, %v713_v22  ;;  %v928_v9 = vadd.f32 %v927_v35, %v711_v14  ;;  %v6464_v62 = vld [vmem:[#allocation93_spill] sm:$0xff]  ;;  %v721_v14 = vmul.f32 %v6465_v56, %v6465_v56  ;;  %v6469_v56 = vld [vmem:[#allocation98_spill] sm:$0xff] }
  0xe9   : > { %v4186_v36 = vpop.xlane.xlu0 %441  ;;  %v720_v22 = vmul.f32 %v6464_v62, %v6464_v62  ;;  %v947_v49 = vsel %vm302_vm0, %v722_v30, 0.0 }
  0xeb   : > { %925 = vadd.xlane.f32.xlu1 %v924_v15  ;;  %v935_v15 = vsel %vm302_vm0, %v716_v47, 0.0  ;;  %v726_v47 = vmul.f32 %v6467_v23, %v6467_v23  ;;  %v723_v23 = vmul.f32 %v6471_v59, %v6471_v59  ;;  %v6477_v59 = vld [vmem:[#allocation103_spill] sm:$0xff] }
  0xec   : > { %921 = vadd.xlane.f32.xlu0 %v920_v20  ;;  %v4193_v38 = vpop.xlane.xlu1 %453  ;;  %v940_v20 = vadd.f32 %v939_v16, %v717_v39  ;;  %v936_v35 = vadd.f32 %v935_v15, %v715_v31  ;;  %v6468_v16 = vld [vmem:[#allocation97_spill] sm:$0xff]  ;;  %v725_v31 = vmul.f32 %v6469_v56, %v6469_v56  ;;  %v6475_v56 = vld [vmem:[#allocation102_spill] sm:$0xff] }
  0xed   : > { %v4200_v5 = vpop.xlane.xlu0 %449  ;;  %v724_v39 = vmul.f32 %v6468_v16, %v6468_v16  ;;  %v955_v62 = vsel %vm302_vm0, %v726_v47, 0.0 }
  0xef   : > { %933 = vadd.xlane.f32.xlu1 %v932_v45  ;;  %v943_v45 = vsel %vm302_vm0, %v720_v22, 0.0  ;;  %v730_v22 = vmul.f32 %v6472_v1, %v6472_v1  ;;  %v727_v1 = vmul.f32 %v6477_v59, %v6477_v59  ;;  %v6483_v59 = vld [vmem:[#allocation107_spill] sm:$0xff] }
  0xf0   : > { %929 = vadd.xlane.f32.xlu0 %v928_v9  ;;  %v4207_v55 = vpop.xlane.xlu1 %461  ;;  %v948_v9 = vadd.f32 %v947_v49, %v721_v14  ;;  %v944_v15 = vadd.f32 %v943_v45, %v719_v6  ;;  %v6474_v49 = vld [vmem:[#allocation101_spill] sm:$0xff]  ;;  %v729_v6 = vmul.f32 %v6475_v56, %v6475_v56  ;;  %v6481_v56 = vld [vmem:[#allocation106_spill] sm:$0xff] }
  0xf1   : > { %v4214_v28 = vpop.xlane.xlu0 %457  ;;  %v728_v14 = vmul.f32 %v6474_v49, %v6474_v49  ;;  %v963_v16 = vsel %vm302_vm0, %v730_v22, 0.0 }
  0xf3   : > { %941 = vadd.xlane.f32.xlu1 %v940_v20  ;;  %v951_v20 = vsel %vm302_vm0, %v724_v39, 0.0 }
  0xf4   : > { %937 = vadd.xlane.f32.xlu0 %v936_v35  ;;  %v4221_v30 = vpop.xlane.xlu1 %469  ;;  %v956_v35 = vadd.f32 %v955_v62, %v725_v31  ;;  %v952_v45 = vadd.f32 %v951_v20, %v723_v23  ;;  %v6480_v62 = vld [vmem:[#allocation105_spill] sm:$0xff]  ;;  %v733_v23 = vmul.f32 %v6481_v56, %v6481_v56  ;;  %v6487_v56 = vld [vmem:[#allocation110_spill] sm:$0xff] }
  0xf5   : > { %6470 = vst [vmem:[#allocation124_spill] sm:$0xff] %v4221_v30  ;;  %v4228_v0 = vpop.xlane.xlu0 %465  ;;  %v732_v31 = vmul.f32 %v6480_v62, %v6480_v62 }
  0xf6   : > { %6473 = vst [vmem:[#allocation125_spill] sm:$0xff] %v4228_v0  ;;  %v6478_v0 = vld [vmem:[#allocation104_spill] sm:$0xff] }
  0xf7   : > { %949 = vadd.xlane.f32.xlu1 %v948_v9  ;;  %v734_v39 = vmul.f32 %v6478_v0, %v6478_v0  ;;  %v959_v9 = vsel %vm302_vm0, %v728_v14, 0.0  ;;  %v731_v0 = vmul.f32 %v6483_v59, %v6483_v59  ;;  %v6488_v59 = vld [vmem:[#allocation111_spill] sm:$0xff] }
  0xf8   : > { %945 = vadd.xlane.f32.xlu0 %v944_v15  ;;  %v4235_v47 = vpop.xlane.xlu1 %477  ;;  %v964_v15 = vadd.f32 %v963_v16, %v729_v6  ;;  %v960_v20 = vadd.f32 %v959_v9, %v727_v1  ;;  %v6486_v16 = vld [vmem:[#allocation109_spill] sm:$0xff]  ;;  %v737_v1 = vmul.f32 %v6487_v56, %v6487_v56 }
  0xf9   : > { %6476 = vst [vmem:[#allocation126_spill] sm:$0xff] %v4235_v47  ;;  %v4242_v30 = vpop.xlane.xlu0 %473  ;;  %v971_v49 = vsel %vm302_vm0, %v734_v39, 0.0  ;;  %v736_v6 = vmul.f32 %v6486_v16, %v6486_v16  ;;  %v6492_v16 = vld [vmem:[#allocation115_spill] sm:$0xff] }
  0xfa   : > { %6479 = vst [vmem:[#allocation127_spill] sm:$0xff] %v4242_v30  ;;  %v6484_v30 = vld [vmem:[#allocation108_spill] sm:$0xff] }
  0xfb   : > { %957 = vadd.xlane.f32.xlu1 %v956_v35  ;;  %v738_v14 = vmul.f32 %v6484_v30, %v6484_v30  ;;  %v967_v35 = vsel %vm302_vm0, %v732_v31, 0.0  ;;  %v735_v30 = vmul.f32 %v6488_v59, %v6488_v59  ;;  %v6493_v59 = vld [vmem:[#allocation116_spill] sm:$0xff] }
  0xfc   : > { %953 = vadd.xlane.f32.xlu0 %v952_v45  ;;  %v4249_v22 = vpop.xlane.xlu1 %485  ;;  %v972_v45 = vadd.f32 %v971_v49, %v733_v23  ;;  %v968_v9 = vadd.f32 %v967_v35, %v731_v0  ;;  %v6491_v49 = vld [vmem:[#allocation113_spill] sm:$0xff]  ;;  %v741_v0 = vmul.f32 %v3838_v29, %v3838_v29 }
  0xfd   : > { %6482 = vst [vmem:[#allocation128_spill] sm:$0xff] %v4249_v22  ;;  %v4256_v47 = vpop.xlane.xlu0 %481  ;;  %v979_v62 = vsel %vm302_vm0, %v738_v14, 0.0  ;;  %v740_v23 = vmul.f32 %v6491_v49, %v6491_v49  ;;  %v6496_v49 = vld [vmem:[#allocation119_spill] sm:$0xff] }
  0xfe   : > { %6485 = vst [vmem:[#allocation129_spill] sm:$0xff] %v4256_v47  ;;  %v6489_v47 = vld [vmem:[#allocation112_spill] sm:$0xff] }
  0xff   : > { %965 = vadd.xlane.f32.xlu1 %v964_v15  ;;  %v742_v31 = vmul.f32 %v6489_v47, %v6489_v47  ;;  %v975_v15 = vsel %vm302_vm0, %v736_v6, 0.0  ;;  %v739_v47 = vmul.f32 %v6492_v16, %v6492_v16  ;;  %v746_v6 = vmul.f32 %v6493_v59, %v6493_v59  ;;  %v6497_v16 = vld [vmem:[#allocation120_spill] sm:$0xff] }
 0x100   : > { %961 = vadd.xlane.f32.xlu0 %v960_v20  ;;  %v4263_v39 = vpop.xlane.xlu1 %493  ;;  %v980_v20 = vadd.f32 %v979_v62, %v737_v1  ;;  %v976_v35 = vadd.f32 %v975_v15, %v735_v30  ;;  %v6495_v62 = vld [vmem:[#allocation117_spill] sm:$0xff]  ;;  %v745_v30 = vmul.f32 %v3856_v61, %v3856_v61  ;;  %v743_v59 = vmul.f32 %v6496_v49, %v6496_v49 }
 0x101   : > { %v4270_v22 = vpop.xlane.xlu0 %489  ;;  %v987_v56 = vsel %vm302_vm0, %v742_v31, 0.0  ;;  %v744_v1 = vmul.f32 %v6495_v62, %v6495_v62  ;;  %v995_v29 = vsel %vm302_vm0, %v746_v6, 0.0  ;;  %v4345_v49 = vmul.f32 0.0051020407, %v3941_v4 }
 0x102   : > { %6490 = vst [vmem:[#allocation130_spill] sm:$0xff] %v4270_v22 }
 0x103   : > { %973 = vadd.xlane.f32.xlu1 %v972_v45  ;;  %v983_v45 = vsel %vm302_vm0, %v740_v23, 0.0  ;;  %v750_v23 = vmul.f32 %v6497_v16, %v6497_v16  ;;  %v747_v16 = vmul.f32 %v3881_v37, %v3881_v37  ;;  %v1073_v4 = vmul.f32 %v4345_v49, %v4345_v49 }
 0x104   : > { %969 = vadd.xlane.f32.xlu0 %v968_v9  ;;  %v4277_v14 = vpop.xlane.xlu1 %501  ;;  %v988_v9 = vadd.f32 %v987_v56, %v741_v0  ;;  %v984_v15 = vadd.f32 %v983_v45, %v739_v47  ;;  %v6499_v56 = vld [vmem:[#allocation121_spill] sm:$0xff]  ;;  %v749_v47 = vmul.f32 %v3874_v13, %v3874_v13 }
 0x105   : > { %v4284_v22 = vpop.xlane.xlu0 %497  ;;  %v748_v0 = vmul.f32 %v6499_v56, %v6499_v56  ;;  %v1003_v61 = vsel %vm302_vm0, %v750_v23, 0.0 }
 0x106   : > { %6494 = vst [vmem:[#allocation131_spill] sm:$0xff] %v4284_v22  ;;  %v1004_v56 = vadd.f32 %v1003_v61, %v749_v47 }
 0x107   : > { %981 = vadd.xlane.f32.xlu1 %v980_v20  ;;  %v991_v20 = vsel %vm302_vm0, %v744_v1, 0.0  ;;  %v999_v1 = vsel %vm302_vm0, %v748_v0, 0.0 }
 0x108   : > { %977 = vadd.xlane.f32.xlu0 %v976_v35  ;;  %v4291_v31 = vpop.xlane.xlu1 %509  ;;  %v996_v35 = vadd.f32 %v995_v29, %v745_v30  ;;  %v992_v45 = vadd.f32 %v991_v20, %v743_v59 }
 0x109   : > { %v4298_v22 = vpop.xlane.xlu0 %505 }
 0x10a   : > { %6498 = vst [vmem:[#allocation132_spill] sm:$0xff] %v4298_v22 }
 0x10b   : > { %989 = vadd.xlane.f32.xlu1 %v988_v9  ;;  %v1000_v9 = vadd.f32 %v999_v1, %v747_v16  ;;  %v4332_v16 = vmul.f32 0.0051020407, %v3962_v53 }
 0x10c   : > { %985 = vadd.xlane.f32.xlu0 %v984_v15  ;;  %v4305_v6 = vpop.xlane.xlu1 %517 }
 0x10d   : > { %6500 = vst [vmem:[#allocation133_spill] sm:$0xff] %v4305_v6  ;;  %v4310_v62 = vpop.xlane.xlu0 %513  ;;  %v1072_v1 = vmul.f32 %v4332_v16, %v4332_v16 }
 0x10e   : > { %6501 = vst [vmem:[#allocation134_spill] sm:$0xff] %v4310_v62 }
 0x10f   : > { %997 = vadd.xlane.f32.xlu1 %v996_v35 }
 0x110   : > { %993 = vadd.xlane.f32.xlu0 %v992_v45  ;;  %v4313_v29 = vpop.xlane.xlu1 %525  ;;  %v4340_v45 = vmul.f32 0.0051020407, %v3955_v51  ;;  %v4352_v51 = vmul.f32 0.0051020407, %v3969_v41 }
 0x111   : > { %6502 = vst [vmem:[#allocation135_spill] sm:$0xff] %v4313_v29  ;;  %v4315_v30 = vpop.xlane.xlu0 %521 }
 0x112   : > { %6503 = vst [vmem:[#allocation136_spill] sm:$0xff] %v4315_v30 }
 0x113   : > { %1005 = vadd.xlane.f32.xlu1 %v1004_v56  ;;  %v4337_v56 = vmul.f32 0.0051020407, %v3948_v19 }
 0x114   : > { %1001 = vadd.xlane.f32.xlu0 %v1000_v9  ;;  %v4317_v59 = vpop.xlane.xlu1 %533 }
 0x115   : > { %6504 = vst [vmem:[#allocation137_spill] sm:$0xff] %v4317_v59  ;;  %v4319_v15 = vpop.xlane.xlu0 %529  ;;  %v1071_v53 = vmul.f32 %v4337_v56, %v4337_v56 }
 0x116   : > { %6505 = vst [vmem:[#allocation138_spill] sm:$0xff] %v4319_v15  ;;  %v4357_v15 = vmul.f32 0.0051020407, %v3976_v46 }
 0x118   : > { %v4321_v23 = vpop.xlane.xlu1 %541  ;;  %v1075_v46 = vmul.f32 %v4357_v15, %v4357_v15 }
 0x119   : > { %6506 = vst [vmem:[#allocation139_spill] sm:$0xff] %v4321_v23  ;;  %v4323_v20 = vpop.xlane.xlu0 %537 }
 0x11a   : > { %6507 = vst [vmem:[#allocation140_spill] sm:$0xff] %v4323_v20 }
 0x11c   : > { %v4325_v13 = vpop.xlane.xlu1 %549 }
 0x11d   : > { %6508 = vst [vmem:[#allocation141_spill] sm:$0xff] %v4325_v13  ;;  %v4327_v0 = vpop.xlane.xlu0 %545  ;;  %v1074_v13 = vmul.f32 %v4340_v45, %v4340_v45 }
 0x11e   : > { %6509 = vst [vmem:[#allocation142_spill] sm:$0xff] %v4327_v0 }
 0x120   : > { %v4329_v61 = vpop.xlane.xlu1 %557 }
 0x121   : > { %6510 = vst [vmem:[#allocation143_spill] sm:$0xff] %v4329_v61  ;;  %v4334_v35 = vpop.xlane.xlu0 %553 }
 0x122   : > { %6511 = vst [vmem:[#allocation144_spill] sm:$0xff] %v4334_v35 }
 0x124   : > { %v758_v47 = vpop.xlane.xlu1 %757 }
 0x125   : > { %v1008_v9 = vmul.f32 0.0051020407, %v758_v47  ;;  %v754_v37 = vpop.xlane.xlu0 %753 }
 0x126   : > { %v1007_v61 = vmul.f32 0.0051020407, %v754_v37 }
 0x127   : > { %v1136_v35 = vsub.f32 %v1008_v9, %v1072_v1  ;;  %v4360_v9 = vmul.f32 0.0051020407, %v3983_v3 }
 0x128   : > { %v1135_v0 = vsub.f32 %v1007_v61, %v1071_v53  ;;  %v766_v19 = vpop.xlane.xlu1 %765 }
 0x129   : > { %v1264_v20 = vadd.f32 1e-05, %v1136_v35  ;;  %v1010_v23 = vmul.f32 0.0051020407, %v766_v19  ;;  %v762_v47 = vpop.xlane.xlu0 %761  ;;  %v1076_v35 = vmul.f32 %v4352_v51, %v4352_v51 }
 0x12a   : > { %v1263_v37 = vadd.f32 1e-05, %v1135_v0  ;;  %v1009_v1 = vmul.f32 0.0051020407, %v762_v47  ;;  %v4368_v0 = vmul.f32 0.0051020407, %v3990_v58  ;;  %v1078_v58 = vmul.f32 %v4360_v9, %v4360_v9 }
 0x12b   : > { %3093 = vrsqrt.f32 %v1264_v20  ;;  %v1138_v61 = vsub.f32 %v1010_v23, %v1074_v13  ;;  %v4371_v20 = vmul.f32 0.0051020407, %v3997_v2 }
 0x12c   : > { %3095 = vrsqrt.f32 %v1263_v37  ;;  %v1137_v41 = vsub.f32 %v1009_v1, %v1073_v4  ;;  %v774_v53 = vpop.xlane.xlu1 %773  ;;  %v1077_v1 = vmul.f32 %v4368_v0, %v4368_v0 }
 0x12d   : > { %v1266_v19 = vadd.f32 1e-05, %v1138_v61  ;;  %v1012_v59 = vmul.f32 0.0051020407, %v774_v53  ;;  %v770_v30 = vpop.xlane.xlu0 %769  ;;  %v4386_v53 = vmul.f32 0.0051020407, %v4011_v11 }
 0x12e   : > { %v1265_v13 = vadd.f32 1e-05, %v1137_v41  ;;  %v1011_v23 = vmul.f32 0.0051020407, %v770_v30  ;;  %v4381_v30 = vmul.f32 0.0051020407, %v4004_v8 }
 0x12f   : > { %3097 = vrsqrt.f32 %v1266_v19  ;;  %v1140_v3 = vsub.f32 %v1012_v59, %v1076_v35  ;;  %v1200_v19 = vld [vmem:[%s4376_s19 + $0x8] sm:$0xff] }
 0x130   : > { %3099 = vrsqrt.f32 %v1265_v13  ;;  %v1139_v47 = vsub.f32 %v1011_v23, %v1075_v46  ;;  %v782_v4 = vpop.xlane.xlu1 %781  ;;  %v1199_v23 = vld [vmem:[%s4376_s19] sm:$0xff] }
 0x131   : > { %v1268_v59 = vadd.f32 1e-05, %v1140_v3  ;;  %v1014_v37 = vmul.f32 0.0051020407, %v782_v4  ;;  %v778_v2 = vpop.xlane.xlu0 %777  ;;  %v1080_v3 = vmul.f32 %v4371_v20, %v4371_v20  ;;  %v1079_v4 = vmul.f32 %v4381_v30, %v4381_v30 }
 0x132   : > { %v1267_v61 = vadd.f32 1e-05, %v1139_v47  ;;  %v1013_v41 = vmul.f32 0.0051020407, %v778_v2 }
 0x133   : > { %3101 = vrsqrt.f32 %v1268_v59  ;;  %v1142_v35 = vsub.f32 %v1014_v37, %v1078_v58  ;;  %v4395_v59 = vmul.f32 0.0051020407, %v4018_v24 }
 0x134   : > { %3103 = vrsqrt.f32 %v1267_v61  ;;  %v1141_v46 = vsub.f32 %v1013_v41, %v1077_v1  ;;  %v790_v13 = vpop.xlane.xlu1 %789  ;;  %v1082_v61 = vmul.f32 %v4386_v53, %v4386_v53 }
 0x135   : > { %v3094_v8 = vpop.eup %3093  ;;  %v1270_v29 = vadd.f32 1e-05, %v1142_v35  ;;  %v1016_v47 = vmul.f32 0.0051020407, %v790_v13  ;;  %v786_v2 = vpop.xlane.xlu0 %785  ;;  %v4404_v35 = vmul.f32 0.0051020407, %v4025_v21  ;;  %v1081_v21 = vmul.f32 %v4395_v59, %v4395_v59 }
 0x136   : > { %v3096_v11 = vpop.eup %3095  ;;  %v1269_v58 = vadd.f32 1e-05, %v1141_v46  ;;  %v1015_v37 = vmul.f32 0.0051020407, %v786_v2  ;;  %v4397_v1 = vmul.f32 %v3094_v8, %v1200_v19  ;;  %v1201_v46 = vld [vmem:[%s4376_s19 + $0x10] sm:$0xff] }
 0x137   : > { %3105 = vrsqrt.f32 %v1270_v29  ;;  %v1144_v41 = vsub.f32 %v1016_v47, %v1080_v3  ;;  %v4401_v62 = vmul.f32 %v3096_v11, %v1199_v23  ;;  %v1202_v3 = vld [vmem:[%s4376_s19 + $0x18] sm:$0xff]  ;;  %v4415_v47 = vmul.f32 0.0051020407, %v4032_v33 }
 0x138   : > { %3107 = vrsqrt.f32 %v1269_v58  ;;  %v1143_v13 = vsub.f32 %v1015_v37, %v1079_v4  ;;  %v798_v6 = vpop.xlane.xlu1 %797  ;;  %v1456_v24 = vmul.f32 %v4397_v1, %v4332_v16  ;;  %v3274_v16 = vmov 0  }
 0x139   : > { %v3098_v19 = vpop.eup %3097  ;;  %v1272_v8 = vadd.f32 1e-05, %v1144_v41  ;;  %v1018_v2 = vmul.f32 0.0051020407, %v798_v6  ;;  %v794_v22 = vpop.xlane.xlu0 %793  ;;  %v1455_v29 = vmul.f32 %v4401_v62, %v4337_v56  ;;  %3089 = vset.pattern.permute.xlu0 %v3274_v16  ;;  %3090 = vset.pattern.permute.xlu1 %v3274_v16  ;;  %v4422_v58 = vmul.f32 0.0051020407, %v4039_v10 }
 0x13a   : > { %v3100_v23 = vpop.eup %3099  ;;  %v1271_v4 = vadd.f32 1e-05, %v1143_v13  ;;  %v1017_v11 = vmul.f32 0.0051020407, %v794_v22  ;;  %1585 = vrot.lane.b32.xlu1 %v1456_v24, %s3273_s20  ;;  %v4424_v22 = vmul.f32 %v3098_v19, %v1202_v3  ;;  %v1203_v41 = vld [vmem:[%s4376_s19 + $0x20] sm:$0xff]  ;;  %v1084_v24 = vmul.f32 %v4404_v35, %v4404_v35 }
 0x13b   : > { %3109 = vrsqrt.f32 %v1272_v8  ;;  %v1146_v6 = vsub.f32 %v1018_v2, %v1082_v61  ;;  %1583 = vrot.lane.b32.xlu0 %v1455_v29, %s3273_s20  ;;  %v4419_v56 = vmul.f32 %v3100_v23, %v1201_v46  ;;  %v1204_v29 = vld [vmem:[%s4376_s19 + $0x28] sm:$0xff]  ;;  %v1083_v23 = vmul.f32 %v4415_v47, %v4415_v47 }
 0x13c   : > { %3111 = vrsqrt.f32 %v1271_v4  ;;  %v1145_v33 = vsub.f32 %v1017_v11, %v1081_v21  ;;  %v806_v37 = vpop.xlane.xlu1 %805  ;;  %v4435_v19 = vmul.f32 0.0051020407, %v4046_v17  ;;  %v4438_v4 = vmul.f32 0.0051020407, %v4053_v57 }
 0x13d   : > { %6512 = vst [vmem:[#allocation145_spill] sm:$0xff] %v4419_v56  ;;  %v3102_v13 = vpop.eup %3101  ;;  %v1274_v61 = vadd.f32 1e-05, %v1146_v6  ;;  %v1020_v8 = vmul.f32 0.0051020407, %v806_v37  ;;  %v802_v2 = vpop.xlane.xlu0 %801  ;;  %v1457_v46 = vmul.f32 %v4419_v56, %v4345_v49  ;;  %v1086_v16 = vmul.f32 %v4422_v58, %v4422_v58 }
 0x13e   : > { %v3104_v10 = vpop.eup %3103  ;;  %v1273_v3 = vadd.f32 1e-05, %v1145_v33  ;;  %v1019_v21 = vmul.f32 0.0051020407, %v802_v2  ;;  %v1458_v17 = vmul.f32 %v4424_v22, %v4340_v45  ;;  %v1205_v33 = vld [vmem:[%s4376_s19 + $0x30] sm:$0xff] }
 0x13f   : > { %3113 = vrsqrt.f32 %v1274_v61  ;;  %v1148_v11 = vsub.f32 %v1020_v8, %v1084_v24  ;;  %1587 = vrot.lane.b32.xlu1 %v1457_v46, %s3273_s20  ;;  %v4441_v49 = vmul.f32 %v3104_v10, %v1203_v41  ;;  %v4450_v8 = vmul.f32 %v3102_v13, %v1204_v29  ;;  %v1206_v41 = vld [vmem:[%s4376_s19 + $0x38] sm:$0xff] }
 0x140   : > { %3115 = vrsqrt.f32 %v1273_v3  ;;  %v1147_v6 = vsub.f32 %v1019_v21, %v1083_v23  ;;  %v814_v37 = vpop.xlane.xlu1 %813  ;;  %v1085_v10 = vmul.f32 %v4435_v19, %v4435_v19  ;;  %v4456_v23 = vmul.f32 0.0051020407, %v4060_v50 }
 0x141   : > { %6513 = vst [vmem:[#allocation146_spill] sm:$0xff] %v4441_v49  ;;  %v3106_v2 = vpop.eup %3105  ;;  %v1276_v57 = vadd.f32 1e-05, %v1148_v11  ;;  %v1022_v56 = vmul.f32 0.0051020407, %v814_v37  ;;  %v810_v61 = vpop.xlane.xlu0 %809  ;;  %v1459_v24 = vmul.f32 %v4441_v49, %v4357_v15  ;;  %v1088_v21 = vmul.f32 %v4438_v4, %v4438_v4  ;;  %v1207_v37 = vld [vmem:[%s4376_s19 + $0x40] sm:$0xff] }
 0x142   : > { %v3108_v46 = vpop.eup %3107  ;;  %v1275_v45 = vadd.f32 1e-05, %v1147_v6  ;;  %v1021_v3 = vmul.f32 0.0051020407, %v810_v61  ;;  %v4465_v13 = vmul.f32 0.0051020407, %v4067_v54  ;;  %v4467_v6 = vmul.f32 %v3106_v2, %v1206_v41 }
 0x143   : > { %3117 = vrsqrt.f32 %v1276_v57  ;;  %v1150_v11 = vsub.f32 %v1022_v56, %v1086_v16  ;;  %1589 = vrot.lane.b32.xlu1 %v1458_v17, %s3273_s20  ;;  %1591 = vrot.lane.b32.xlu0 %v1459_v24, %s3273_s20  ;;  %v4462_v15 = vmul.f32 %v3108_v46, %v1205_v33  ;;  %v1460_v16 = vmul.f32 %v4450_v8, %v4352_v51  ;;  %v1208_v33 = vld [vmem:[%s4376_s19 + $0x48] sm:$0xff] }
 0x144   : > { %3119 = vrsqrt.f32 %v1275_v45  ;;  %v1149_v50 = vsub.f32 %v1021_v3, %v1085_v10  ;;  %v822_v29 = vpop.xlane.xlu1 %821  ;;  %v1087_v54 = vmul.f32 %v4456_v23, %v4456_v23  ;;  %v4478_v2 = vmul.f32 0.0051020407, %v4074_v12 }
 0x145   : > { %v3110_v61 = vpop.eup %3109  ;;  %v1278_v49 = vadd.f32 1e-05, %v1150_v11  ;;  %v1024_v57 = vmul.f32 0.0051020407, %v822_v29  ;;  %v818_v56 = vpop.xlane.xlu0 %817  ;;  %v1461_v17 = vmul.f32 %v4462_v15, %v4368_v0  ;;  %v4481_v10 = vmul.f32 0.0051020407, %v4081_v25 }
 0x146   : > { %v3112_v24 = vpop.eup %3111  ;;  %v1277_v41 = vadd.f32 1e-05, %v1149_v50  ;;  %v1023_v46 = vmul.f32 0.0051020407, %v818_v56  ;;  %v1090_v0 = vmul.f32 %v4465_v13, %v4465_v13  ;;  %v1462_v11 = vmul.f32 %v4467_v6, %v4360_v9  ;;  %v1209_v25 = vld [vmem:[%s4376_s19 + $0x50] sm:$0xff] }
 0x147   : > { %3121 = vrsqrt.f32 %v1278_v49  ;;  %v1152_v45 = vsub.f32 %v1024_v57, %v1088_v21  ;;  %1593 = vrot.lane.b32.xlu1 %v1460_v16, %s3273_s20  ;;  %1595 = vrot.lane.b32.xlu0 %v1461_v17, %s3273_s20  ;;  %v4485_v51 = vmul.f32 %v3112_v24, %v1207_v37  ;;  %v4494_v56 = vmul.f32 %v3110_v61, %v1208_v33  ;;  %v1210_v37 = vld [vmem:[%s4376_s19 + $0x58] sm:$0xff] }
 0x148   : > { %3123 = vrsqrt.f32 %v1277_v41  ;;  %v1151_v12 = vsub.f32 %v1023_v46, %v1087_v54  ;;  %v830_v3 = vpop.xlane.xlu1 %829  ;;  %v1089_v17 = vmul.f32 %v4478_v2, %v4478_v2  ;;  %v4500_v24 = vmul.f32 0.0051020407, %v4088_v42 }
 0x149   : > { %v3114_v50 = vpop.eup %3113  ;;  %v1280_v49 = vadd.f32 1e-05, %v1152_v45  ;;  %v1026_v21 = vmul.f32 0.0051020407, %v830_v3  ;;  %v826_v29 = vpop.xlane.xlu0 %825  ;;  %v1463_v57 = vmul.f32 %v4485_v51, %v4381_v30  ;;  %v1092_v41 = vmul.f32 %v4481_v10, %v4481_v10 }
 0x14a   : > { %v3116_v16 = vpop.eup %3115  ;;  %v1279_v9 = vadd.f32 1e-05, %v1151_v12  ;;  %v1025_v54 = vmul.f32 0.0051020407, %v826_v29  ;;  %v4509_v61 = vmul.f32 0.0051020407, %v4095_v7  ;;  %v4511_v45 = vmul.f32 %v3114_v50, %v1210_v37 }
 0x14b   : > { %3125 = vrsqrt.f32 %v1280_v49  ;;  %v1154_v46 = vsub.f32 %v1026_v21, %v1090_v0  ;;  %1597 = vrot.lane.b32.xlu1 %v1462_v11, %s3273_s20  ;;  %1599 = vrot.lane.b32.xlu0 %v1463_v57, %s3273_s20  ;;  %v4506_v30 = vmul.f32 %v3116_v16, %v1209_v25  ;;  %v1211_v12 = vld [vmem:[%s4376_s19 + $0x60] sm:$0xff]  ;;  %v1464_v11 = vmul.f32 %v4494_v56, %v4371_v20  ;;  %v1212_v21 = vld [vmem:[%s4376_s19 + $0x68] sm:$0xff] }
 0x14c   : > { %3127 = vrsqrt.f32 %v1279_v9  ;;  %v1153_v42 = vsub.f32 %v1025_v54, %v1089_v17  ;;  %v838_v33 = vpop.xlane.xlu1 %837  ;;  %v1091_v7 = vmul.f32 %v4500_v24, %v4500_v24  ;;  %v4522_v50 = vmul.f32 0.0051020407, %v4102_v60 }
 0x14d   : > { %v3118_v3 = vpop.eup %3117  ;;  %v1282_v29 = vadd.f32 1e-05, %v1154_v46  ;;  %v1028_v49 = vmul.f32 0.0051020407, %v838_v33  ;;  %v834_v0 = vpop.xlane.xlu0 %833  ;;  %v1465_v25 = vmul.f32 %v4506_v30, %v4395_v59  ;;  %v4525_v17 = vmul.f32 0.0051020407, %v4109_v32 }
 0x14e   : > { %v3120_v57 = vpop.eup %3119  ;;  %v1281_v37 = vadd.f32 1e-05, %v1153_v42  ;;  %v1027_v16 = vmul.f32 0.0051020407, %v834_v0  ;;  %v1094_v59 = vmul.f32 %v4509_v61, %v4509_v61  ;;  %v1466_v46 = vmul.f32 %v4511_v45, %v4386_v53  ;;  %v1213_v32 = vld [vmem:[%s4376_s19 + $0x70] sm:$0xff] }
 0x14f   : > { %3129 = vrsqrt.f32 %v1282_v29  ;;  %v1156_v9 = vsub.f32 %v1028_v49, %v1092_v41  ;;  %1601 = vrot.lane.b32.xlu1 %v1464_v11, %s3273_s20  ;;  %1603 = vrot.lane.b32.xlu0 %v1465_v25, %s3273_s20  ;;  %v4529_v20 = vmul.f32 %v3120_v57, %v1211_v12  ;;  %v4538_v0 = vmul.f32 %v3118_v3, %v1212_v21  ;;  %v1214_v12 = vld [vmem:[%s4376_s19 + $0x78] sm:$0xff] }
 0x150   : > { %3131 = vrsqrt.f32 %v1281_v37  ;;  %v1155_v60 = vsub.f32 %v1027_v16, %v1091_v7  ;;  %v846_v54 = vpop.xlane.xlu1 %845  ;;  %v1093_v25 = vmul.f32 %v4522_v50, %v4522_v50  ;;  %v4544_v57 = vmul.f32 0.0051020407, %v4116_v34 }
 0x151   : > { %v3122_v42 = vpop.eup %3121  ;;  %v1284_v33 = vadd.f32 1e-05, %v1156_v9  ;;  %v1030_v41 = vmul.f32 0.0051020407, %v846_v54  ;;  %v842_v29 = vpop.xlane.xlu0 %841  ;;  %v1467_v49 = vmul.f32 %v4529_v20, %v4415_v47  ;;  %v1096_v37 = vmul.f32 %v4525_v17, %v4525_v17 }
 0x152   : > { %v3124_v11 = vpop.eup %3123  ;;  %v1283_v53 = vadd.f32 1e-05, %v1155_v60  ;;  %v1029_v7 = vmul.f32 0.0051020407, %v842_v29  ;;  %v4553_v3 = vmul.f32 0.0051020407, %v4123_v48  ;;  %v4555_v9 = vmul.f32 %v3122_v42, %v1214_v12 }
 0x153   : > { %3133 = vrsqrt.f32 %v1284_v33  ;;  %v1158_v16 = vsub.f32 %v1030_v41, %v1094_v59  ;;  %1605 = vrot.lane.b32.xlu1 %v1466_v46, %s3273_s20  ;;  %1607 = vrot.lane.b32.xlu0 %v1467_v49, %s3273_s20  ;;  %v4550_v47 = vmul.f32 %v3124_v11, %v1213_v32  ;;  %v1215_v60 = vld [vmem:[%s4376_s19 + $0x80] sm:$0xff]  ;;  %v1468_v46 = vmul.f32 %v4538_v0, %v4404_v35  ;;  %v1216_v41 = vld [vmem:[%s4376_s19 + $0x88] sm:$0xff] }
 0x154   : > { %3135 = vrsqrt.f32 %v1283_v53  ;;  %v1157_v34 = vsub.f32 %v1029_v7, %v1093_v25  ;;  %v854_v21 = vpop.xlane.xlu1 %853  ;;  %v1095_v48 = vmul.f32 %v4544_v57, %v4544_v57  ;;  %v4566_v42 = vmul.f32 0.0051020407, %v4130_v52 }
 0x155   : > { %v3126_v54 = vpop.eup %3125  ;;  %v1286_v29 = vadd.f32 1e-05, %v1158_v16  ;;  %v1032_v33 = vmul.f32 0.0051020407, %v854_v21  ;;  %v850_v59 = vpop.xlane.xlu0 %849  ;;  %v1469_v32 = vmul.f32 %v4550_v47, %v4435_v19  ;;  %v4569_v25 = vmul.f32 0.0051020407, %v4137_v40 }
 0x156   : > { %v3128_v49 = vpop.eup %3127  ;;  %v1285_v12 = vadd.f32 1e-05, %v1157_v34  ;;  %v1031_v11 = vmul.f32 0.0051020407, %v850_v59  ;;  %v1098_v19 = vmul.f32 %v4553_v3, %v4553_v3  ;;  %v1470_v16 = vmul.f32 %v4555_v9, %v4422_v58  ;;  %v1217_v40 = vld [vmem:[%s4376_s19 + $0x90] sm:$0xff] }
 0x157   : > { %3137 = vrsqrt.f32 %v1286_v29  ;;  %v1160_v53 = vsub.f32 %v1032_v33, %v1096_v37  ;;  %1609 = vrot.lane.b32.xlu1 %v1468_v46, %s3273_s20  ;;  %1611 = vrot.lane.b32.xlu0 %v1469_v32, %s3273_s20  ;;  %v4573_v35 = vmul.f32 %v3128_v49, %v1215_v60  ;;  %v4582_v59 = vmul.f32 %v3126_v54, %v1216_v41  ;;  %v1218_v60 = vld [vmem:[%s4376_s19 + $0x98] sm:$0xff] }
 0x158   : > { %3139 = vrsqrt.f32 %v1285_v12  ;;  %v1159_v52 = vsub.f32 %v1031_v11, %v1095_v48  ;;  %v862_v7 = vpop.xlane.xlu1 %861  ;;  %v1097_v32 = vmul.f32 %v4566_v42, %v4566_v42  ;;  %v4588_v49 = vmul.f32 0.0051020407, %v4144_v26 }
 0x159   : > { %v3130_v34 = vpop.eup %3129  ;;  %v1288_v21 = vadd.f32 1e-05, %v1160_v53  ;;  %v1034_v37 = vmul.f32 0.0051020407, %v862_v7  ;;  %v858_v29 = vpop.xlane.xlu0 %857  ;;  %v1471_v33 = vmul.f32 %v4573_v35, %v4456_v23  ;;  %v1100_v12 = vmul.f32 %v4569_v25, %v4569_v25 }
 0x15a   : > { %v3132_v46 = vpop.eup %3131  ;;  %v1287_v58 = vadd.f32 1e-05, %v1159_v52  ;;  %v1033_v48 = vmul.f32 0.0051020407, %v858_v29  ;;  %v4597_v54 = vmul.f32 0.0051020407, %v4151_v43  ;;  %v4599_v53 = vmul.f32 %v3130_v34, %v1218_v60 }
 0x15b   : > { %3141 = vrsqrt.f32 %v1288_v21  ;;  %v1162_v11 = vsub.f32 %v1034_v37, %v1098_v19  ;;  %1613 = vrot.lane.b32.xlu1 %v1470_v16, %s3273_s20  ;;  %1615 = vrot.lane.b32.xlu0 %v1471_v33, %s3273_s20  ;;  %v4594_v23 = vmul.f32 %v3132_v46, %v1217_v40  ;;  %v1219_v52 = vld [vmem:[%s4376_s19 + $0xa0] sm:$0xff]  ;;  %v1472_v16 = vmul.f32 %v4582_v59, %v4438_v4  ;;  %v1220_v37 = vld [vmem:[%s4376_s19 + $0xa8] sm:$0xff] }
 0x15c   : > { %3143 = vrsqrt.f32 %v1287_v58  ;;  %v1161_v26 = vsub.f32 %v1033_v48, %v1097_v32  ;;  %v870_v41 = vpop.xlane.xlu1 %869  ;;  %v1099_v43 = vmul.f32 %v4588_v49, %v4588_v49  ;;  %v4610_v34 = vmul.f32 0.0051020407, %v4158_v44 }
 0x15d   : > { %v3134_v7 = vpop.eup %3133  ;;  %v1290_v29 = vadd.f32 1e-05, %v1162_v11  ;;  %v1036_v21 = vmul.f32 0.0051020407, %v870_v41  ;;  %v866_v19 = vpop.xlane.xlu0 %865  ;;  %v1473_v40 = vmul.f32 %v4594_v23, %v4478_v2  ;;  %v4613_v32 = vmul.f32 0.0051020407, %v4165_v27 }
 0x15e   : > { %v3136_v33 = vpop.eup %3135  ;;  %v1289_v60 = vadd.f32 1e-05, %v1161_v26  ;;  %v1035_v46 = vmul.f32 0.0051020407, %v866_v19  ;;  %v1102_v2 = vmul.f32 %v4597_v54, %v4597_v54  ;;  %v1474_v11 = vmul.f32 %v4599_v53, %v4465_v13  ;;  %v1221_v27 = vld [vmem:[%s4376_s19 + $0xb0] sm:$0xff] }
 0x15f   : > { %3145 = vrsqrt.f32 %v1290_v29  ;;  %v1164_v58 = vsub.f32 %v1036_v21, %v1100_v12  ;;  %1617 = vrot.lane.b32.xlu1 %v1472_v16, %s3273_s20  ;;  %1619 = vrot.lane.b32.xlu0 %v1473_v40, %s3273_s20  ;;  %v4617_v4 = vmul.f32 %v3136_v33, %v1219_v52  ;;  %v4626_v19 = vmul.f32 %v3134_v7, %v1220_v37  ;;  %v1222_v52 = vld [vmem:[%s4376_s19 + $0xb8] sm:$0xff] }
 0x160   : > { %3147 = vrsqrt.f32 %v1289_v60  ;;  %v1163_v44 = vsub.f32 %v1035_v46, %v1099_v43  ;;  %v878_v48 = vpop.xlane.xlu1 %877  ;;  %v1101_v40 = vmul.f32 %v4610_v34, %v4610_v34  ;;  %v4632_v33 = vmul.f32 0.0051020407, %v4172_v18 }
 0x161   : > { %v3138_v26 = vpop.eup %3137  ;;  %v1292_v41 = vadd.f32 1e-05, %v1164_v58  ;;  %v1038_v12 = vmul.f32 0.0051020407, %v878_v48  ;;  %v874_v29 = vpop.xlane.xlu0 %873  ;;  %v1475_v21 = vmul.f32 %v4617_v4, %v4500_v24  ;;  %v1104_v60 = vmul.f32 %v4613_v32, %v4613_v32 }
 0x162   : > { %v3140_v16 = vpop.eup %3139  ;;  %v1291_v13 = vadd.f32 1e-05, %v1163_v44  ;;  %v1037_v43 = vmul.f32 0.0051020407, %v874_v29  ;;  %v4641_v7 = vmul.f32 0.0051020407, %v4179_v63  ;;  %v4643_v58 = vmul.f32 %v3138_v26, %v1222_v52 }
 0x163   : > { %3149 = vrsqrt.f32 %v1292_v41  ;;  %v1166_v46 = vsub.f32 %v1038_v12, %v1102_v2  ;;  %1621 = vrot.lane.b32.xlu1 %v1474_v11, %s3273_s20  ;;  %1623 = vrot.lane.b32.xlu0 %v1475_v21, %s3273_s20  ;;  %v4638_v24 = vmul.f32 %v3140_v16, %v1221_v27  ;;  %v1223_v44 = vld [vmem:[%s4376_s19 + $0xc0] sm:$0xff]  ;;  %v1476_v11 = vmul.f32 %v4626_v19, %v4481_v10  ;;  %v1224_v12 = vld [vmem:[%s4376_s19 + $0xc8] sm:$0xff] }
 0x164   : > { %3151 = vrsqrt.f32 %v1291_v13  ;;  %v1165_v18 = vsub.f32 %v1037_v43, %v1101_v40  ;;  %v886_v37 = vpop.xlane.xlu1 %885  ;;  %v1103_v63 = vmul.f32 %v4632_v33, %v4632_v33  ;;  %v4654_v26 = vmul.f32 0.0051020407, %v4186_v36 }
 0x165   : > { %v3142_v48 = vpop.eup %3141  ;;  %v1294_v29 = vadd.f32 1e-05, %v1166_v46  ;;  %v1040_v41 = vmul.f32 0.0051020407, %v886_v37  ;;  %v882_v2 = vpop.xlane.xlu0 %881  ;;  %v1477_v27 = vmul.f32 %v4638_v24, %v4522_v50  ;;  %v4657_v40 = vmul.f32 0.0051020407, %v4193_v38 }
 0x166   : > { %v3144_v21 = vpop.eup %3143  ;;  %v1293_v52 = vadd.f32 1e-05, %v1165_v18  ;;  %v1039_v16 = vmul.f32 0.0051020407, %v882_v2  ;;  %v1106_v50 = vmul.f32 %v4641_v7, %v4641_v7  ;;  %v1478_v46 = vmul.f32 %v4643_v58, %v4509_v61  ;;  %v1225_v38 = vld [vmem:[%s4376_s19 + $0xd0] sm:$0xff] }
 0x167   : > { %3153 = vrsqrt.f32 %v1294_v29  ;;  %v1168_v13 = vsub.f32 %v1040_v41, %v1104_v60  ;;  %1625 = vrot.lane.b32.xlu1 %v1476_v11, %s3273_s20  ;;  %1627 = vrot.lane.b32.xlu0 %v1477_v27, %s3273_s20  ;;  %v4661_v10 = vmul.f32 %v3144_v21, %v1223_v44  ;;  %v4670_v2 = vmul.f32 %v3142_v48, %v1224_v12  ;;  %v1226_v44 = vld [vmem:[%s4376_s19 + $0xd8] sm:$0xff] }
 0x168   : > { %3155 = vrsqrt.f32 %v1293_v52  ;;  %v1167_v36 = vsub.f32 %v1039_v16, %v1103_v63  ;;  %v894_v43 = vpop.xlane.xlu1 %893  ;;  %v1105_v27 = vmul.f32 %v4654_v26, %v4654_v26  ;;  %v4676_v21 = vmul.f32 0.0051020407, %v4200_v5 }
 0x169   : > { %v3146_v18 = vpop.eup %3145  ;;  %v1296_v37 = vadd.f32 1e-05, %v1168_v13  ;;  %v1042_v60 = vmul.f32 0.0051020407, %v894_v43  ;;  %v890_v29 = vpop.xlane.xlu0 %889  ;;  %v1479_v41 = vmul.f32 %v4661_v10, %v4544_v57  ;;  %v1108_v52 = vmul.f32 %v4657_v40, %v4657_v40 }
 0x16a   : > { %v3148_v11 = vpop.eup %3147  ;;  %v1295_v61 = vadd.f32 1e-05, %v1167_v36  ;;  %v1041_v63 = vmul.f32 0.0051020407, %v890_v29  ;;  %v4685_v48 = vmul.f32 0.0051020407, %v4207_v55  ;;  %v4687_v13 = vmul.f32 %v3146_v18, %v1226_v44 }
 0x16b   : > { %3157 = vrsqrt.f32 %v1296_v37  ;;  %v1170_v16 = vsub.f32 %v1042_v60, %v1106_v50  ;;  %1629 = vrot.lane.b32.xlu1 %v1478_v46, %s3273_s20  ;;  %1631 = vrot.lane.b32.xlu0 %v1479_v41, %s3273_s20  ;;  %v4682_v57 = vmul.f32 %v3148_v11, %v1225_v38  ;;  %v1227_v36 = vld [vmem:[%s4376_s19 + $0xe0] sm:$0xff]  ;;  %v1480_v46 = vmul.f32 %v4670_v2, %v4525_v17  ;;  %v1228_v60 = vld [vmem:[%s4376_s19 + $0xe8] sm:$0xff] }
 0x16c   : > { %3159 = vrsqrt.f32 %v1295_v61  ;;  %v1169_v5 = vsub.f32 %v1041_v63, %v1105_v27  ;;  %v902_v12 = vpop.xlane.xlu1 %901  ;;  %6515 = vst [vmem:[#allocation148_spill] sm:$0xff] %v4687_v13  ;;  %v1107_v55 = vmul.f32 %v4676_v21, %v4676_v21  ;;  %v4698_v18 = vmul.f32 0.0051020407, %v4214_v28  ;;  %v6516_v27 = vld [vmem:[#allocation124_spill] sm:$0xff] }
 0x16d   : > { %6514 = vst [vmem:[#allocation147_spill] sm:$0xff] %v4682_v57  ;;  %v3150_v43 = vpop.eup %3149  ;;  %v1298_v29 = vadd.f32 1e-05, %v1170_v16  ;;  %v1044_v37 = vmul.f32 0.0051020407, %v902_v12  ;;  %v898_v50 = vpop.xlane.xlu0 %897  ;;  %v1481_v38 = vmul.f32 %v4682_v57, %v4566_v42  ;;  %v1110_v42 = vmul.f32 %v4685_v48, %v4685_v48  ;;  %v1229_v12 = vld [vmem:[%s4376_s19 + $0xf0] sm:$0xff] }
 0x16e   : > { %v3152_v41 = vpop.eup %3151  ;;  %v1297_v44 = vadd.f32 1e-05, %v1169_v5  ;;  %v1043_v11 = vmul.f32 0.0051020407, %v898_v50  ;;  %v4701_v61 = vmul.f32 0.0051020407, %v6516_v27  ;;  %v1482_v5 = vmul.f32 %v4687_v13, %v4553_v3 }
 0x16f   : > { %3161 = vrsqrt.f32 %v1298_v29  ;;  %v1172_v63 = vsub.f32 %v1044_v37, %v1108_v52  ;;  %1633 = vrot.lane.b32.xlu1 %v1480_v46, %s3273_s20  ;;  %1635 = vrot.lane.b32.xlu0 %v1481_v38, %s3273_s20  ;;  %v4705_v17 = vmul.f32 %v3152_v41, %v1227_v36  ;;  %v4714_v38 = vmul.f32 %v3150_v43, %v1228_v60  ;;  %v1230_v36 = vld [vmem:[%s4376_s19 + $0xf8] sm:$0xff]  ;;  %v6520_v43 = vld [vmem:[#allocation126_spill] sm:$0xff] }
 0x170   : > { %3163 = vrsqrt.f32 %v1297_v44  ;;  %v1171_v28 = vsub.f32 %v1043_v11, %v1107_v55  ;;  %v910_v16 = vpop.xlane.xlu1 %909  ;;  %v1109_v55 = vmul.f32 %v4698_v18, %v4698_v18  ;;  %v6518_v44 = vld [vmem:[#allocation125_spill] sm:$0xff]  ;;  %v4729_v60 = vmul.f32 0.0051020407, %v6520_v43 }
 0x171   : > { %6517 = vst [vmem:[#allocation124_spill] sm:$0xff] %v4705_v17  ;;  %v3154_v50 = vpop.eup %3153  ;;  %v1300_v29 = vadd.f32 1e-05, %v1172_v63  ;;  %v1046_v52 = vmul.f32 0.0051020407, %v910_v16  ;;  %v906_v37 = vpop.xlane.xlu0 %905  ;;  %v1483_v46 = vmul.f32 %v4705_v17, %v4588_v49  ;;  %v1112_v63 = vmul.f32 %v4701_v61, %v4701_v61 }
 0x172   : > { %v3156_v41 = vpop.eup %3155  ;;  %v4720_v11 = vmul.f32 0.0051020407, %v6518_v44  ;;  %v1299_v3 = vadd.f32 1e-05, %v1171_v28  ;;  %v1045_v27 = vmul.f32 0.0051020407, %v906_v37  ;;  %v4731_v28 = vmul.f32 %v3154_v50, %v1230_v36 }
 0x173   : > { %3165 = vrsqrt.f32 %v1300_v29  ;;  %v1174_v16 = vsub.f32 %v1046_v52, %v1110_v42  ;;  %1637 = vrot.lane.b32.xlu1 %v1482_v5, %s3273_s20  ;;  %1639 = vrot.lane.b32.xlu0 %v1483_v46, %s3273_s20  ;;  %v4726_v49 = vmul.f32 %v3156_v41, %v1229_v12  ;;  %v1231_v37 = vld [vmem:[%s4376_s19 + $0x100] sm:$0xff]  ;;  %v1484_v5 = vmul.f32 %v4714_v38, %v4569_v25  ;;  %v1232_v52 = vld [vmem:[%s4376_s19 + $0x108] sm:$0xff] }
 0x174   : > { %3167 = vrsqrt.f32 %v1299_v3  ;;  %v1173_v44 = vsub.f32 %v1045_v27, %v1109_v55  ;;  %v918_v17 = vpop.xlane.xlu1 %917  ;;  %6521 = vst [vmem:[#allocation126_spill] sm:$0xff] %v4731_v28  ;;  %v1111_v41 = vmul.f32 %v4720_v11, %v4720_v11  ;;  %v6522_v55 = vld [vmem:[#allocation127_spill] sm:$0xff]  ;;  %v6523_v27 = vld [vmem:[#allocation128_spill] sm:$0xff] }
 0x175   : > { %6519 = vst [vmem:[#allocation125_spill] sm:$0xff] %v4726_v49  ;;  %v3158_v57 = vpop.eup %3157  ;;  %v1302_v13 = vadd.f32 1e-05, %v1174_v16  ;;  %v1048_v29 = vmul.f32 0.0051020407, %v918_v17  ;;  %v914_v42 = vpop.xlane.xlu0 %913  ;;  %v1485_v12 = vmul.f32 %v4726_v49, %v4610_v34  ;;  %v1114_v34 = vmul.f32 %v4729_v60, %v4729_v60 }
 0x176   : > { %v3160_v46 = vpop.eup %3159  ;;  %v4742_v50 = vmul.f32 0.0051020407, %v6522_v55  ;;  %v1301_v36 = vadd.f32 1e-05, %v1173_v44  ;;  %v1047_v3 = vmul.f32 0.0051020407, %v914_v42  ;;  %v1486_v44 = vmul.f32 %v4731_v28, %v4597_v54 }
 0x177   : > { %v4745_v17 = vmul.f32 0.0051020407, %v6523_v27  ;;  %3169 = vrsqrt.f32 %v1302_v13  ;;  %v1176_v16 = vsub.f32 %v1048_v29, %v1112_v63  ;;  %1641 = vrot.lane.b32.xlu1 %v1484_v5, %s3273_s20  ;;  %1643 = vrot.lane.b32.xlu0 %v1485_v12, %s3273_s20  ;;  %v4749_v25 = vmul.f32 %v3160_v46, %v1231_v37  ;;  %v1233_v42 = vld [vmem:[%s4376_s19 + $0x110] sm:$0xff]  ;;  %v1234_v37 = vld [vmem:[%s4376_s19 + $0x118] sm:$0xff] }
 0x178   : > { %3171 = vrsqrt.f32 %v1301_v36  ;;  %v1175_v43 = vsub.f32 %v1047_v3, %v1111_v41  ;;  %v926_v55 = vpop.xlane.xlu1 %925  ;;  %v4758_v12 = vmul.f32 %v3158_v57, %v1232_v52  ;;  %v1113_v41 = vmul.f32 %v4742_v50, %v4742_v50  ;;  %v6525_v36 = vld [vmem:[#allocation129_spill] sm:$0xff] }
 0x179   : > { %6524 = vst [vmem:[#allocation127_spill] sm:$0xff] %v4749_v25  ;;  %v3162_v27 = vpop.eup %3161  ;;  %v1304_v13 = vadd.f32 1e-05, %v1176_v16  ;;  %v1050_v63 = vmul.f32 0.0051020407, %v926_v55  ;;  %v922_v29 = vpop.xlane.xlu0 %921  ;;  %v1487_v5 = vmul.f32 %v4749_v25, %v4632_v33  ;;  %v1116_v16 = vmul.f32 %v4745_v17, %v4745_v17 }
 0x17a   : > { %v3164_v46 = vpop.eup %3163  ;;  %v4764_v3 = vmul.f32 0.0051020407, %v6525_v36  ;;  %v1303_v54 = vadd.f32 1e-05, %v1175_v43  ;;  %v1049_v49 = vmul.f32 0.0051020407, %v922_v29  ;;  %v4775_v43 = vmul.f32 %v3162_v27, %v1234_v37 }
 0x17b   : > { %3173 = vrsqrt.f32 %v1304_v13  ;;  %v1178_v55 = vsub.f32 %v1050_v63, %v1114_v34  ;;  %1645 = vrot.lane.b32.xlu1 %v1486_v44, %s3273_s20  ;;  %1647 = vrot.lane.b32.xlu0 %v1487_v5, %s3273_s20  ;;  %v4770_v33 = vmul.f32 %v3164_v46, %v1233_v42  ;;  %v4773_v57 = vmul.f32 0.0051020407, %v4263_v39  ;;  %v1235_v29 = vld [vmem:[%s4376_s19 + $0x120] sm:$0xff]  ;;  %v1236_v63 = vld [vmem:[%s4376_s19 + $0x128] sm:$0xff] }
 0x17c   : > { %3175 = vrsqrt.f32 %v1303_v54  ;;  %v1177_v52 = vsub.f32 %v1049_v49, %v1113_v41  ;;  %v934_v36 = vpop.xlane.xlu1 %933  ;;  %v1488_v44 = vmul.f32 %v4758_v12, %v4613_v32  ;;  %v1115_v39 = vmul.f32 %v4764_v3, %v4764_v3  ;;  %v6526_v49 = vld [vmem:[#allocation130_spill] sm:$0xff] }
 0x17d   : > { %v3166_v25 = vpop.eup %3165  ;;  %v1306_v28 = vadd.f32 1e-05, %v1178_v55  ;;  %v1052_v13 = vmul.f32 0.0051020407, %v934_v36  ;;  %v930_v34 = vpop.xlane.xlu0 %929  ;;  %v1489_v42 = vmul.f32 %v4770_v33, %v4654_v26  ;;  %v4786_v27 = vmul.f32 0.0051020407, %v6526_v49 }
 0x17e   : > { %v3168_v5 = vpop.eup %3167  ;;  %v1305_v37 = vadd.f32 1e-05, %v1177_v52  ;;  %v1051_v46 = vmul.f32 0.0051020407, %v930_v34  ;;  %v4789_v41 = vmul.f32 0.0051020407, %v4277_v14  ;;  %v1118_v26 = vmul.f32 %v4773_v57, %v4773_v57 }
 0x17f   : > { %3177 = vrsqrt.f32 %v1306_v28  ;;  %v1180_v54 = vsub.f32 %v1052_v13, %v1116_v16  ;;  %1649 = vrot.lane.b32.xlu1 %v1488_v44, %s3273_s20  ;;  %1651 = vrot.lane.b32.xlu0 %v1489_v42, %s3273_s20  ;;  %v4793_v32 = vmul.f32 %v3168_v5, %v1235_v29  ;;  %v1490_v52 = vmul.f32 %v4775_v43, %v4641_v7  ;;  %v4800_v14 = vld [vmem:[%s4376_s19 + $0x130] sm:$0xff]  ;;  %v4807_v42 = vld [vmem:[%s4376_s19 + $0x138] sm:$0xff]  ;;  %v6530_v49 = vld [vmem:[#allocation131_spill] sm:$0xff] }
 0x180   : > { %3179 = vrsqrt.f32 %v1305_v37  ;;  %v1179_v55 = vsub.f32 %v1051_v46, %v1115_v39  ;;  %v942_v36 = vpop.xlane.xlu1 %941  ;;  %6528 = vst [vmem:[#allocation129_spill] sm:$0xff] %v4800_v14  ;;  %v4804_v29 = vmul.f32 %v3166_v25, %v1236_v63  ;;  %6529 = vst [vmem:[#allocation130_spill] sm:$0xff] %v4807_v42  ;;  %v1117_v39 = vmul.f32 %v4786_v27, %v4786_v27 }
 0x181   : > { %6527 = vst [vmem:[#allocation128_spill] sm:$0xff] %v4793_v32  ;;  %v3170_v28 = vpop.eup %3169  ;;  %v1308_v16 = vadd.f32 1e-05, %v1180_v54  ;;  %v1054_v13 = vmul.f32 0.0051020407, %v942_v36  ;;  %v938_v34 = vpop.xlane.xlu0 %937  ;;  %v1491_v44 = vmul.f32 %v4793_v32, %v4676_v21  ;;  %v1120_v54 = vmul.f32 %v4789_v41, %v4789_v41  ;;  %v4884_v32 = vld [vmem:[%s4376_s19 + $0x160] sm:$0xff] }
 0x182   : > { %v3172_v5 = vpop.eup %3171  ;;  %v4812_v7 = vmul.f32 0.0051020407, %v6530_v49  ;;  %v1307_v37 = vadd.f32 1e-05, %v1179_v55  ;;  %v1053_v46 = vmul.f32 0.0051020407, %v938_v34  ;;  %v4825_v34 = vmul.f32 %v3170_v28, %v4807_v42 }
 0x183   : > { %3181 = vrsqrt.f32 %v1308_v16  ;;  %v1182_v36 = vsub.f32 %v1054_v13, %v1118_v26  ;;  %1653 = vrot.lane.b32.xlu1 %v1490_v52, %s3273_s20  ;;  %1655 = vrot.lane.b32.xlu0 %v1491_v44, %s3273_s20  ;;  %v4819_v21 = vmul.f32 %v3172_v5, %v4800_v14  ;;  %v4822_v25 = vmul.f32 0.0051020407, %v4291_v31  ;;  %v4828_v49 = vld [vmem:[%s4376_s19 + $0x140] sm:$0xff]  ;;  %v4835_v31 = vld [vmem:[%s4376_s19 + $0x148] sm:$0xff]  ;;  %6545 = vst [vmem:[#allocation154_spill] sm:$0xff] %v4884_v32 }
 0x184   : > { %3183 = vrsqrt.f32 %v1307_v37  ;;  %v1181_v63 = vsub.f32 %v1053_v46, %v1117_v39  ;;  %v950_v55 = vpop.xlane.xlu1 %949  ;;  %6532 = vst [vmem:[#allocation149_spill] sm:$0xff] %v4825_v34  ;;  %6533 = vst [vmem:[#allocation150_spill] sm:$0xff] %v4828_v49  ;;  %v1492_v44 = vmul.f32 %v4804_v29, %v4657_v40  ;;  %v1119_v28 = vmul.f32 %v4812_v7, %v4812_v7  ;;  %v6535_v39 = vld [vmem:[#allocation132_spill] sm:$0xff] }
 0x185   : > { %6531 = vst [vmem:[#allocation131_spill] sm:$0xff] %v4819_v21  ;;  %v3174_v26 = vpop.eup %3173  ;;  %v1310_v16 = vadd.f32 1e-05, %v1182_v36  ;;  %v1056_v13 = vmul.f32 0.0051020407, %v950_v55  ;;  %v946_v52 = vpop.xlane.xlu0 %945  ;;  %v1493_v5 = vmul.f32 %v4819_v21, %v4698_v18  ;;  %6534 = vst [vmem:[#allocation151_spill] sm:$0xff] %v4835_v31  ;;  %v1122_v21 = vmul.f32 %v4822_v25, %v4822_v25 }
 0x186   : > { %v3176_v37 = vpop.eup %3175  ;;  %v4840_v46 = vmul.f32 0.0051020407, %v6535_v39  ;;  %v1309_v42 = vadd.f32 1e-05, %v1181_v63  ;;  %v1055_v36 = vmul.f32 0.0051020407, %v946_v52  ;;  %v1494_v52 = vmul.f32 %v4825_v34, %v4685_v48 }
 0x187   : > { %v6536_v55 = vld [vmem:[#allocation133_spill] sm:$0xff]  ;;  %3185 = vrsqrt.f32 %v1310_v16  ;;  %v1184_v40 = vsub.f32 %v1056_v13, %v1120_v54  ;;  %1657 = vrot.lane.b32.xlu1 %v1492_v44, %s3273_s20  ;;  %1659 = vrot.lane.b32.xlu0 %v1493_v5, %s3273_s20  ;;  %v4848_v18 = vmul.f32 %v3176_v37, %v4828_v49  ;;  %v4860_v37 = vmul.f32 %v3174_v26, %v4835_v31  ;;  %v6541_v48 = vld [vmem:[#allocation134_spill] sm:$0xff]  ;;  %v6543_v31 = vld [vmem:[#allocation135_spill] sm:$0xff] }
 0x188   : > { %v4843_v14 = vmul.f32 0.0051020407, %v6536_v55  ;;  %3187 = vrsqrt.f32 %v1309_v42  ;;  %v1183_v39 = vsub.f32 %v1055_v36, %v1119_v28  ;;  %v958_v63 = vpop.xlane.xlu1 %957  ;;  %v4855_v55 = vld [vmem:[%s4376_s19 + $0x150] sm:$0xff]  ;;  %v4863_v49 = vld [vmem:[%s4376_s19 + $0x158] sm:$0xff]  ;;  %v1121_v28 = vmul.f32 %v4840_v46, %v4840_v46 }
 0x189   : > { %6537 = vst [vmem:[#allocation132_spill] sm:$0xff] %v4848_v18  ;;  %6538 = vst [vmem:[#allocation133_spill] sm:$0xff] %v4855_v55  ;;  %v3178_v54 = vpop.eup %3177  ;;  %v1312_v16 = vadd.f32 1e-05, %v1184_v40  ;;  %v1058_v13 = vmul.f32 0.0051020407, %v958_v63  ;;  %v954_v44 = vpop.xlane.xlu0 %953  ;;  %v1495_v5 = vmul.f32 %v4848_v18, %v4720_v11 }
 0x18a   : > { %6539 = vst [vmem:[#allocation152_spill] sm:$0xff] %v4860_v37  ;;  %6540 = vst [vmem:[#allocation153_spill] sm:$0xff] %v4863_v49  ;;  %v3180_v42 = vpop.eup %3179  ;;  %v4868_v36 = vmul.f32 0.0051020407, %v6541_v48  ;;  %v1311_v34 = vadd.f32 1e-05, %v1183_v39  ;;  %v1124_v63 = vmul.f32 %v4843_v14, %v4843_v14 }
 0x18b   : > { %v1057_v40 = vmul.f32 0.0051020407, %v954_v44  ;;  %3189 = vrsqrt.f32 %v1312_v16  ;;  %v1186_v11 = vsub.f32 %v1058_v13, %v1122_v21  ;;  %1661 = vrot.lane.b32.xlu1 %v1494_v52, %s3273_s20  ;;  %1663 = vrot.lane.b32.xlu0 %v1495_v5, %s3273_s20  ;;  %v4875_v26 = vmul.f32 %v3180_v42, %v4855_v55 }
 0x18c   : > { %v4878_v18 = vmul.f32 0.0051020407, %v6543_v31  ;;  %3191 = vrsqrt.f32 %v1311_v34  ;;  %v966_v39 = vpop.xlane.xlu1 %965  ;;  %v4881_v44 = vmul.f32 %v3178_v54, %v4863_v49  ;;  %v1496_v5 = vmul.f32 %v4860_v37, %v4701_v61  ;;  %v4891_v31 = vld [vmem:[%s4376_s19 + $0x168] sm:$0xff]  ;;  %v4940_v37 = vld [vmem:[%s4376_s19 + $0x180] sm:$0xff] }
 0x18d   : > { %6542 = vst [vmem:[#allocation134_spill] sm:$0xff] %v4875_v26  ;;  %v1185_v48 = vsub.f32 %v1057_v40, %v1121_v28  ;;  %v3182_v21 = vpop.eup %3181  ;;  %v1314_v16 = vadd.f32 1e-05, %v1186_v11  ;;  %v1060_v13 = vmul.f32 0.0051020407, %v966_v39  ;;  %v962_v52 = vpop.xlane.xlu0 %961  ;;  %v1497_v42 = vmul.f32 %v4875_v26, %v4742_v50  ;;  %6546 = vst [vmem:[#allocation155_spill] sm:$0xff] %v4891_v31 }
 0x18e   : > { %6544 = vst [vmem:[#allocation135_spill] sm:$0xff] %v4881_v44  ;;  %v3184_v34 = vpop.eup %3183  ;;  %v1123_v54 = vmul.f32 %v4868_v36, %v4868_v36  ;;  %v6547_v28 = vld [vmem:[#allocation136_spill] sm:$0xff]  ;;  %v1059_v11 = vmul.f32 0.0051020407, %v962_v52  ;;  %v6548_v39 = vld [vmem:[#allocation137_spill] sm:$0xff]  ;;  %v1126_v26 = vmul.f32 %v4878_v18, %v4878_v18  ;;  %v1498_v52 = vmul.f32 %v4881_v44, %v4729_v60  ;;  %v6553_v60 = vld [vmem:[#allocation138_spill] sm:$0xff] }
 0x18f   : > { %v4896_v40 = vmul.f32 0.0051020407, %v6547_v28  ;;  %v1313_v49 = vadd.f32 1e-05, %v1185_v48  ;;  %v4899_v55 = vmul.f32 0.0051020407, %v6548_v39  ;;  %3193 = vrsqrt.f32 %v1314_v16  ;;  %1665 = vrot.lane.b32.xlu1 %v1496_v5, %s3273_s20  ;;  %1667 = vrot.lane.b32.xlu0 %v1497_v42, %s3273_s20 }
 0x190   : > { %v1188_v61 = vsub.f32 %v1060_v13, %v1124_v63  ;;  %v4904_v50 = vmul.f32 %v3184_v34, %v4884_v32  ;;  %v1187_v28 = vsub.f32 %v1059_v11, %v1123_v54  ;;  %v974_v48 = vpop.xlane.xlu1 %973  ;;  %v4911_v39 = vld [vmem:[%s4376_s19 + $0x170] sm:$0xff]  ;;  %v4916_v34 = vmul.f32 %v3182_v21, %v4891_v31  ;;  %v4919_v32 = vld [vmem:[%s4376_s19 + $0x178] sm:$0xff]  ;;  %v6555_v31 = vld [vmem:[#allocation139_spill] sm:$0xff]  ;;  %6557 = vst [vmem:[#allocation158_spill] sm:$0xff] %v4940_v37 }
 0x191   : > { %3195 = vrsqrt.f32 %v1313_v49  ;;  %6550 = vst [vmem:[#allocation137_spill] sm:$0xff] %v4911_v39  ;;  %v3186_v63 = vpop.eup %3185  ;;  %v1062_v13 = vmul.f32 0.0051020407, %v974_v48  ;;  %v970_v5 = vpop.xlane.xlu0 %969  ;;  %6552 = vst [vmem:[#allocation157_spill] sm:$0xff] %v4919_v32  ;;  %v1125_v54 = vmul.f32 %v4896_v40, %v4896_v40  ;;  %v4924_v11 = vmul.f32 0.0051020407, %v6553_v60 }
 0x192   : > { %6549 = vst [vmem:[#allocation136_spill] sm:$0xff] %v4904_v50  ;;  %v1316_v16 = vadd.f32 1e-05, %v1188_v61  ;;  %v1499_v42 = vmul.f32 %v4904_v50, %v4764_v3  ;;  %6551 = vst [vmem:[#allocation156_spill] sm:$0xff] %v4916_v34  ;;  %v3188_v49 = vpop.eup %3187  ;;  %v1315_v44 = vadd.f32 1e-05, %v1187_v28  ;;  %v1128_v48 = vmul.f32 %v4899_v55, %v4899_v55 }
 0x193   : > { %v1061_v61 = vmul.f32 0.0051020407, %v970_v5  ;;  %v1190_v3 = vsub.f32 %v1062_v13, %v1126_v26  ;;  %1669 = vrot.lane.b32.xlu1 %v1498_v52, %s3273_s20  ;;  %v4931_v21 = vmul.f32 %v3188_v49, %v4911_v39  ;;  %v4934_v50 = vmul.f32 0.0051020407, %v6555_v31  ;;  %v4947_v31 = vld [vmem:[%s4376_s19 + $0x188] sm:$0xff] }
 0x194   : > { %3197 = vrsqrt.f32 %v1316_v16  ;;  %1671 = vrot.lane.b32.xlu0 %v1499_v42, %s3273_s20  ;;  %v982_v28 = vpop.xlane.xlu1 %981  ;;  %v4937_v5 = vmul.f32 %v3186_v63, %v4919_v32  ;;  %v1500_v42 = vmul.f32 %v4916_v34, %v4745_v17  ;;  %6558 = vst [vmem:[#allocation159_spill] sm:$0xff] %v4947_v31  ;;  %v1127_v63 = vmul.f32 %v4924_v11, %v4924_v11  ;;  %v4996_v34 = vld [vmem:[%s4376_s19 + $0x1a0] sm:$0xff] }
 0x195   : > { %6554 = vst [vmem:[#allocation138_spill] sm:$0xff] %v4931_v21  ;;  %3199 = vrsqrt.f32 %v1315_v44  ;;  %v1189_v60 = vsub.f32 %v1061_v61, %v1125_v54  ;;  %v3190_v26 = vpop.eup %3189  ;;  %v1318_v16 = vadd.f32 1e-05, %v1190_v3  ;;  %v1064_v13 = vmul.f32 0.0051020407, %v982_v28  ;;  %v978_v52 = vpop.xlane.xlu0 %977  ;;  %v6559_v54 = vld [vmem:[#allocation140_spill] sm:$0xff] }
 0x196   : > { %6556 = vst [vmem:[#allocation139_spill] sm:$0xff] %v4937_v5  ;;  %v1501_v49 = vmul.f32 %v4931_v21, %v4786_v27  ;;  %v3192_v44 = vpop.eup %3191  ;;  %v4952_v61 = vmul.f32 0.0051020407, %v6559_v54  ;;  %v1063_v3 = vmul.f32 0.0051020407, %v978_v52  ;;  %v6560_v28 = vld [vmem:[#allocation141_spill] sm:$0xff]  ;;  %v1130_v21 = vmul.f32 %v4934_v50, %v4934_v50 }
 0x197   : > { %v1317_v32 = vadd.f32 1e-05, %v1189_v60  ;;  %v4955_v39 = vmul.f32 0.0051020407, %v6560_v28  ;;  %3201 = vrsqrt.f32 %v1318_v16  ;;  %v1192_v17 = vsub.f32 %v1064_v13, %v1128_v48  ;;  %1673 = vrot.lane.b32.xlu1 %v1500_v42, %s3273_s20  ;;  %v4967_v28 = vld [vmem:[%s4376_s19 + $0x190] sm:$0xff] }
 0x198   : > { %1675 = vrot.lane.b32.xlu0 %v1501_v49, %s3273_s20  ;;  %v4960_v27 = vmul.f32 %v3192_v44, %v4940_v37  ;;  %v1191_v54 = vsub.f32 %v1063_v3, %v1127_v63  ;;  %v990_v60 = vpop.xlane.xlu1 %989  ;;  %v1502_v52 = vmul.f32 %v4937_v5, %v4773_v57  ;;  %6562 = vst [vmem:[#allocation141_spill] sm:$0xff] %v4967_v28  ;;  %v4975_v37 = vld [vmem:[%s4376_s19 + $0x198] sm:$0xff]  ;;  %v6564_v57 = vld [vmem:[#allocation142_spill] sm:$0xff] }
 0x199   : > { %3203 = vrsqrt.f32 %v1317_v32  ;;  %v3194_v48 = vpop.eup %3193  ;;  %v1320_v16 = vadd.f32 1e-05, %v1192_v17  ;;  %v1066_v13 = vmul.f32 0.0051020407, %v990_v60  ;;  %v986_v42 = vpop.xlane.xlu0 %985  ;;  %v4972_v44 = vmul.f32 %v3190_v26, %v4947_v31  ;;  %6563 = vst [vmem:[#allocation160_spill] sm:$0xff] %v4975_v37  ;;  %v6566_v31 = vld [vmem:[#allocation143_spill] sm:$0xff] }
 0x19a   : > { %6561 = vst [vmem:[#allocation140_spill] sm:$0xff] %v4960_v27  ;;  %v1503_v49 = vmul.f32 %v4960_v27, %v4812_v7  ;;  %v1129_v63 = vmul.f32 %v4952_v61, %v4952_v61  ;;  %v4980_v3 = vmul.f32 0.0051020407, %v6564_v57  ;;  %v1319_v5 = vadd.f32 1e-05, %v1191_v54  ;;  %6567 = vst [vmem:[#allocation143_spill] sm:$0xff] %v4996_v34 }
 0x19b   : > { %v3196_v32 = vpop.eup %3195  ;;  %v1065_v17 = vmul.f32 0.0051020407, %v986_v42  ;;  %v1132_v60 = vmul.f32 %v4955_v39, %v4955_v39  ;;  %3205 = vrsqrt.f32 %v1320_v16  ;;  %v1194_v7 = vsub.f32 %v1066_v13, %v1130_v21  ;;  %1677 = vrot.lane.b32.xlu1 %v1502_v52, %s3273_s20 }
 0x19c   : > { %1679 = vrot.lane.b32.xlu0 %v1503_v49, %s3273_s20  ;;  %v4987_v26 = vmul.f32 %v3196_v32, %v4967_v28  ;;  %v4990_v27 = vmul.f32 0.0051020407, %v6566_v31  ;;  %3207 = vrsqrt.f32 %v1319_v5  ;;  %v998_v54 = vpop.xlane.xlu1 %997  ;;  %v4993_v42 = vmul.f32 %v3194_v48, %v4975_v37  ;;  %v5003_v31 = vld [vmem:[%s4376_s19 + $0x1a8] sm:$0xff] }
 0x19d   : > { %v1193_v57 = vsub.f32 %v1065_v17, %v1129_v63  ;;  %v1322_v16 = vadd.f32 1e-05, %v1194_v7  ;;  %v1068_v13 = vmul.f32 0.0051020407, %v998_v54  ;;  %v994_v52 = vpop.xlane.xlu0 %993  ;;  %v1504_v49 = vmul.f32 %v4972_v44, %v4789_v41  ;;  %6568 = vst [vmem:[#allocation161_spill] sm:$0xff] %v5003_v31  ;;  %v6569_v63 = vld [vmem:[#allocation144_spill] sm:$0xff] }
 0x19e   : > { %6565 = vst [vmem:[#allocation142_spill] sm:$0xff] %v4987_v26  ;;  %v3198_v21 = vpop.eup %3197  ;;  %v1505_v32 = vmul.f32 %v4987_v26, %v4840_v46  ;;  %v1131_v48 = vmul.f32 %v4980_v3, %v4980_v3  ;;  %v5008_v17 = vmul.f32 0.0051020407, %v6569_v63  ;;  %v1067_v7 = vmul.f32 0.0051020407, %v994_v52  ;;  %v5020_v52 = vld [vmem:[%s4376_s19 + $0x1b0] sm:$0xff] }
 0x19f   : > { %v3200_v5 = vpop.eup %3199  ;;  %v1321_v37 = vadd.f32 1e-05, %v1193_v57  ;;  %3209 = vrsqrt.f32 %v1322_v16  ;;  %v1196_v54 = vsub.f32 %v1068_v13, %v1132_v60  ;;  %1681 = vrot.lane.b32.xlu1 %v1504_v49, %s3273_s20  ;;  %v1134_v46 = vmul.f32 %v4990_v27, %v4990_v27  ;;  %6570 = vst [vmem:[#allocation144_spill] sm:$0xff] %v5020_v52 }
 0x1a0   : > { %1683 = vrot.lane.b32.xlu0 %v1505_v32, %s3273_s20  ;;  %v5013_v41 = vmul.f32 %v3200_v5, %v4996_v34  ;;  %v1195_v28 = vsub.f32 %v1067_v7, %v1131_v48  ;;  %v1006_v26 = vpop.xlane.xlu1 %1005  ;;  %v1506_v57 = vmul.f32 %v4993_v42, %v4822_v25  ;;  %v5025_v5 = vmul.f32 %v3198_v21, %v5003_v31  ;;  %v5030_v25 = vld [vmem:[%s4376_s19 + $0x1b8] sm:$0xff]  ;;  %v5038_v21 = vld [vmem:[%s4376_s19 + $0x1c0] sm:$0xff] }
 0x1a1   : > { %3211 = vrsqrt.f32 %v1321_v37  ;;  %v3202_v60 = vpop.eup %3201  ;;  %v1324_v16 = vadd.f32 1e-05, %v1196_v54  ;;  %v1070_v13 = vmul.f32 0.0051020407, %v1006_v26  ;;  %v1002_v49 = vpop.xlane.xlu0 %1001  ;;  %v1133_v37 = vmul.f32 %v5008_v17, %v5008_v17  ;;  %6571 = vst [vmem:[#allocation162_spill] sm:$0xff] %v5030_v25  ;;  %6572 = vst [vmem:[#allocation163_spill] sm:$0xff] %v5038_v21 }
 0x1a2   : > { %v1507_v32 = vmul.f32 %v5013_v41, %v4868_v36  ;;  %v1323_v48 = vadd.f32 1e-05, %v1195_v28  ;;  %v1069_v7 = vmul.f32 0.0051020407, %v1002_v49  ;;  %v1508_v49 = vmul.f32 %v5025_v5, %v4843_v14  ;;  %v5056_v14 = vld [vmem:[%s4376_s19 + $0x1d0] sm:$0xff] }
 0x1a3   : > { %v3204_v63 = vpop.eup %3203  ;;  %3213 = vrsqrt.f32 %v1324_v16  ;;  %v1198_v54 = vsub.f32 %v1070_v13, %v1134_v46  ;;  %1685 = vrot.lane.b32.xlu1 %v1506_v57, %s3273_s20  ;;  %v5045_v57 = vmul.f32 %v3202_v60, %v5030_v25  ;;  %6574 = vst [vmem:[#allocation165_spill] sm:$0xff] %v5056_v14 }
 0x1a4   : > { %1687 = vrot.lane.b32.xlu0 %v1507_v32, %s3273_s20  ;;  %v5035_v36 = vmul.f32 %v3204_v63, %v5020_v52  ;;  %3215 = vrsqrt.f32 %v1323_v48  ;;  %v1197_v26 = vsub.f32 %v1069_v7, %v1133_v37  ;;  %v5048_v32 = vld [vmem:[%s4376_s19 + $0x1c8] sm:$0xff] }
 0x1a5   : > { %v3206_v31 = vpop.eup %3205  ;;  %v1326_v28 = vadd.f32 1e-05, %v1198_v54  ;;  %6573 = vst [vmem:[#allocation164_spill] sm:$0xff] %v5048_v32  ;;  %v1510_v60 = vmul.f32 %v5045_v57, %v4878_v18  ;;  %v5066_v54 = vld [vmem:[%s4376_s19 + $0x1d8] sm:$0xff]  ;;  %v5076_v18 = vld [vmem:[%s4376_s19 + $0x1e0] sm:$0xff] }
 0x1a6   : > { %v1509_v46 = vmul.f32 %v5035_v36, %v4896_v40  ;;  %v3208_v16 = vpop.eup %3207  ;;  %v1325_v13 = vadd.f32 1e-05, %v1197_v26  ;;  %v5063_v48 = vmul.f32 %v3206_v31, %v5048_v32  ;;  %6575 = vst [vmem:[#allocation166_spill] sm:$0xff] %v5066_v54  ;;  %6576 = vst [vmem:[#allocation167_spill] sm:$0xff] %v5076_v18 }
 0x1a7   : > { %3217 = vrsqrt.f32 %v1326_v28  ;;  %1689 = vrot.lane.b32.xlu1 %v1508_v49, %s3273_s20  ;;  %v5053_v63 = vmul.f32 %v3208_v16, %v5038_v21 }
 0x1a8   : > { %1691 = vrot.lane.b32.xlu0 %v1509_v46, %s3273_s20  ;;  %3219 = vrsqrt.f32 %v1325_v13  ;;  %v5086_v13 = vld [vmem:[%s4376_s19 + $0x1e8] sm:$0xff] }
 0x1a9   : > { %v3210_v40 = vpop.eup %3209  ;;  %v1511_v37 = vmul.f32 %v5053_v63, %v4924_v11  ;;  %v1512_v11 = vmul.f32 %v5063_v48, %v4899_v55  ;;  %6577 = vst [vmem:[#allocation168_spill] sm:$0xff] %v5086_v13 }
 0x1aa   : > { %v5083_v46 = vmul.f32 %v3210_v40, %v5066_v54  ;;  %v5108_v54 = vld [vmem:[%s4376_s19 + $0x1f8] sm:$0xff] }
 0x1ab   : > { %v3212_v7 = vpop.eup %3211  ;;  %1693 = vrot.lane.b32.xlu1 %v1510_v60, %s3273_s20  ;;  %6579 = vst [vmem:[#allocation170_spill] sm:$0xff] %v5108_v54 }
 0x1ac   : > { %1695 = vrot.lane.b32.xlu0 %v1511_v37, %s3273_s20  ;;  %v5071_v26 = vmul.f32 %v3212_v7, %v5056_v14  ;;  %v5073_v28 = vpop.permute.xlu1 %1585  ;;  %v5094_v37 = vld [vmem:[%s4376_s19 + $0x1f0] sm:$0xff]  ;;  %v6585_v14 = vld [vmem:[#allocation126_spill] sm:$0xff] }
 0x1ad   : > { %v3214_v49 = vpop.eup %3213  ;;  %6578 = vst [vmem:[#allocation169_spill] sm:$0xff] %v5094_v37  ;;  %v5096_v7 = vpop.permute.xlu0 %1583 }
 0x1ae   : > { %v1513_v31 = vmul.f32 %v5071_v26, %v4952_v61  ;;  %v3216_v16 = vpop.eup %3215  ;;  %v1514_v61 = vmul.f32 %v5083_v46, %v4934_v50 }
 0x1af   : > { %1697 = vrot.lane.b32.xlu1 %v1512_v11, %s3273_s20  ;;  %v5091_v60 = vmul.f32 %v3216_v16, %v5076_v18  ;;  %v5105_v11 = vmul.f32 %v3214_v49, %v5086_v13 }
 0x1b0   : > { %1699 = vrot.lane.b32.xlu0 %v1513_v31, %s3273_s20 }
 0x1b1   : > { %v3218_v55 = vpop.eup %3217  ;;  %v5098_v32 = vpop.permute.xlu1 %1587  ;;  %v1515_v40 = vmul.f32 %v5091_v60, %v4980_v3  ;;  %v1516_v50 = vmul.f32 %v5105_v11, %v4955_v39 }
 0x1b2   : > { %v3220_v31 = vpop.eup %3219  ;;  %v5124_v49 = vmul.f32 %v3218_v55, %v5108_v54 }
 0x1b3   : > { %1701 = vrot.lane.b32.xlu1 %v1514_v61, %s3273_s20  ;;  %v5113_v16 = vmul.f32 %v3220_v31, %v5094_v37 }
 0x1b4   : > { %1703 = vrot.lane.b32.xlu0 %v1515_v40, %s3273_s20  ;;  %v1518_v31 = vmul.f32 %v5124_v49, %v4990_v27 }
 0x1b5   : > { %v5115_v18 = vpop.permute.xlu1 %1589  ;;  %v5117_v25 = vpop.permute.xlu0 %1591  ;;  %v1517_v3 = vmul.f32 %v5113_v16, %v5008_v17 }
 0x1b7   : > { %1705 = vrot.lane.b32.xlu1 %v1516_v50, %s3273_s20 }
 0x1b8   : > { %1707 = vrot.lane.b32.xlu0 %v1517_v3, %s3273_s20  ;;  %v6580_v3 = vld [vmem:[#allocation145_spill] sm:$0xff] }
 0x1b9   : > { %v5128_v61 = vpop.permute.xlu1 %1593  ;;  %v5130_v40 = vpop.permute.xlu0 %1595 }
 0x1bb   : > { %1709 = vrot.lane.b32.xlu1 %v1518_v31, %s3273_s20 }
 0x1bc   : > { %1841 = vperm.xlu0 %3089, %v4401_v62   ;;  %v6581_v62 = vld [vmem:[#allocation146_spill] sm:$0xff] }
 0x1bd   : > { %v5136_v39 = vpop.permute.xlu1 %1597  ;;  %v5138_v17 = vpop.permute.xlu0 %1599 }
 0x1bf   : > { %1846 = vperm.xlu1 %3090, %v4397_v1  }
 0x1c0   : > { %1856 = vperm.xlu0 %3089, %v4424_v22  }
 0x1c1   : > { %v5142_v55 = vpop.permute.xlu1 %1601  ;;  %v5144_v50 = vpop.permute.xlu0 %1603 }
 0x1c3   : > { %1851 = vperm.xlu1 %3090, %v6580_v3  }
 0x1c4   : > { %1866 = vperm.xlu0 %3089, %v4450_v8  }
 0x1c5   : > { %v5148_v27 = vpop.permute.xlu1 %1605  ;;  %v5150_v31 = vpop.permute.xlu0 %1607 }
 0x1c7   : > { %1861 = vperm.xlu1 %3090, %v6581_v62  }
 0x1c8   : > { %1876 = vperm.xlu0 %3089, %v4467_v6  }
 0x1c9   : > { %v5154_v54 = vpop.permute.xlu1 %1609  ;;  %v5156_v1 = vpop.permute.xlu0 %1611 }
 0x1cb   : > { %1871 = vperm.xlu1 %3090, %v4462_v15  }
 0x1cc   : > { %1886 = vperm.xlu0 %3089, %v4494_v56  }
 0x1cd   : > { %v5160_v22 = vpop.permute.xlu1 %1613  ;;  %v5162_v3 = vpop.permute.xlu0 %1615 }
 0x1cf   : > { %1881 = vperm.xlu1 %3090, %v4485_v51  }
 0x1d0   : > { %1896 = vperm.xlu0 %3089, %v4511_v45  }
 0x1d1   : > { %v5166_v8 = vpop.permute.xlu1 %1617  ;;  %v5168_v62 = vpop.permute.xlu0 %1619 }
 0x1d3   : > { %1891 = vperm.xlu1 %3090, %v4506_v30  }
 0x1d4   : > { %1906 = vperm.xlu0 %3089, %v4538_v0  }
 0x1d5   : > { %v5172_v6 = vpop.permute.xlu1 %1621  ;;  %v5174_v15 = vpop.permute.xlu0 %1623 }
 0x1d7   : > { %1901 = vperm.xlu1 %3090, %v4529_v20  }
 0x1d8   : > { %1916 = vperm.xlu0 %3089, %v4555_v9  }
 0x1d9   : > { %v5178_v56 = vpop.permute.xlu1 %1625  ;;  %v5180_v51 = vpop.permute.xlu0 %1627 }
 0x1db   : > { %1911 = vperm.xlu1 %3090, %v4550_v47  }
 0x1dc   : > { %1926 = vperm.xlu0 %3089, %v4582_v59  }
 0x1dd   : > { %v5184_v45 = vpop.permute.xlu1 %1629  ;;  %v5186_v30 = vpop.permute.xlu0 %1631 }
 0x1df   : > { %1921 = vperm.xlu1 %3090, %v4573_v35  }
 0x1e0   : > { %1936 = vperm.xlu0 %3089, %v4599_v53  }
 0x1e1   : > { %v5190_v0 = vpop.permute.xlu1 %1633  ;;  %v5192_v20 = vpop.permute.xlu0 %1635 }
 0x1e3   : > { %1931 = vperm.xlu1 %3090, %v4594_v23  }
 0x1e4   : > { %1946 = vperm.xlu0 %3089, %v4626_v19   ;;  %v6582_v19 = vld [vmem:[#allocation148_spill] sm:$0xff] }
 0x1e5   : > { %v5196_v9 = vpop.permute.xlu1 %1637  ;;  %v5198_v47 = vpop.permute.xlu0 %1639 }
 0x1e7   : > { %1941 = vperm.xlu1 %3090, %v4617_v4  }
 0x1e8   : > { %1956 = vperm.xlu0 %3089, %v4643_v58   ;;  %v6583_v58 = vld [vmem:[#allocation147_spill] sm:$0xff] }
 0x1e9   : > { %v5202_v59 = vpop.permute.xlu1 %1641  ;;  %v5204_v35 = vpop.permute.xlu0 %1643 }
 0x1eb   : > { %1951 = vperm.xlu1 %3090, %v4638_v24  }
 0x1ec   : > { %1966 = vperm.xlu0 %3089, %v4670_v2   ;;  %v6584_v2 = vld [vmem:[#allocation124_spill] sm:$0xff] }
 0x1ed   : > { %v5208_v53 = vpop.permute.xlu1 %1645  ;;  %v5210_v23 = vpop.permute.xlu0 %1647 }
 0x1ef   : > { %1961 = vperm.xlu1 %3090, %v4661_v10  }
 0x1f0   : > { %1976 = vperm.xlu0 %3089, %v6582_v19   ;;  %v6587_v19 = vld [vmem:[#allocation125_spill] sm:$0xff] }
 0x1f1   : > { %v5214_v13 = vpop.permute.xlu1 %1649  ;;  %v5216_v4 = vpop.permute.xlu0 %1651 }
 0x1f3   : > { %1971 = vperm.xlu1 %3090, %v6583_v58  }
 0x1f4   : > { %1986 = vperm.xlu0 %3089, %v4714_v38   ;;  %v6589_v38 = vld [vmem:[#allocation127_spill] sm:$0xff] }
 0x1f5   : > { %v5220_v37 = vpop.permute.xlu1 %1653  ;;  %v5222_v24 = vpop.permute.xlu0 %1655 }
 0x1f7   : > { %1981 = vperm.xlu1 %3090, %v6584_v2  }
 0x1f8   : > { %1996 = vperm.xlu0 %3089, %v6585_v14  }
 0x1f9   : > { %v5226_v21 = vpop.permute.xlu1 %1657  ;;  %v5228_v10 = vpop.permute.xlu0 %1659 }
 0x1fa   : > { %6586 = vst [vmem:[#allocation145_spill] sm:$0xff] %v5226_v21 }
 0x1fb   : > { %1991 = vperm.xlu1 %3090, %v6587_v19  }
 0x1fc   : > { %2006 = vperm.xlu0 %3089, %v4758_v12   ;;  %v6594_v12 = vld [vmem:[#allocation128_spill] sm:$0xff] }
 0x1fd   : > { %v5232_v52 = vpop.permute.xlu1 %1661  ;;  %v5234_v58 = vpop.permute.xlu0 %1663 }
 0x1fe   : > { %6588 = vst [vmem:[#allocation146_spill] sm:$0xff] %v5232_v52  ;;  %v6595_v52 = vld [vmem:[#allocation149_spill] sm:$0xff] }
 0x1ff   : > { %2001 = vperm.xlu1 %3090, %v6589_v38  }
 0x200   : > { %2016 = vperm.xlu0 %3089, %v4775_v43   ;;  %v6598_v43 = vld [vmem:[#allocation131_spill] sm:$0xff] }
 0x201   : > { %v5238_v34 = vpop.permute.xlu1 %1665  ;;  %v5240_v2 = vpop.permute.xlu0 %1667 }
 0x202   : > { %6590 = vst [vmem:[#allocation148_spill] sm:$0xff] %v5238_v34  ;;  %6591 = vst [vmem:[#allocation147_spill] sm:$0xff] %v5240_v2  ;;  %v6599_v34 = vld [vmem:[#allocation152_spill] sm:$0xff] }
 0x203   : > { %2011 = vperm.xlu1 %3090, %v4770_v33  }
 0x204   : > { %2026 = vperm.xlu0 %3089, %v4804_v29   ;;  %v6602_v29 = vld [vmem:[#allocation132_spill] sm:$0xff] }
 0x205   : > { %v5244_v14 = vpop.permute.xlu1 %1669 }
 0x206   : > { %6592 = vst [vmem:[#allocation124_spill] sm:$0xff] %v5244_v14  ;;  %v5246_v19 = vpop.permute.xlu0 %1671  ;;  %v6603_v14 = vld [vmem:[#allocation135_spill] sm:$0xff] }
 0x207   : > { %6593 = vst [vmem:[#allocation126_spill] sm:$0xff] %v5246_v19  ;;  %2021 = vperm.xlu1 %3090, %v6594_v12  }
 0x208   : > { %2036 = vperm.xlu0 %3089, %v6595_v52   ;;  %v6605_v52 = vld [vmem:[#allocation134_spill] sm:$0xff] }
 0x209   : > { %v5250_v21 = vpop.permute.xlu1 %1673 }
 0x20a   : > { %6596 = vst [vmem:[#allocation125_spill] sm:$0xff] %v5250_v21  ;;  %v5252_v38 = vpop.permute.xlu0 %1675  ;;  %v6606_v21 = vld [vmem:[#allocation156_spill] sm:$0xff] }
 0x20b   : > { %6597 = vst [vmem:[#allocation127_spill] sm:$0xff] %v5252_v38  ;;  %2031 = vperm.xlu1 %3090, %v6598_v43   ;;  %v6607_v43 = vld [vmem:[#allocation136_spill] sm:$0xff] }
 0x20c   : > { %2046 = vperm.xlu0 %3089, %v6599_v34   ;;  %v6608_v34 = vld [vmem:[#allocation139_spill] sm:$0xff] }
 0x20d   : > { %v5256_v2 = vpop.permute.xlu1 %1677 }
 0x20e   : > { %6600 = vst [vmem:[#allocation128_spill] sm:$0xff] %v5256_v2  ;;  %v5258_v33 = vpop.permute.xlu0 %1679 }
 0x20f   : > { %6601 = vst [vmem:[#allocation149_spill] sm:$0xff] %v5258_v33  ;;  %2041 = vperm.xlu1 %3090, %v6602_v29   ;;  %v6609_v33 = vld [vmem:[#allocation138_spill] sm:$0xff] }
 0x210   : > { %2056 = vperm.xlu0 %3089, %v6603_v14  }
 0x211   : > { %v5262_v19 = vpop.permute.xlu1 %1681 }
 0x212   : > { %6604 = vst [vmem:[#allocation131_spill] sm:$0xff] %v5262_v19  ;;  %v5264_v12 = vpop.permute.xlu0 %1683  ;;  %v6610_v19 = vld [vmem:[#allocation140_spill] sm:$0xff] }
 0x213   : > { %2051 = vperm.xlu1 %3090, %v6605_v52   ;;  %v6611_v52 = vld [vmem:[#allocation142_spill] sm:$0xff] }
 0x214   : > { %2066 = vperm.xlu0 %3089, %v6606_v21  }
 0x215   : > { %v5268_v38 = vpop.permute.xlu1 %1685 }
 0x216   : > { %v5272_v2 = vpop.permute.xlu0 %1687 }
 0x217   : > { %2061 = vperm.xlu1 %3090, %v6607_v43  }
 0x218   : > { %2076 = vperm.xlu0 %3089, %v6608_v34  }
 0x219   : > { %v5276_v14 = vpop.permute.xlu1 %1689 }
 0x21a   : > { %v5278_v29 = vpop.permute.xlu0 %1691 }
 0x21b   : > { %2071 = vperm.xlu1 %3090, %v6609_v33  }
 0x21c   : > { %2086 = vperm.xlu0 %3089, %v4972_v44  }
 0x21d   : > { %v5282_v21 = vpop.permute.xlu1 %1693 }
 0x21e   : > { %v5286_v43 = vpop.permute.xlu0 %1695 }
 0x21f   : > { %2081 = vperm.xlu1 %3090, %v6610_v19  }
 0x220   : > { %2096 = vperm.xlu0 %3089, %v4993_v42  }
 0x221   : > { %v5290_v44 = vpop.permute.xlu1 %1697 }
 0x222   : > { %v5292_v33 = vpop.permute.xlu0 %1699 }
 0x223   : > { %2091 = vperm.xlu1 %3090, %v6611_v52   ;;  %v3224_v52 = vld [vmem:[%s4376_s19 + $0x10] sm:$0xff] }
 0x224   : > { %2106 = vperm.xlu0 %3089, %v5025_v5  }
 0x225   : > { %v5296_v42 = vpop.permute.xlu1 %1701 }
 0x226   : > { %v5300_v5 = vpop.permute.xlu0 %1703 }
 0x227   : > { %2101 = vperm.xlu1 %3090, %v5013_v41  }
 0x228   : > { %2116 = vperm.xlu0 %3089, %v5045_v57  }
 0x229   : > { %v5304_v41 = vpop.permute.xlu1 %1705 }
 0x22a   : > { %v5306_v57 = vpop.permute.xlu0 %1707 }
 0x22b   : > { %2111 = vperm.xlu1 %3090, %v5035_v36   ;;  %v3221_v36 = vld [vmem:[%s4376_s19 + $0x8] sm:$0xff] }
 0x22c   : > { %2126 = vperm.xlu0 %3089, %v5063_v48  }
 0x22d   : > { %v5312_v48 = vpop.permute.xlu1 %1709 }
 0x22f   : > { %2121 = vperm.xlu1 %3090, %v5053_v63   ;;  %v1776_v63 = vsub.f32 %v3221_v36, %v5073_v28  ;;  %v3225_v36 = vld [vmem:[%s4376_s19 + $0x30] sm:$0xff] }
 0x230   : > { %2136 = vperm.xlu0 %3089, %v5083_v46  }
 0x233   : > { %2131 = vperm.xlu1 %3090, %v5071_v26   ;;  %v3275_v26 = vmov 1  }
 0x234   : > { %2146 = vperm.xlu0 %3089, %v5105_v11   ;;  %v3222_v11 = vld [vmem:[%s4376_s19] sm:$0xff] }
 0x235   : > { %v1775_v19 = vsub.f32 %v3222_v11, %v5096_v7  ;;  %v1781_v7 = vsub.f32 %v3225_v36, %v5130_v40  ;;  %v3228_v40 = vld [vmem:[%s4376_s19 + $0x28] sm:$0xff] }
 0x237   : > { %2141 = vperm.xlu1 %3090, %v5091_v60   ;;  %v3223_v60 = vld [vmem:[%s4376_s19 + $0x20] sm:$0xff] }
 0x238   : > { %2156 = vperm.xlu0 %3089, %v5124_v49   ;;  %v1779_v49 = vsub.f32 %v3223_v60, %v5117_v25  ;;  %v3226_v25 = vld [vmem:[%s4376_s19 + $0x18] sm:$0xff] }
 0x23b   : > { %v5314_v46 = vpop.permute.xlu0 %1841  ;;  %2151 = vperm.xlu1 %3090, %v5113_v16   ;;  %v1777_v16 = vsub.f32 %v3224_v52, %v5098_v32  ;;  %v1780_v52 = vsub.f32 %v3228_v40, %v5128_v61 }
 0x23c   : > { %3092 = vset.pattern.permute.xlu0 %v3275_v26 }
 0x23d   : > { %2294 = vperm.xlu0 %3092, %v1776_v63  }
 0x23e   : > { %v5321_v28 = vpop.permute.xlu1 %1846 }
 0x23f   : > { %v5323_v34 = vpop.permute.xlu0 %1856  ;;  %3091 = vset.pattern.permute.xlu1 %v3275_v26  ;;  %v1778_v26 = vsub.f32 %v3226_v25, %v5115_v18 }
 0x240   : > { %2289 = vperm.xlu1 %3091, %v1775_v19   ;;  %v3227_v19 = vld [vmem:[%s4376_s19 + $0x40] sm:$0xff] }
 0x241   : > { %2309 = vperm.xlu0 %3092, %v1779_v49   ;;  %v1783_v60 = vsub.f32 %v3227_v19, %v5138_v17  ;;  %v3230_v17 = vld [vmem:[%s4376_s19 + $0x38] sm:$0xff] }
 0x242   : > { %v5329_v63 = vpop.permute.xlu1 %1851  ;;  %v1782_v25 = vsub.f32 %v3230_v17, %v5136_v39 }
 0x243   : > { %v5331_v11 = vpop.permute.xlu0 %1866 }
 0x244   : > { %2299 = vperm.xlu1 %3091, %v1777_v16   ;;  %v3229_v16 = vld [vmem:[%s4376_s19 + $0x50] sm:$0xff] }
 0x245   : > { %2319 = vperm.xlu0 %3092, %v1781_v7   ;;  %v1785_v36 = vsub.f32 %v3229_v16, %v5144_v50  ;;  %v3232_v50 = vld [vmem:[%s4376_s19 + $0x48] sm:$0xff] }
 0x246   : > { %v5337_v49 = vpop.permute.xlu1 %1861  ;;  %v1784_v40 = vsub.f32 %v3232_v50, %v5142_v55 }
 0x247   : > { %v5339_v32 = vpop.permute.xlu0 %1876 }
 0x248   : > { %2304 = vperm.xlu1 %3091, %v1778_v26   ;;  %v3231_v26 = vld [vmem:[%s4376_s19 + $0x60] sm:$0xff] }
 0x249   : > { %2329 = vperm.xlu0 %3092, %v1783_v60   ;;  %v1787_v19 = vsub.f32 %v3231_v26, %v5150_v31  ;;  %v3234_v31 = vld [vmem:[%s4376_s19 + $0x58] sm:$0xff] }
 0x24a   : > { %v5345_v7 = vpop.permute.xlu1 %1871  ;;  %v1786_v17 = vsub.f32 %v3234_v31, %v5148_v27 }
 0x24b   : > { %v5347_v18 = vpop.permute.xlu0 %1886 }
 0x24c   : > { %2314 = vperm.xlu1 %3091, %v1780_v52   ;;  %v3233_v52 = vld [vmem:[%s4376_s19 + $0x70] sm:$0xff] }
 0x24d   : > { %2339 = vperm.xlu0 %3092, %v1785_v36   ;;  %v1789_v16 = vsub.f32 %v3233_v52, %v5156_v1  ;;  %v3236_v1 = vld [vmem:[%s4376_s19 + $0x68] sm:$0xff] }
 0x24e   : > { %v5353_v60 = vpop.permute.xlu1 %1881  ;;  %v1788_v50 = vsub.f32 %v3236_v1, %v5154_v54 }
 0x24f   : > { %v5355_v61 = vpop.permute.xlu0 %1896 }
 0x250   : > { %2324 = vperm.xlu1 %3091, %v1782_v25   ;;  %v3235_v25 = vld [vmem:[%s4376_s19 + $0x80] sm:$0xff] }
 0x251   : > { %2349 = vperm.xlu0 %3092, %v1787_v19   ;;  %v1791_v26 = vsub.f32 %v3235_v25, %v5162_v3  ;;  %v3238_v3 = vld [vmem:[%s4376_s19 + $0x78] sm:$0xff] }
 0x252   : > { %v5361_v36 = vpop.permute.xlu1 %1891  ;;  %v1790_v31 = vsub.f32 %v3238_v3, %v5160_v22 }
 0x253   : > { %v5363_v39 = vpop.permute.xlu0 %1906 }
 0x254   : > { %2334 = vperm.xlu1 %3091, %v1784_v40   ;;  %v3237_v40 = vld [vmem:[%s4376_s19 + $0x90] sm:$0xff] }
 0x255   : > { %2359 = vperm.xlu0 %3092, %v1789_v16   ;;  %v1793_v52 = vsub.f32 %v3237_v40, %v5168_v62  ;;  %v3240_v62 = vld [vmem:[%s4376_s19 + $0x88] sm:$0xff] }
 0x256   : > { %v5369_v19 = vpop.permute.xlu1 %1901  ;;  %v1792_v1 = vsub.f32 %v3240_v62, %v5166_v8 }
 0x257   : > { %v5371_v55 = vpop.permute.xlu0 %1916 }
 0x258   : > { %2344 = vperm.xlu1 %3091, %v1786_v17   ;;  %v3239_v17 = vld [vmem:[%s4376_s19 + $0xa0] sm:$0xff] }
 0x259   : > { %2369 = vperm.xlu0 %3092, %v1791_v26   ;;  %v1795_v25 = vsub.f32 %v3239_v17, %v5174_v15  ;;  %v3242_v15 = vld [vmem:[%s4376_s19 + $0x98] sm:$0xff] }
 0x25a   : > { %v5377_v16 = vpop.permute.xlu1 %1911  ;;  %v1794_v3 = vsub.f32 %v3242_v15, %v5172_v6 }
 0x25b   : > { %v5379_v27 = vpop.permute.xlu0 %1926 }
 0x25c   : > { %2354 = vperm.xlu1 %3091, %v1788_v50   ;;  %v3241_v50 = vld [vmem:[%s4376_s19 + $0xb0] sm:$0xff] }
 0x25d   : > { %2379 = vperm.xlu0 %3092, %v1793_v52   ;;  %v1797_v40 = vsub.f32 %v3241_v50, %v5180_v51  ;;  %v3244_v51 = vld [vmem:[%s4376_s19 + $0xa8] sm:$0xff] }
 0x25e   : > { %v5385_v26 = vpop.permute.xlu1 %1921  ;;  %v1796_v62 = vsub.f32 %v3244_v51, %v5178_v56 }
 0x25f   : > { %v5387_v54 = vpop.permute.xlu0 %1936 }
 0x260   : > { %2364 = vperm.xlu1 %3091, %v1790_v31   ;;  %v3243_v31 = vld [vmem:[%s4376_s19 + $0xc0] sm:$0xff] }
 0x261   : > { %2389 = vperm.xlu0 %3092, %v1795_v25   ;;  %v1799_v17 = vsub.f32 %v3243_v31, %v5186_v30  ;;  %v3246_v30 = vld [vmem:[%s4376_s19 + $0xb8] sm:$0xff] }
 0x262   : > { %v5393_v52 = vpop.permute.xlu1 %1931  ;;  %v1798_v15 = vsub.f32 %v3246_v30, %v5184_v45 }
 0x263   : > { %v5395_v22 = vpop.permute.xlu0 %1946 }
 0x264   : > { %2374 = vperm.xlu1 %3091, %v1792_v1   ;;  %v3245_v1 = vld [vmem:[%s4376_s19 + $0xd0] sm:$0xff] }
 0x265   : > { %2399 = vperm.xlu0 %3092, %v1797_v40   ;;  %v1801_v50 = vsub.f32 %v3245_v1, %v5192_v20  ;;  %v3248_v20 = vld [vmem:[%s4376_s19 + $0xc8] sm:$0xff] }
 0x266   : > { %v5401_v25 = vpop.permute.xlu1 %1941  ;;  %v1800_v51 = vsub.f32 %v3248_v20, %v5190_v0 }
 0x267   : > { %v5403_v8 = vpop.permute.xlu0 %1956 }
 0x268   : > { %2384 = vperm.xlu1 %3091, %v1794_v3   ;;  %v3247_v3 = vld [vmem:[%s4376_s19 + $0xe0] sm:$0xff] }
 0x269   : > { %2409 = vperm.xlu0 %3092, %v1799_v17   ;;  %v1803_v31 = vsub.f32 %v3247_v3, %v5198_v47  ;;  %v3250_v47 = vld [vmem:[%s4376_s19 + $0xd8] sm:$0xff] }
 0x26a   : > { %v5409_v40 = vpop.permute.xlu1 %1951  ;;  %v1802_v30 = vsub.f32 %v3250_v47, %v5196_v9 }
 0x26b   : > { %v5411_v6 = vpop.permute.xlu0 %1966 }
 0x26c   : > { %2394 = vperm.xlu1 %3091, %v1796_v62   ;;  %v3249_v62 = vld [vmem:[%s4376_s19 + $0xf0] sm:$0xff] }
 0x26d   : > { %2419 = vperm.xlu0 %3092, %v1801_v50   ;;  %v1805_v1 = vsub.f32 %v3249_v62, %v5204_v35  ;;  %v3252_v35 = vld [vmem:[%s4376_s19 + $0xe8] sm:$0xff] }
 0x26e   : > { %v5417_v17 = vpop.permute.xlu1 %1961  ;;  %v1804_v20 = vsub.f32 %v3252_v35, %v5202_v59  ;;  %v3256_v59 = vld [vmem:[%s4376_s19 + $0x108] sm:$0xff]  ;;  %v6615_v35 = vld [vmem:[#allocation129_spill] sm:$0xff] }
 0x26f   : > { %v5419_v56 = vpop.permute.xlu0 %1976 }
 0x270   : > { %2404 = vperm.xlu1 %3091, %v1798_v15   ;;  %v3251_v15 = vld [vmem:[%s4376_s19 + $0x100] sm:$0xff] }
 0x271   : > { %2429 = vperm.xlu0 %3092, %v1803_v31   ;;  %v1807_v3 = vsub.f32 %v3251_v15, %v5210_v23  ;;  %v3254_v23 = vld [vmem:[%s4376_s19 + $0xf8] sm:$0xff]  ;;  %v3255_v15 = vld [vmem:[%s4376_s19 + $0x120] sm:$0xff] }
 0x272   : > { %v5425_v50 = vpop.permute.xlu1 %1971  ;;  %v1806_v47 = vsub.f32 %v3254_v23, %v5208_v53  ;;  %v3257_v53 = vld [vmem:[%s4376_s19 + $0x118] sm:$0xff]  ;;  %v6617_v23 = vld [vmem:[#allocation150_spill] sm:$0xff] }
 0x273   : > { %v5427_v45 = vpop.permute.xlu0 %1986 }
 0x274   : > { %2414 = vperm.xlu1 %3091, %v1800_v51   ;;  %v3253_v51 = vld [vmem:[%s4376_s19 + $0x110] sm:$0xff] }
 0x275   : > { %2439 = vperm.xlu0 %3092, %v1805_v1   ;;  %v1809_v62 = vsub.f32 %v3253_v51, %v5216_v4  ;;  %v1808_v4 = vsub.f32 %v3256_v59, %v5214_v13  ;;  %v3258_v13 = vld [vmem:[%s4376_s19 + $0x128] sm:$0xff] }
 0x276   : > { %v5433_v31 = vpop.permute.xlu1 %1981 }
 0x277   : > { %v5435_v0 = vpop.permute.xlu0 %1996 }
 0x278   : > { %6612 = vst [vmem:[#allocation152_spill] sm:$0xff] %v5435_v0  ;;  %2424 = vperm.xlu1 %3091, %v1802_v30   ;;  %v1811_v30 = vsub.f32 %v3255_v15, %v5222_v24  ;;  %v1810_v24 = vsub.f32 %v3257_v53, %v5220_v37  ;;  %v6624_v37 = vld [vmem:[#allocation146_spill] sm:$0xff] }
 0x279   : > { %2449 = vperm.xlu0 %3092, %v1807_v3  }
 0x27a   : > { %v5441_v1 = vpop.permute.xlu1 %1991 }
 0x27b   : > { %v5443_v9 = vpop.permute.xlu0 %2006 }
 0x27c   : > { %6613 = vst [vmem:[#allocation132_spill] sm:$0xff] %v5443_v9  ;;  %2434 = vperm.xlu1 %3091, %v1804_v20   ;;  %v1813_v20 = vsub.f32 %v6615_v35, %v5228_v10  ;;  %v6619_v10 = vld [vmem:[#allocation145_spill] sm:$0xff]  ;;  %v6620_v35 = vld [vmem:[#allocation147_spill] sm:$0xff]  ;;  %v6627_v9 = vld [vmem:[#allocation154_spill] sm:$0xff] }
 0x27d   : > { %2459 = vperm.xlu0 %3092, %v1809_v62   ;;  %v1812_v59 = vsub.f32 %v3258_v13, %v6619_v10  ;;  %v6630_v13 = vld [vmem:[#allocation148_spill] sm:$0xff] }
 0x27e   : > { %v5449_v3 = vpop.permute.xlu1 %2001 }
 0x27f   : > { %v5451_v0 = vpop.permute.xlu0 %2016 }
 0x280   : > { %6614 = vst [vmem:[#allocation135_spill] sm:$0xff] %v5451_v0  ;;  %2444 = vperm.xlu1 %3091, %v1806_v47   ;;  %v1815_v47 = vsub.f32 %v6617_v23, %v5234_v58  ;;  %v6621_v0 = vld [vmem:[#allocation133_spill] sm:$0xff]  ;;  %v6625_v58 = vld [vmem:[#allocation130_spill] sm:$0xff] }
 0x281   : > { %2469 = vperm.xlu0 %3092, %v1811_v30   ;;  %v1814_v53 = vsub.f32 %v6625_v58, %v6624_v37  ;;  %v6626_v23 = vld [vmem:[#allocation126_spill] sm:$0xff]  ;;  %v6635_v37 = vld [vmem:[#allocation124_spill] sm:$0xff] }
 0x282   : > { %v5457_v51 = vpop.permute.xlu1 %2011 }
 0x283   : > { %v5459_v62 = vpop.permute.xlu0 %2026 }
 0x284   : > { %6616 = vst [vmem:[#allocation134_spill] sm:$0xff] %v5459_v62  ;;  %2454 = vperm.xlu1 %3091, %v1808_v4   ;;  %v1817_v62 = vsub.f32 %v6621_v0, %v6620_v35  ;;  %v6631_v0 = vld [vmem:[#allocation151_spill] sm:$0xff] }
 0x285   : > { %2479 = vperm.xlu0 %3092, %v1813_v20   ;;  %v1816_v10 = vsub.f32 %v6631_v0, %v6630_v13  ;;  %v6632_v35 = vld [vmem:[#allocation127_spill] sm:$0xff]  ;;  %v6640_v13 = vld [vmem:[#allocation125_spill] sm:$0xff] }
 0x286   : > { %v5465_v15 = vpop.permute.xlu1 %2021 }
 0x287   : > { %v5467_v30 = vpop.permute.xlu0 %2036 }
 0x288   : > { %6618 = vst [vmem:[#allocation156_spill] sm:$0xff] %v5467_v30  ;;  %2464 = vperm.xlu1 %3091, %v1810_v24   ;;  %v1819_v30 = vsub.f32 %v6627_v9, %v6626_v23  ;;  %v6636_v9 = vld [vmem:[#allocation153_spill] sm:$0xff] }
 0x289   : > { %2489 = vperm.xlu0 %3092, %v1815_v47   ;;  %v1818_v58 = vsub.f32 %v6636_v9, %v6635_v37  ;;  %v6637_v23 = vld [vmem:[#allocation149_spill] sm:$0xff]  ;;  %v6644_v37 = vld [vmem:[#allocation128_spill] sm:$0xff] }
 0x28a   : > { %v5473_v4 = vpop.permute.xlu1 %2031 }
 0x28b   : > { %6622 = vst [vmem:[#allocation136_spill] sm:$0xff] %v5473_v4  ;;  %v5475_v20 = vpop.permute.xlu0 %2046  ;;  %v6633_v4 = vld [vmem:[#allocation137_spill] sm:$0xff] }
 0x28c   : > { %6623 = vst [vmem:[#allocation139_spill] sm:$0xff] %v5475_v20  ;;  %2474 = vperm.xlu1 %3091, %v1812_v59   ;;  %v1821_v20 = vsub.f32 %v6633_v4, %v6632_v35  ;;  %v6641_v4 = vld [vmem:[#allocation155_spill] sm:$0xff]  ;;  %v6642_v35 = vld [vmem:[#allocation141_spill] sm:$0xff] }
 0x28d   : > { %2499 = vperm.xlu0 %3092, %v1817_v62   ;;  %v1820_v0 = vsub.f32 %v6641_v4, %v6640_v13  ;;  %v6647_v13 = vld [vmem:[#allocation131_spill] sm:$0xff] }
 0x28e   : > { %v5481_v24 = vpop.permute.xlu1 %2041 }
 0x28f   : > { %6628 = vst [vmem:[#allocation138_spill] sm:$0xff] %v5481_v24  ;;  %v5483_v47 = vpop.permute.xlu0 %2056  ;;  %v6638_v24 = vld [vmem:[#allocation158_spill] sm:$0xff] }
 0x290   : > { %6629 = vst [vmem:[#allocation140_spill] sm:$0xff] %v5483_v47  ;;  %2484 = vperm.xlu1 %3091, %v1814_v53   ;;  %v1823_v47 = vsub.f32 %v6638_v24, %v6637_v23  ;;  %v6645_v24 = vld [vmem:[#allocation157_spill] sm:$0xff]  ;;  %v6646_v23 = vld [vmem:[#allocation143_spill] sm:$0xff] }
 0x291   : > { %2509 = vperm.xlu0 %3092, %v1819_v30   ;;  %v1822_v9 = vsub.f32 %v6645_v24, %v6644_v37  ;;  %v6651_v24 = vld [vmem:[#allocation163_spill] sm:$0xff] }
 0x292   : > { %v5489_v59 = vpop.permute.xlu1 %2051 }
 0x293   : > { %v5491_v62 = vpop.permute.xlu0 %2066 }
 0x294   : > { %6634 = vst [vmem:[#allocation142_spill] sm:$0xff] %v5491_v62  ;;  %2494 = vperm.xlu1 %3091, %v1816_v10   ;;  %v1825_v62 = vsub.f32 %v6642_v35, %v5264_v12  ;;  %v6648_v12 = vld [vmem:[#allocation159_spill] sm:$0xff]  ;;  %v6649_v35 = vld [vmem:[#allocation144_spill] sm:$0xff] }
 0x295   : > { %2519 = vperm.xlu0 %3092, %v1821_v20   ;;  %v1824_v4 = vsub.f32 %v6648_v12, %v6647_v13  ;;  %v6653_v12 = vld [vmem:[#allocation165_spill] sm:$0xff] }
 0x296   : > { %v5497_v53 = vpop.permute.xlu1 %2061 }
 0x297   : > { %v5499_v30 = vpop.permute.xlu0 %2076 }
 0x298   : > { %6639 = vst [vmem:[#allocation129_spill] sm:$0xff] %v5499_v30  ;;  %2504 = vperm.xlu1 %3091, %v1818_v58   ;;  %v1827_v30 = vsub.f32 %v6646_v23, %v5272_v2  ;;  %v6650_v2 = vld [vmem:[#allocation160_spill] sm:$0xff]  ;;  %v1831_v23 = vsub.f32 %v6651_v24, %v5286_v43 }
 0x299   : > { %2529 = vperm.xlu0 %3092, %v1823_v47   ;;  %v1826_v37 = vsub.f32 %v6650_v2, %v5268_v38  ;;  %v6655_v38 = vld [vmem:[#allocation162_spill] sm:$0xff]  ;;  %v6656_v2 = vld [vmem:[#allocation167_spill] sm:$0xff] }
 0x29a   : > { %v5505_v10 = vpop.permute.xlu1 %2071  ;;  %v1830_v43 = vsub.f32 %v6655_v38, %v5282_v21  ;;  %v1835_v24 = vsub.f32 %v6656_v2, %v5300_v5  ;;  %v6661_v5 = vld [vmem:[#allocation166_spill] sm:$0xff]  ;;  %v3259_v2 = vld [vmem:[%s3307_s15 + $0x10] sm:$0xff] }
 0x29b   : > { %v5507_v20 = vpop.permute.xlu0 %2086 }
 0x29c   : > { %6643 = vst [vmem:[#allocation150_spill] sm:$0xff] %v5507_v20  ;;  %2514 = vperm.xlu1 %3091, %v1820_v0   ;;  %v1829_v20 = vsub.f32 %v6649_v35, %v5278_v29  ;;  %v6652_v29 = vld [vmem:[#allocation161_spill] sm:$0xff]  ;;  %v1833_v35 = vsub.f32 %v6653_v12, %v5292_v33 }
 0x29d   : > { %2539 = vperm.xlu0 %3092, %v1825_v62   ;;  %v1828_v13 = vsub.f32 %v6652_v29, %v5276_v14  ;;  %v6658_v14 = vld [vmem:[#allocation164_spill] sm:$0xff]  ;;  %v6659_v29 = vld [vmem:[#allocation169_spill] sm:$0xff] }
 0x29e   : > { %v5513_v58 = vpop.permute.xlu1 %2081  ;;  %v1832_v33 = vsub.f32 %v6658_v14, %v5290_v44  ;;  %v6664_v44 = vld [vmem:[#allocation168_spill] sm:$0xff]  ;;  %v3260_v14 = vld [vmem:[%s3307_s15 + $0x18] sm:$0xff] }
 0x29f   : > { %v5515_v47 = vpop.permute.xlu0 %2096 }
 0x2a0   : > { %2524 = vperm.xlu1 %3091, %v1822_v9  }
 0x2a1   : > { %2549 = vperm.xlu0 %3092, %v1827_v30  }
 0x2a2   : > { %v5521_v0 = vpop.permute.xlu1 %2091 }
 0x2a3   : > { %v5523_v62 = vpop.permute.xlu0 %2106 }
 0x2a4   : > { %2534 = vperm.xlu1 %3091, %v1824_v4  }
 0x2a5   : > { %2559 = vperm.xlu0 %3092, %v1829_v20  }
 0x2a6   : > { %v5529_v9 = vpop.permute.xlu1 %2101 }
 0x2a7   : > { %v5531_v30 = vpop.permute.xlu0 %2116 }
 0x2a8   : > { %2544 = vperm.xlu1 %3091, %v1826_v37  }
 0x2a9   : > { %2569 = vperm.xlu0 %3092, %v1831_v23  }
 0x2aa   : > { %v5537_v4 = vpop.permute.xlu1 %2111 }
 0x2ab   : > { %v5539_v20 = vpop.permute.xlu0 %2126 }
 0x2ac   : > { %6654 = vst [vmem:[#allocation145_spill] sm:$0xff] %v5539_v20  ;;  %2554 = vperm.xlu1 %3091, %v1828_v13   ;;  %v1837_v13 = vsub.f32 %v6659_v29, %v5306_v57  ;;  %v1836_v57 = vsub.f32 %v6664_v44, %v5304_v41  ;;  %v6666_v41 = vld [vmem:[#allocation170_spill] sm:$0xff] }
 0x2ad   : > { %2579 = vperm.xlu0 %3092, %v1833_v35   ;;  %v1834_v35 = vsub.f32 %v6661_v5, %v5296_v42  ;;  %v3261_v44 = vld [vmem:[%s3307_s15] sm:$0xff] }
 0x2ae   : > { %v5545_v37 = vpop.permute.xlu1 %2121 }
 0x2af   : > { %v5547_v23 = vpop.permute.xlu0 %2136 }
 0x2b0   : > { %6657 = vst [vmem:[#allocation147_spill] sm:$0xff] %v5547_v23  ;;  %2564 = vperm.xlu1 %3091, %v1830_v43  }
 0x2b1   : > { %2589 = vperm.xlu0 %3092, %v1835_v24   ;;  %v2161_v24 = vmul.f32 %v3259_v2, %v5321_v28  ;;  %v3262_v2 = vld [vmem:[%s3307_s15 + $0x8] sm:$0xff] }
 0x2b2   : > { %v5553_v12 = vpop.permute.xlu1 %2131 }
 0x2b3   : > { %v5555_v21 = vpop.permute.xlu0 %2146 }
 0x2b4   : > { %6660 = vst [vmem:[#allocation133_spill] sm:$0xff] %v5555_v21  ;;  %2574 = vperm.xlu1 %3091, %v1832_v33   ;;  %v2162_v33 = vmul.f32 %v3260_v14, %v5321_v28  ;;  %v2159_v28 = vmul.f32 %v3261_v44, %v5314_v46  ;;  %v2160_v14 = vmul.f32 %v3262_v2, %v5314_v46  ;;  %v6667_v2 = vld [vmem:[#allocation2_spill] sm:$0xff] }
 0x2b5   : > { %2599 = vperm.xlu0 %3092, %v1837_v13  }
 0x2b6   : > { %v5559_v38 = vpop.permute.xlu1 %2141 }
 0x2b7   : > { %6662 = vst [vmem:[#allocation146_spill] sm:$0xff] %v5559_v38  ;;  %v5561_v43 = vpop.permute.xlu0 %2156 }
 0x2b8   : > { %6663 = vst [vmem:[#allocation130_spill] sm:$0xff] %v5561_v43  ;;  %2584 = vperm.xlu1 %3091, %v1834_v35   ;;  %v1838_v35 = vsub.f32 %v6666_v41, %v5312_v48 }
 0x2ba   : > { %v5569_v29 = vpop.permute.xlu1 %2151 }
 0x2bb   : > { %6665 = vst [vmem:[#allocation126_spill] sm:$0xff] %v5569_v29 }
 0x2bc   : > { %v2295_v42 = vpop.permute.xlu0 %2294  ;;  %2594 = vperm.xlu1 %3091, %v1836_v57  }
 0x2bd   : > { %v2609_v13 = vadd.f32 %v2295_v42, %v2161_v24  ;;  %v2610_v5 = vadd.f32 %v2295_v42, %v2162_v33  ;;  %v3263_v24 = vld [vmem:[%s3307_s15 + $0x40] sm:$0xff]  ;;  %v3264_v33 = vld [vmem:[%s3307_s15 + $0x48] sm:$0xff] }
 0x2be   : > { %v2167_v57 = vmul.f32 %v3263_v24, %v5337_v49  ;;  %v2168_v42 = vmul.f32 %v3264_v33, %v5337_v49  ;;  %v2163_v24 = vmul.f32 %v5329_v63, %v6667_v2  ;;  %v6668_v49 = vld [vmem:[#allocation3_spill] sm:$0xff]  ;;  %v6670_v33 = vld [vmem:[#allocation9_spill] sm:$0xff] }
 0x2bf   : > { %v2737_v43 = vmax.f32 %v2609_v13, 0.0  ;;  %v2738_v21 = vmax.f32 %v2610_v5, 0.0  ;;  %v2290_v23 = vpop.permute.xlu1 %2289  ;;  %v2164_v13 = vmul.f32 %v5329_v63, %v6668_v49  ;;  %v6669_v5 = vld [vmem:[#allocation11_spill] sm:$0xff]  ;;  %v6674_v2 = vld [vmem:[#allocation13_spill] sm:$0xff] }
 0x2c0   : > { %v2310_v29 = vpop.permute.xlu0 %2309  ;;  %v2607_v48 = vadd.f32 %v2290_v23, %v2159_v28  ;;  %v2608_v41 = vadd.f32 %v2290_v23, %v2160_v14  ;;  %2604 = vperm.xlu1 %3091, %v1838_v35   ;;  %v2176_v49 = vmul.f32 %v5353_v60, %v6674_v2 }
 0x2c1   : > { %2865 = vst [vmem:[%s5576_s23 + $0x10] sm:$0xff] %v2737_v43  ;;  %2866 = vst.msk [vmem:[%s5576_s23 + $0x18] sm:$0xff] %vm302_vm0, %v2738_v21  ;;  %v2615_v44 = vadd.f32 %v2310_v29, %v2167_v57  ;;  %v2616_v46 = vadd.f32 %v2310_v29, %v2168_v42  ;;  %v2171_v43 = vmul.f32 %v5345_v7, %v6669_v5  ;;  %v6671_v42 = vld [vmem:[#allocation4_spill] sm:$0xff] }
 0x2c2   : > { %v2172_v21 = vmul.f32 %v5345_v7, %v6670_v33  ;;  %v2735_v28 = vmax.f32 %v2607_v48, 0.0  ;;  %v2736_v20 = vmax.f32 %v2608_v41, 0.0  ;;  %v2165_v48 = vmul.f32 %v5323_v34, %v6671_v42  ;;  %v6672_v41 = vld [vmem:[#allocation5_spill] sm:$0xff] }
 0x2c3   : > { %v2743_v23 = vmax.f32 %v2615_v44, 0.0  ;;  %v2744_v14 = vmax.f32 %v2616_v46, 0.0  ;;  %v2300_v57 = vpop.permute.xlu1 %2299  ;;  %v2166_v44 = vmul.f32 %v5323_v34, %v6672_v41  ;;  %v6673_v46 = vld [vmem:[#allocation15_spill] sm:$0xff] }
 0x2c4   : > { %v2320_v38 = vpop.permute.xlu0 %2319  ;;  %2863 = vst [vmem:[%s5576_s23] sm:$0xff] %v2735_v28  ;;  %2864 = vst.msk [vmem:[%s5576_s23 + $0x8] sm:$0xff] %vm302_vm0, %v2736_v20  ;;  %v2611_v63 = vadd.f32 %v2300_v57, %v2163_v24  ;;  %v2612_v29 = vadd.f32 %v2300_v57, %v2164_v13  ;;  %v2175_v20 = vmul.f32 %v5353_v60, %v6673_v46  ;;  %v6676_v57 = vld [vmem:[#allocation6_spill] sm:$0xff] }
 0x2c5   : > { %2871 = vst [vmem:[%s5576_s23 + $0x40] sm:$0xff] %v2743_v23  ;;  %2872 = vst.msk [vmem:[%s5576_s23 + $0x48] sm:$0xff] %vm302_vm0, %v2744_v14  ;;  %v2619_v35 = vadd.f32 %v2320_v38, %v2171_v43  ;;  %v2620_v7 = vadd.f32 %v2320_v38, %v2172_v21  ;;  %v6675_v21 = vld [vmem:[#allocation7_spill] sm:$0xff] }
 0x2c6   : > { %v2739_v5 = vmax.f32 %v2611_v63, 0.0  ;;  %v2740_v33 = vmax.f32 %v2612_v29, 0.0  ;;  %v2169_v14 = vmul.f32 %v5331_v11, %v6675_v21  ;;  %v2170_v63 = vmul.f32 %v5331_v11, %v6676_v57  ;;  %v6677_v29 = vld [vmem:[#allocation19_spill] sm:$0xff] }
 0x2c7   : > { %v2747_v24 = vmax.f32 %v2619_v35, 0.0  ;;  %v2748_v28 = vmax.f32 %v2620_v7, 0.0  ;;  %v2305_v13 = vpop.permute.xlu1 %2304  ;;  %v2179_v35 = vmul.f32 %v5361_v36, %v6677_v29  ;;  %v6678_v7 = vld [vmem:[#allocation17_spill] sm:$0xff] }
 0x2c8   : > { %v2330_v23 = vpop.permute.xlu0 %2329  ;;  %2867 = vst [vmem:[%s5576_s23 + $0x20] sm:$0xff] %v2739_v5  ;;  %2868 = vst.msk [vmem:[%s5576_s23 + $0x28] sm:$0xff] %vm302_vm0, %v2740_v33  ;;  %v2613_v34 = vadd.f32 %v2305_v13, %v2165_v48  ;;  %v2614_v38 = vadd.f32 %v2305_v13, %v2166_v44  ;;  %v2180_v42 = vmul.f32 %v5361_v36, %v6678_v7  ;;  %v6679_v33 = vld [vmem:[#allocation10_spill] sm:$0xff] }
 0x2c9   : > { %2875 = vst [vmem:[%s5576_s23 + $0x60] sm:$0xff] %v2747_v24  ;;  %2876 = vst.msk [vmem:[%s5576_s23 + $0x68] sm:$0xff] %vm302_vm0, %v2748_v28  ;;  %v2623_v43 = vadd.f32 %v2330_v23, %v2175_v20  ;;  %v2624_v60 = vadd.f32 %v2330_v23, %v2176_v49  ;;  %v2173_v24 = vmul.f32 %v5339_v32, %v6679_v33  ;;  %v6680_v28 = vld [vmem:[#allocation8_spill] sm:$0xff]  ;;  %v6681_v23 = vld [vmem:[#allocation23_spill] sm:$0xff] }
 0x2ca   : > { %v2741_v41 = vmax.f32 %v2613_v34, 0.0  ;;  %v2742_v46 = vmax.f32 %v2614_v38, 0.0  ;;  %v2174_v13 = vmul.f32 %v5339_v32, %v6680_v28  ;;  %v2183_v34 = vmul.f32 %v5369_v19, %v6681_v23  ;;  %v6682_v38 = vld [vmem:[#allocation21_spill] sm:$0xff] }
 0x2cb   : > { %v2751_v48 = vmax.f32 %v2623_v43, 0.0  ;;  %v2752_v2 = vmax.f32 %v2624_v60, 0.0  ;;  %v2315_v44 = vpop.permute.xlu1 %2314  ;;  %v2184_v43 = vmul.f32 %v5369_v19, %v6682_v38 }
 0x2cc   : > { %v2340_v5 = vpop.permute.xlu0 %2339  ;;  %2869 = vst [vmem:[%s5576_s23 + $0x30] sm:$0xff] %v2741_v41  ;;  %2870 = vst.msk [vmem:[%s5576_s23 + $0x38] sm:$0xff] %vm302_vm0, %v2742_v46  ;;  %v2617_v11 = vadd.f32 %v2315_v44, %v2169_v14  ;;  %v2618_v20 = vadd.f32 %v2315_v44, %v2170_v63  ;;  %v6684_v46 = vld [vmem:[#allocation12_spill] sm:$0xff] }
 0x2cd   : > { %2879 = vst [vmem:[%s5576_s23 + $0x80] sm:$0xff] %v2751_v48  ;;  %2880 = vst.msk [vmem:[%s5576_s23 + $0x88] sm:$0xff] %vm302_vm0, %v2752_v2  ;;  %v2627_v49 = vadd.f32 %v2340_v5, %v2179_v35  ;;  %v2628_v36 = vadd.f32 %v2340_v5, %v2180_v42  ;;  %v6683_v42 = vld [vmem:[#allocation14_spill] sm:$0xff]  ;;  %v2178_v48 = vmul.f32 %v5347_v18, %v6684_v46  ;;  %v6685_v2 = vld [vmem:[#allocation27_spill] sm:$0xff] }
 0x2ce   : > { %v2745_v60 = vmax.f32 %v2617_v11, 0.0  ;;  %v2746_v21 = vmax.f32 %v2618_v20, 0.0  ;;  %v2177_v41 = vmul.f32 %v5347_v18, %v6683_v42  ;;  %v2187_v44 = vmul.f32 %v5377_v16, %v6685_v2  ;;  %v6686_v5 = vld [vmem:[#allocation25_spill] sm:$0xff] }
 0x2cf   : > { %v2755_v14 = vmax.f32 %v2627_v49, 0.0  ;;  %v2756_v57 = vmax.f32 %v2628_v36, 0.0  ;;  %v2325_v63 = vpop.permute.xlu1 %2324  ;;  %v2188_v11 = vmul.f32 %v5377_v16, %v6686_v5 }
 0x2d0   : > { %v2350_v29 = vpop.permute.xlu0 %2349  ;;  %2873 = vst [vmem:[%s5576_s23 + $0x50] sm:$0xff] %v2745_v60  ;;  %2874 = vst.msk [vmem:[%s5576_s23 + $0x58] sm:$0xff] %vm302_vm0, %v2746_v21  ;;  %v2621_v32 = vadd.f32 %v2325_v63, %v2173_v24  ;;  %v2622_v35 = vadd.f32 %v2325_v63, %v2174_v13  ;;  %v6689_v21 = vld [vmem:[#allocation31_spill] sm:$0xff] }
 0x2d1   : > { %2883 = vst [vmem:[%s5576_s23 + $0xa0] sm:$0xff] %v2755_v14  ;;  %2884 = vst.msk [vmem:[%s5576_s23 + $0xa8] sm:$0xff] %vm302_vm0, %v2756_v57  ;;  %v2631_v7 = vadd.f32 %v2350_v29, %v2183_v34  ;;  %v2632_v19 = vadd.f32 %v2350_v29, %v2184_v43  ;;  %v6687_v34 = vld [vmem:[#allocation18_spill] sm:$0xff]  ;;  %v6688_v43 = vld [vmem:[#allocation16_spill] sm:$0xff]  ;;  %v2191_v14 = vmul.f32 %v5385_v26, %v6689_v21 }
 0x2d2   : > { %v2749_v20 = vmax.f32 %v2621_v32, 0.0  ;;  %v2750_v49 = vmax.f32 %v2622_v35, 0.0  ;;  %v2181_v38 = vmul.f32 %v5355_v61, %v6687_v34  ;;  %v2182_v60 = vmul.f32 %v5355_v61, %v6688_v43  ;;  %v6690_v57 = vld [vmem:[#allocation29_spill] sm:$0xff] }
 0x2d3   : > { %v2759_v36 = vmax.f32 %v2631_v7, 0.0  ;;  %v2760_v33 = vmax.f32 %v2632_v19, 0.0  ;;  %v2335_v24 = vpop.permute.xlu1 %2334  ;;  %v2192_v63 = vmul.f32 %v5385_v26, %v6690_v57 }
 0x2d4   : > { %v2360_v28 = vpop.permute.xlu0 %2359  ;;  %2877 = vst [vmem:[%s5576_s23 + $0x70] sm:$0xff] %v2749_v20  ;;  %2878 = vst.msk [vmem:[%s5576_s23 + $0x78] sm:$0xff] %vm302_vm0, %v2750_v49  ;;  %v2625_v18 = vadd.f32 %v2335_v24, %v2177_v41  ;;  %v2626_v13 = vadd.f32 %v2335_v24, %v2178_v48  ;;  %v6691_v48 = vld [vmem:[#allocation22_spill] sm:$0xff]  ;;  %v6694_v49 = vld [vmem:[#allocation33_spill] sm:$0xff] }
 0x2d5   : > { %2887 = vst [vmem:[%s5576_s23 + $0xc0] sm:$0xff] %v2759_v36  ;;  %2888 = vst.msk [vmem:[%s5576_s23 + $0xc8] sm:$0xff] %vm302_vm0, %v2760_v33  ;;  %v2635_v23 = vadd.f32 %v2360_v28, %v2187_v44  ;;  %v2636_v16 = vadd.f32 %v2360_v28, %v2188_v11  ;;  %v2185_v2 = vmul.f32 %v5363_v39, %v6691_v48  ;;  %v6692_v44 = vld [vmem:[#allocation20_spill] sm:$0xff]  ;;  %v6693_v11 = vld [vmem:[#allocation35_spill] sm:$0xff] }
 0x2d6   : > { %v2753_v29 = vmax.f32 %v2625_v18, 0.0  ;;  %v2754_v32 = vmax.f32 %v2626_v13, 0.0  ;;  %v2186_v5 = vmul.f32 %v5363_v39, %v6692_v44  ;;  %v2195_v20 = vmul.f32 %v5393_v52, %v6693_v11 }
 0x2d7   : > { %v2763_v35 = vmax.f32 %v2635_v23, 0.0  ;;  %v2764_v7 = vmax.f32 %v2636_v16, 0.0  ;;  %v2345_v19 = vpop.permute.xlu1 %2344  ;;  %v2196_v36 = vmul.f32 %v5393_v52, %v6694_v49 }
 0x2d8   : > { %v2370_v42 = vpop.permute.xlu0 %2369  ;;  %2881 = vst [vmem:[%s5576_s23 + $0x90] sm:$0xff] %v2753_v29  ;;  %2882 = vst.msk [vmem:[%s5576_s23 + $0x98] sm:$0xff] %vm302_vm0, %v2754_v32  ;;  %v2629_v61 = vadd.f32 %v2345_v19, %v2181_v38  ;;  %v2630_v41 = vadd.f32 %v2345_v19, %v2182_v60  ;;  %v6695_v38 = vld [vmem:[#allocation26_spill] sm:$0xff]  ;;  %v6696_v60 = vld [vmem:[#allocation24_spill] sm:$0xff] }
 0x2d9   : > { %2891 = vst [vmem:[%s5576_s23 + $0xe0] sm:$0xff] %v2763_v35  ;;  %2892 = vst.msk [vmem:[%s5576_s23 + $0xe8] sm:$0xff] %vm302_vm0, %v2764_v7  ;;  %v2639_v46 = vadd.f32 %v2370_v42, %v2191_v14  ;;  %v2640_v26 = vadd.f32 %v2370_v42, %v2192_v63  ;;  %v2189_v43 = vmul.f32 %v5371_v55, %v6695_v38  ;;  %v6697_v14 = vld [vmem:[#allocation39_spill] sm:$0xff]  ;;  %v6698_v63 = vld [vmem:[#allocation37_spill] sm:$0xff] }
 0x2da   : > { %v2757_v33 = vmax.f32 %v2629_v61, 0.0  ;;  %v2758_v24 = vmax.f32 %v2630_v41, 0.0  ;;  %v2190_v21 = vmul.f32 %v5371_v55, %v6696_v60  ;;  %v2199_v57 = vmul.f32 %v5401_v25, %v6697_v14 }
 0x2db   : > { %v2767_v28 = vmax.f32 %v2639_v46, 0.0  ;;  %v2768_v18 = vmax.f32 %v2640_v26, 0.0  ;;  %v2355_v13 = vpop.permute.xlu1 %2354  ;;  %v2200_v29 = vmul.f32 %v5401_v25, %v6698_v63  ;;  %v6699_v26 = vld [vmem:[#allocation30_spill] sm:$0xff] }
 0x2dc   : > { %v2380_v23 = vpop.permute.xlu0 %2379  ;;  %2885 = vst [vmem:[%s5576_s23 + $0xb0] sm:$0xff] %v2757_v33  ;;  %2886 = vst.msk [vmem:[%s5576_s23 + $0xb8] sm:$0xff] %vm302_vm0, %v2758_v24  ;;  %v2633_v39 = vadd.f32 %v2355_v13, %v2185_v2  ;;  %v2634_v16 = vadd.f32 %v2355_v13, %v2186_v5  ;;  %v2193_v48 = vmul.f32 %v5379_v27, %v6699_v26  ;;  %v6700_v2 = vld [vmem:[#allocation28_spill] sm:$0xff]  ;;  %v6701_v5 = vld [vmem:[#allocation43_spill] sm:$0xff] }
 0x2dd   : > { %2895 = vst [vmem:[%s5576_s23 + $0x100] sm:$0xff] %v2767_v28  ;;  %2896 = vst.msk [vmem:[%s5576_s23 + $0x108] sm:$0xff] %vm302_vm0, %v2768_v18  ;;  %v2643_v34 = vadd.f32 %v2380_v23, %v2195_v20  ;;  %v2644_v52 = vadd.f32 %v2380_v23, %v2196_v36  ;;  %v2194_v44 = vmul.f32 %v5379_v27, %v6700_v2  ;;  %v6702_v20 = vld [vmem:[#allocation41_spill] sm:$0xff] }
 0x2de   : > { %v2761_v32 = vmax.f32 %v2633_v39, 0.0  ;;  %v2762_v35 = vmax.f32 %v2634_v16, 0.0  ;;  %v2203_v11 = vmul.f32 %v5409_v40, %v6701_v5  ;;  %v2204_v49 = vmul.f32 %v5409_v40, %v6702_v20  ;;  %v6703_v16 = vld [vmem:[#allocation34_spill] sm:$0xff] }
 0x2df   : > { %v2771_v7 = vmax.f32 %v2643_v34, 0.0  ;;  %v2772_v19 = vmax.f32 %v2644_v52, 0.0  ;;  %v2365_v42 = vpop.permute.xlu1 %2364  ;;  %v2197_v34 = vmul.f32 %v5387_v54, %v6703_v16  ;;  %v6704_v52 = vld [vmem:[#allocation32_spill] sm:$0xff] }
 0x2e0   : > { %v2390_v61 = vpop.permute.xlu0 %2389  ;;  %2889 = vst [vmem:[%s5576_s23 + $0xd0] sm:$0xff] %v2761_v32  ;;  %2890 = vst.msk [vmem:[%s5576_s23 + $0xd8] sm:$0xff] %vm302_vm0, %v2762_v35  ;;  %v2637_v55 = vadd.f32 %v2365_v42, %v2189_v43  ;;  %v2638_v41 = vadd.f32 %v2365_v42, %v2190_v21  ;;  %v2198_v38 = vmul.f32 %v5387_v54, %v6704_v52  ;;  %v6705_v43 = vld [vmem:[#allocation47_spill] sm:$0xff]  ;;  %v6706_v21 = vld [vmem:[#allocation45_spill] sm:$0xff] }
 0x2e1   : > { %2899 = vst [vmem:[%s5576_s23 + $0x120] sm:$0xff] %v2771_v7  ;;  %2900 = vst.msk [vmem:[%s5576_s23 + $0x128] sm:$0xff] %vm302_vm0, %v2772_v19  ;;  %v2647_v46 = vadd.f32 %v2390_v61, %v2199_v57  ;;  %v2648_v25 = vadd.f32 %v2390_v61, %v2200_v29  ;;  %v2207_v60 = vmul.f32 %v5417_v17, %v6705_v43  ;;  %v6707_v61 = vld [vmem:[#allocation38_spill] sm:$0xff] }
 0x2e2   : > { %v2765_v36 = vmax.f32 %v2637_v55, 0.0  ;;  %v2766_v33 = vmax.f32 %v2638_v41, 0.0  ;;  %v2208_v14 = vmul.f32 %v5417_v17, %v6706_v21  ;;  %v2201_v55 = vmul.f32 %v5395_v22, %v6707_v61  ;;  %v6708_v41 = vld [vmem:[#allocation36_spill] sm:$0xff] }
 0x2e3   : > { %v2775_v24 = vmax.f32 %v2647_v46, 0.0  ;;  %v2776_v28 = vmax.f32 %v2648_v25, 0.0  ;;  %v2375_v18 = vpop.permute.xlu1 %2374  ;;  %v2202_v46 = vmul.f32 %v5395_v22, %v6708_v41  ;;  %v6709_v25 = vld [vmem:[#allocation51_spill] sm:$0xff] }
 0x2e4   : > { %v2400_v13 = vpop.permute.xlu0 %2399  ;;  %2893 = vst [vmem:[%s5576_s23 + $0xf0] sm:$0xff] %v2765_v36  ;;  %2894 = vst.msk [vmem:[%s5576_s23 + $0xf8] sm:$0xff] %vm302_vm0, %v2766_v33  ;;  %v2641_v27 = vadd.f32 %v2375_v18, %v2193_v48  ;;  %v2642_v23 = vadd.f32 %v2375_v18, %v2194_v44  ;;  %v2211_v26 = vmul.f32 %v5425_v50, %v6709_v25  ;;  %v6710_v48 = vld [vmem:[#allocation49_spill] sm:$0xff] }
 0x2e5   : > { %2903 = vst [vmem:[%s5576_s23 + $0x140] sm:$0xff] %v2775_v24  ;;  %2904 = vst.msk [vmem:[%s5576_s23 + $0x148] sm:$0xff] %vm302_vm0, %v2776_v28  ;;  %v2651_v39 = vadd.f32 %v2400_v13, %v2203_v11  ;;  %v2652_v40 = vadd.f32 %v2400_v13, %v2204_v49  ;;  %v2212_v2 = vmul.f32 %v5425_v50, %v6710_v48  ;;  %v6711_v28 = vld [vmem:[#allocation42_spill] sm:$0xff]  ;;  %v6712_v13 = vld [vmem:[#allocation40_spill] sm:$0xff] }
 0x2e6   : > { %v2769_v57 = vmax.f32 %v2641_v27, 0.0  ;;  %v2770_v63 = vmax.f32 %v2642_v23, 0.0  ;;  %v2205_v18 = vmul.f32 %v5403_v8, %v6711_v28  ;;  %v2206_v27 = vmul.f32 %v5403_v8, %v6712_v13  ;;  %v6713_v23 = vld [vmem:[#allocation55_spill] sm:$0xff] }
 0x2e7   : > { %v2779_v29 = vmax.f32 %v2651_v39, 0.0  ;;  %v2780_v32 = vmax.f32 %v2652_v40, 0.0  ;;  %v2385_v35 = vpop.permute.xlu1 %2384  ;;  %v2215_v39 = vmul.f32 %v5433_v31, %v6713_v23  ;;  %v6714_v40 = vld [vmem:[#allocation53_spill] sm:$0xff] }
 0x2e8   : > { %v2410_v7 = vpop.permute.xlu0 %2409  ;;  %2897 = vst [vmem:[%s5576_s23 + $0x110] sm:$0xff] %v2769_v57  ;;  %2898 = vst.msk [vmem:[%s5576_s23 + $0x118] sm:$0xff] %vm302_vm0, %v2770_v63  ;;  %v2645_v54 = vadd.f32 %v2385_v35, %v2197_v34  ;;  %v2646_v19 = vadd.f32 %v2385_v35, %v2198_v38  ;;  %v2216_v16 = vmul.f32 %v5433_v31, %v6714_v40  ;;  %v6715_v63 = vld [vmem:[#allocation46_spill] sm:$0xff] }
 0x2e9   : > { %2907 = vst [vmem:[%s5576_s23 + $0x160] sm:$0xff] %v2779_v29  ;;  %2908 = vst.msk [vmem:[%s5576_s23 + $0x168] sm:$0xff] %vm302_vm0, %v2780_v32  ;;  %v2655_v42 = vadd.f32 %v2410_v7, %v2207_v60  ;;  %v2656_v17 = vadd.f32 %v2410_v7, %v2208_v14  ;;  %v2209_v29 = vmul.f32 %v5411_v6, %v6715_v63  ;;  %v6716_v32 = vld [vmem:[#allocation44_spill] sm:$0xff]  ;;  %v6717_v7 = vld [vmem:[#allocation59_spill] sm:$0xff] }
 0x2ea   : > { %v2773_v44 = vmax.f32 %v2645_v54, 0.0  ;;  %v2774_v5 = vmax.f32 %v2646_v19, 0.0  ;;  %v2210_v35 = vmul.f32 %v5411_v6, %v6716_v32  ;;  %v2219_v54 = vmul.f32 %v5441_v1, %v6717_v7  ;;  %v6718_v19 = vld [vmem:[#allocation57_spill] sm:$0xff]  ;;  %v6728_v7 = vld [vmem:[#allocation152_spill] sm:$0xff] }
 0x2eb   : > { %v2783_v11 = vmax.f32 %v2655_v42, 0.0  ;;  %v2784_v20 = vmax.f32 %v2656_v17, 0.0  ;;  %v2395_v49 = vpop.permute.xlu1 %2394  ;;  %v2220_v42 = vmul.f32 %v5441_v1, %v6718_v19  ;;  %v6729_v19 = vld [vmem:[#allocation56_spill] sm:$0xff] }
 0x2ec   : > { %v2420_v36 = vpop.permute.xlu0 %2419  ;;  %2901 = vst [vmem:[%s5576_s23 + $0x130] sm:$0xff] %v2773_v44  ;;  %2902 = vst.msk [vmem:[%s5576_s23 + $0x138] sm:$0xff] %vm302_vm0, %v2774_v5  ;;  %v2649_v22 = vadd.f32 %v2395_v49, %v2201_v55  ;;  %v2650_v33 = vadd.f32 %v2395_v49, %v2202_v46  ;;  %v6720_v5 = vld [vmem:[#allocation48_spill] sm:$0xff] }
 0x2ed   : > { %2911 = vst [vmem:[%s5576_s23 + $0x180] sm:$0xff] %v2783_v11  ;;  %2912 = vst.msk [vmem:[%s5576_s23 + $0x188] sm:$0xff] %vm302_vm0, %v2784_v20  ;;  %v2659_v24 = vadd.f32 %v2420_v36, %v2211_v26  ;;  %v2660_v50 = vadd.f32 %v2420_v36, %v2212_v2  ;;  %v6719_v2 = vld [vmem:[#allocation50_spill] sm:$0xff]  ;;  %v2214_v11 = vmul.f32 %v5419_v56, %v6720_v5  ;;  %v6721_v20 = vld [vmem:[#allocation63_spill] sm:$0xff] }
 0x2ee   : > { %v2777_v34 = vmax.f32 %v2649_v22, 0.0  ;;  %v2778_v52 = vmax.f32 %v2650_v33, 0.0  ;;  %v2213_v44 = vmul.f32 %v5419_v56, %v6719_v2  ;;  %v2223_v49 = vmul.f32 %v5449_v3, %v6721_v20  ;;  %v6722_v36 = vld [vmem:[#allocation61_spill] sm:$0xff]  ;;  %v6733_v20 = vld [vmem:[#allocation132_spill] sm:$0xff] }
 0x2ef   : > { %v2787_v38 = vmax.f32 %v2659_v24, 0.0  ;;  %v2788_v43 = vmax.f32 %v2660_v50, 0.0  ;;  %v2405_v60 = vpop.permute.xlu1 %2404  ;;  %v2224_v22 = vmul.f32 %v5449_v3, %v6722_v36  ;;  %v6734_v36 = vld [vmem:[#allocation60_spill] sm:$0xff] }
 0x2f0   : > { %v2430_v21 = vpop.permute.xlu0 %2429  ;;  %2905 = vst [vmem:[%s5576_s23 + $0x150] sm:$0xff] %v2777_v34  ;;  %2906 = vst.msk [vmem:[%s5576_s23 + $0x158] sm:$0xff] %vm302_vm0, %v2778_v52  ;;  %v2653_v8 = vadd.f32 %v2405_v60, %v2205_v18  ;;  %v2654_v14 = vadd.f32 %v2405_v60, %v2206_v27  ;;  %v6725_v52 = vld [vmem:[#allocation67_spill] sm:$0xff] }
 0x2f1   : > { %2915 = vst [vmem:[%s5576_s23 + $0x1a0] sm:$0xff] %v2787_v38  ;;  %2916 = vst.msk [vmem:[%s5576_s23 + $0x1a8] sm:$0xff] %vm302_vm0, %v2788_v43  ;;  %v2663_v57 = vadd.f32 %v2430_v21, %v2215_v39  ;;  %v2664_v31 = vadd.f32 %v2430_v21, %v2216_v16  ;;  %v6723_v39 = vld [vmem:[#allocation54_spill] sm:$0xff]  ;;  %v6724_v16 = vld [vmem:[#allocation52_spill] sm:$0xff]  ;;  %v2227_v38 = vmul.f32 %v5457_v51, %v6725_v52 }
 0x2f2   : > { %v2781_v17 = vmax.f32 %v2653_v8, 0.0  ;;  %v2782_v61 = vmax.f32 %v2654_v14, 0.0  ;;  %v2217_v40 = vmul.f32 %v5427_v45, %v6723_v39  ;;  %v2218_v34 = vmul.f32 %v5427_v45, %v6724_v16  ;;  %v6726_v43 = vld [vmem:[#allocation65_spill] sm:$0xff] }
 0x2f3   : > { %v2791_v55 = vmax.f32 %v2663_v57, 0.0  ;;  %v2792_v41 = vmax.f32 %v2664_v31, 0.0  ;;  %v2415_v46 = vpop.permute.xlu1 %2414  ;;  %v2228_v60 = vmul.f32 %v5457_v51, %v6726_v43  ;;  %v6739_v43 = vld [vmem:[#allocation135_spill] sm:$0xff] }
 0x2f4   : > { %v2440_v25 = vpop.permute.xlu0 %2439  ;;  %2909 = vst [vmem:[%s5576_s23 + $0x170] sm:$0xff] %v2781_v17  ;;  %2910 = vst.msk [vmem:[%s5576_s23 + $0x178] sm:$0xff] %vm302_vm0, %v2782_v61  ;;  %v2657_v6 = vadd.f32 %v2415_v46, %v2209_v29  ;;  %v2658_v26 = vadd.f32 %v2415_v46, %v2210_v35  ;;  %v6727_v35 = vld [vmem:[#allocation58_spill] sm:$0xff]  ;;  %v6730_v17 = vld [vmem:[#allocation71_spill] sm:$0xff] }
 0x2f5   : > { %2919 = vst [vmem:[%s5576_s23 + $0x1c0] sm:$0xff] %v2791_v55  ;;  %2920 = vst.msk [vmem:[%s5576_s23 + $0x1c8] sm:$0xff] %vm302_vm0, %v2792_v41  ;;  %v2667_v48 = vadd.f32 %v2440_v25, %v2219_v54  ;;  %v2668_v1 = vadd.f32 %v2440_v25, %v2220_v42  ;;  %v2221_v54 = vmul.f32 %v6728_v7, %v6727_v35  ;;  %v6731_v55 = vld [vmem:[#allocation69_spill] sm:$0xff] }
 0x2f6   : > { %v2785_v33 = vmax.f32 %v2657_v6, 0.0  ;;  %v2786_v24 = vmax.f32 %v2658_v26, 0.0  ;;  %v2222_v42 = vmul.f32 %v6728_v7, %v6729_v19  ;;  %v2231_v61 = vmul.f32 %v5465_v15, %v6730_v17 }
 0x2f7   : > { %v2795_v50 = vmax.f32 %v2667_v48, 0.0  ;;  %v2796_v28 = vmax.f32 %v2668_v1, 0.0  ;;  %v2425_v18 = vpop.permute.xlu1 %2424  ;;  %v2232_v41 = vmul.f32 %v5465_v15, %v6731_v55  ;;  %v6744_v55 = vld [vmem:[#allocation70_spill] sm:$0xff] }
 0x2f8   : > { %v2450_v13 = vpop.permute.xlu0 %2449  ;;  %2913 = vst [vmem:[%s5576_s23 + $0x190] sm:$0xff] %v2785_v33  ;;  %2914 = vst.msk [vmem:[%s5576_s23 + $0x198] sm:$0xff] %vm302_vm0, %v2786_v24  ;;  %v2661_v56 = vadd.f32 %v2425_v18, %v2213_v44  ;;  %v2662_v27 = vadd.f32 %v2425_v18, %v2214_v11  ;;  %v6732_v11 = vld [vmem:[#allocation62_spill] sm:$0xff]  ;;  %v6735_v33 = vld [vmem:[#allocation75_spill] sm:$0xff] }
 0x2f9   : > { %2923 = vst [vmem:[%s5576_s23 + $0x1e0] sm:$0xff] %v2795_v50  ;;  %2924 = vst.msk [vmem:[%s5576_s23 + $0x1e8] sm:$0xff] %vm302_vm0, %v2796_v28  ;;  %v2671_v23 = vadd.f32 %v2450_v13, %v2223_v49  ;;  %v2672_v3 = vadd.f32 %v2450_v13, %v2224_v22  ;;  %v2225_v49 = vmul.f32 %v6733_v20, %v6732_v11  ;;  %v6736_v24 = vld [vmem:[#allocation136_spill] sm:$0xff]  ;;  %v6737_v28 = vld [vmem:[#allocation73_spill] sm:$0xff] }
 0x2fa   : > { %v2789_v21 = vmax.f32 %v2661_v56, 0.0  ;;  %v2790_v8 = vmax.f32 %v2662_v27, 0.0  ;;  %v2226_v22 = vmul.f32 %v6733_v20, %v6734_v36  ;;  %v2235_v50 = vmul.f32 %v6736_v24, %v6735_v33 }
 0x2fb   : > { %v2799_v14 = vmax.f32 %v2671_v23, 0.0  ;;  %v2800_v57 = vmax.f32 %v2672_v3, 0.0  ;;  %v2435_v31 = vpop.permute.xlu1 %2434  ;;  %v2236_v18 = vmul.f32 %v6736_v24, %v6737_v28  ;;  %v6749_v24 = vld [vmem:[#allocation74_spill] sm:$0xff] }
 0x2fc   : > { %v2460_v63 = vpop.permute.xlu0 %2459  ;;  %2917 = vst [vmem:[%s5576_s23 + $0x1b0] sm:$0xff] %v2789_v21  ;;  %2918 = vst.msk [vmem:[%s5576_s23 + $0x1b8] sm:$0xff] %vm302_vm0, %v2790_v8  ;;  %v2665_v45 = vadd.f32 %v2435_v31, %v2217_v40  ;;  %v2666_v29 = vadd.f32 %v2435_v31, %v2218_v34  ;;  %v6740_v21 = vld [vmem:[#allocation64_spill] sm:$0xff] }
 0x2fd   : > { %2927 = vst [vmem:[%s5576_s23 + $0x200] sm:$0xff] %v2799_v14  ;;  %2928 = vst.msk [vmem:[%s5576_s23 + $0x208] sm:$0xff] %vm302_vm0, %v2800_v57  ;;  %v2675_v32 = vadd.f32 %v2460_v63, %v2227_v38  ;;  %v2676_v51 = vadd.f32 %v2460_v63, %v2228_v60  ;;  %v6738_v38 = vld [vmem:[#allocation66_spill] sm:$0xff]  ;;  %v2230_v8 = vmul.f32 %v6739_v43, %v6740_v21  ;;  %v6741_v14 = vld [vmem:[#allocation79_spill] sm:$0xff] }
 0x2fe   : > { %v2793_v46 = vmax.f32 %v2665_v45, 0.0  ;;  %v2794_v25 = vmax.f32 %v2666_v29, 0.0  ;;  %v2229_v60 = vmul.f32 %v6739_v43, %v6738_v38  ;;  %v6742_v57 = vld [vmem:[#allocation138_spill] sm:$0xff]  ;;  %v6743_v63 = vld [vmem:[#allocation77_spill] sm:$0xff] }
 0x2ff   : > { %v2803_v6 = vmax.f32 %v2675_v32, 0.0  ;;  %v2804_v26 = vmax.f32 %v2676_v51, 0.0  ;;  %v2445_v48 = vpop.permute.xlu1 %2444  ;;  %v2239_v31 = vmul.f32 %v6742_v57, %v6741_v14  ;;  %v2240_v45 = vmul.f32 %v6742_v57, %v6743_v63  ;;  %v6755_v14 = vld [vmem:[#allocation139_spill] sm:$0xff] }
 0x300   : > { %v2470_v1 = vpop.permute.xlu0 %2469  ;;  %2921 = vst [vmem:[%s5576_s23 + $0x1d0] sm:$0xff] %v2793_v46  ;;  %2922 = vst.msk [vmem:[%s5576_s23 + $0x1d8] sm:$0xff] %vm302_vm0, %v2794_v25  ;;  %v2669_v2 = vadd.f32 %v2445_v48, %v2221_v54  ;;  %v2670_v44 = vadd.f32 %v2445_v48, %v2222_v42  ;;  %v6746_v25 = vld [vmem:[#allocation68_spill] sm:$0xff] }
 0x301   : > { %2931 = vst [vmem:[%s5576_s23 + $0x220] sm:$0xff] %v2803_v6  ;;  %2932 = vst.msk [vmem:[%s5576_s23 + $0x228] sm:$0xff] %vm302_vm0, %v2804_v26  ;;  %v2679_v5 = vadd.f32 %v2470_v1, %v2231_v61  ;;  %v2680_v15 = vadd.f32 %v2470_v1, %v2232_v41  ;;  %v6745_v41 = vld [vmem:[#allocation134_spill] sm:$0xff]  ;;  %v6747_v26 = vld [vmem:[#allocation83_spill] sm:$0xff] }
 0x302   : > { %v2797_v13 = vmax.f32 %v2669_v2, 0.0  ;;  %v2798_v56 = vmax.f32 %v2670_v44, 0.0  ;;  %v2233_v46 = vmul.f32 %v6745_v41, %v6744_v55  ;;  %v2234_v6 = vmul.f32 %v6745_v41, %v6746_v25  ;;  %v6748_v1 = vld [vmem:[#allocation81_spill] sm:$0xff]  ;;  %v6760_v25 = vld [vmem:[#allocation140_spill] sm:$0xff] }
 0x303   : > { %v2807_v27 = vmax.f32 %v2679_v5, 0.0  ;;  %v2808_v23 = vmax.f32 %v2680_v15, 0.0  ;;  %v2455_v3 = vpop.permute.xlu1 %2454  ;;  %v2243_v48 = vmul.f32 %v5489_v59, %v6747_v26  ;;  %v2244_v2 = vmul.f32 %v5489_v59, %v6748_v1  ;;  %v6761_v26 = vld [vmem:[#allocation80_spill] sm:$0xff]  ;;  %v6762_v1 = vld [vmem:[#allocation95_spill] sm:$0xff] }
 0x304   : > { %v2480_v39 = vpop.permute.xlu0 %2479  ;;  %2925 = vst [vmem:[%s5576_s23 + $0x1f0] sm:$0xff] %v2797_v13  ;;  %2926 = vst.msk [vmem:[%s5576_s23 + $0x1f8] sm:$0xff] %vm302_vm0, %v2798_v56  ;;  %v2673_v40 = vadd.f32 %v2455_v3, %v2225_v49  ;;  %v2674_v16 = vadd.f32 %v2455_v3, %v2226_v22  ;;  %v6752_v56 = vld [vmem:[#allocation87_spill] sm:$0xff] }
 0x305   : > { %2935 = vst [vmem:[%s5576_s23 + $0x240] sm:$0xff] %v2807_v27  ;;  %2936 = vst.msk [vmem:[%s5576_s23 + $0x248] sm:$0xff] %vm302_vm0, %v2808_v23  ;;  %v2683_v34 = vadd.f32 %v2480_v39, %v2235_v50  ;;  %v2684_v52 = vadd.f32 %v2480_v39, %v2236_v18  ;;  %v6750_v50 = vld [vmem:[#allocation156_spill] sm:$0xff]  ;;  %v2247_v27 = vmul.f32 %v5497_v53, %v6752_v56  ;;  %v6753_v23 = vld [vmem:[#allocation85_spill] sm:$0xff] }
 0x306   : > { %v2801_v29 = vmax.f32 %v2673_v40, 0.0  ;;  %v2802_v32 = vmax.f32 %v2674_v16, 0.0  ;;  %v2237_v28 = vmul.f32 %v6750_v50, %v6749_v24  ;;  %v6751_v18 = vld [vmem:[#allocation72_spill] sm:$0xff]  ;;  %v2248_v3 = vmul.f32 %v5497_v53, %v6753_v23 }
 0x307   : > { %v2811_v51 = vmax.f32 %v2683_v34, 0.0  ;;  %v2812_v35 = vmax.f32 %v2684_v52, 0.0  ;;  %v2465_v7 = vpop.permute.xlu1 %2464  ;;  %v2238_v13 = vmul.f32 %v6750_v50, %v6751_v18  ;;  %v6764_v50 = vld [vmem:[#allocation86_spill] sm:$0xff] }
 0x308   : > { %v2490_v54 = vpop.permute.xlu0 %2489  ;;  %2929 = vst [vmem:[%s5576_s23 + $0x210] sm:$0xff] %v2801_v29  ;;  %2930 = vst.msk [vmem:[%s5576_s23 + $0x218] sm:$0xff] %vm302_vm0, %v2802_v32  ;;  %v2677_v19 = vadd.f32 %v2465_v7, %v2229_v60  ;;  %v2678_v42 = vadd.f32 %v2465_v7, %v2230_v8  ;;  %v6754_v8 = vld [vmem:[#allocation78_spill] sm:$0xff]  ;;  %v6758_v32 = vld [vmem:[#allocation89_spill] sm:$0xff] }
 0x309   : > { %2939 = vst [vmem:[%s5576_s23 + $0x260] sm:$0xff] %v2811_v51  ;;  %2940 = vst.msk [vmem:[%s5576_s23 + $0x268] sm:$0xff] %vm302_vm0, %v2812_v35  ;;  %v2687_v17 = vadd.f32 %v2490_v54, %v2239_v31  ;;  %v2688_v61 = vadd.f32 %v2490_v54, %v2240_v45  ;;  %v2241_v57 = vmul.f32 %v6755_v14, %v6754_v8  ;;  %v6756_v31 = vld [vmem:[#allocation76_spill] sm:$0xff]  ;;  %v6757_v45 = vld [vmem:[#allocation91_spill] sm:$0xff] }
 0x30a   : > { %v2805_v44 = vmax.f32 %v2677_v19, 0.0  ;;  %v2806_v5 = vmax.f32 %v2678_v42, 0.0  ;;  %v2242_v63 = vmul.f32 %v6755_v14, %v6756_v31  ;;  %v2251_v29 = vmul.f32 %v5505_v10, %v6757_v45  ;;  %v6769_v8 = vld [vmem:[#allocation90_spill] sm:$0xff]  ;;  %v6770_v14 = vld [vmem:[#allocation129_spill] sm:$0xff]  ;;  %v6771_v31 = vld [vmem:[#allocation88_spill] sm:$0xff] }
 0x30b   : > { %v2815_v15 = vmax.f32 %v2687_v17, 0.0  ;;  %v2816_v11 = vmax.f32 %v2688_v61, 0.0  ;;  %v2475_v20 = vpop.permute.xlu1 %2474  ;;  %v2252_v51 = vmul.f32 %v5505_v10, %v6758_v32  ;;  %v6772_v45 = vld [vmem:[#allocation103_spill] sm:$0xff]  ;;  %v6773_v32 = vld [vmem:[#allocation101_spill] sm:$0xff] }
 0x30c   : > { %v2500_v49 = vpop.permute.xlu0 %2499  ;;  %2933 = vst [vmem:[%s5576_s23 + $0x230] sm:$0xff] %v2805_v44  ;;  %2934 = vst.msk [vmem:[%s5576_s23 + $0x238] sm:$0xff] %vm302_vm0, %v2806_v5  ;;  %v2681_v36 = vadd.f32 %v2475_v20, %v2233_v46  ;;  %v2682_v22 = vadd.f32 %v2475_v20, %v2234_v6  ;;  %v6759_v46 = vld [vmem:[#allocation82_spill] sm:$0xff]  ;;  %v6763_v44 = vld [vmem:[#allocation93_spill] sm:$0xff] }
 0x30d   : > { %2943 = vst [vmem:[%s5576_s23 + $0x280] sm:$0xff] %v2815_v15  ;;  %2944 = vst.msk [vmem:[%s5576_s23 + $0x288] sm:$0xff] %vm302_vm0, %v2816_v11  ;;  %v2691_v33 = vadd.f32 %v2500_v49, %v2243_v48  ;;  %v2692_v59 = vadd.f32 %v2500_v49, %v2244_v2  ;;  %v2245_v6 = vmul.f32 %v6760_v25, %v6759_v46  ;;  %v6775_v46 = vld [vmem:[#allocation150_spill] sm:$0xff] }
 0x30e   : > { %v2809_v39 = vmax.f32 %v2681_v36, 0.0  ;;  %v2810_v40 = vmax.f32 %v2682_v22, 0.0  ;;  %v2246_v48 = vmul.f32 %v6760_v25, %v6761_v26  ;;  %v2255_v2 = vmul.f32 %v5513_v58, %v6762_v1 }
 0x30f   : > { %v2819_v16 = vmax.f32 %v2691_v33, 0.0  ;;  %v2820_v34 = vmax.f32 %v2692_v59, 0.0  ;;  %v2485_v52 = vpop.permute.xlu1 %2484  ;;  %v2256_v5 = vmul.f32 %v5513_v58, %v6763_v44 }
 0x310   : > { %v2510_v38 = vpop.permute.xlu0 %2509  ;;  %2937 = vst [vmem:[%s5576_s23 + $0x250] sm:$0xff] %v2809_v39  ;;  %2938 = vst.msk [vmem:[%s5576_s23 + $0x258] sm:$0xff] %vm302_vm0, %v2810_v40  ;;  %v2685_v43 = vadd.f32 %v2485_v52, %v2237_v28  ;;  %v2686_v60 = vadd.f32 %v2485_v52, %v2238_v13  ;;  %v6765_v28 = vld [vmem:[#allocation142_spill] sm:$0xff]  ;;  %v6766_v13 = vld [vmem:[#allocation84_spill] sm:$0xff] }
 0x311   : > { %2947 = vst [vmem:[%s5576_s23 + $0x2a0] sm:$0xff] %v2819_v16  ;;  %2948 = vst.msk [vmem:[%s5576_s23 + $0x2a8] sm:$0xff] %vm302_vm0, %v2820_v34  ;;  %v2695_v21 = vadd.f32 %v2510_v38, %v2247_v27  ;;  %v2696_v53 = vadd.f32 %v2510_v38, %v2248_v3  ;;  %v2249_v18 = vmul.f32 %v6765_v28, %v6764_v50  ;;  %v6767_v27 = vld [vmem:[#allocation99_spill] sm:$0xff]  ;;  %v6768_v3 = vld [vmem:[#allocation97_spill] sm:$0xff] }
 0x312   : > { %v2813_v35 = vmax.f32 %v2685_v43, 0.0  ;;  %v2814_v7 = vmax.f32 %v2686_v60, 0.0  ;;  %v2250_v56 = vmul.f32 %v6765_v28, %v6766_v13  ;;  %v2259_v23 = vmul.f32 %v5521_v0, %v6767_v27  ;;  %v6780_v50 = vld [vmem:[#allocation96_spill] sm:$0xff] }
 0x313   : > { %v2823_v54 = vmax.f32 %v2695_v21, 0.0  ;;  %v2824_v19 = vmax.f32 %v2696_v53, 0.0  ;;  %v2495_v42 = vpop.permute.xlu1 %2494  ;;  %v2260_v39 = vmul.f32 %v5521_v0, %v6768_v3  ;;  %v2262_v28 = vmul.f32 %v5515_v47, %v6780_v50 }
 0x314   : > { %v2520_v17 = vpop.permute.xlu0 %2519  ;;  %2941 = vst [vmem:[%s5576_s23 + $0x270] sm:$0xff] %v2813_v35  ;;  %2942 = vst.msk [vmem:[%s5576_s23 + $0x278] sm:$0xff] %vm302_vm0, %v2814_v7  ;;  %v2689_v61 = vadd.f32 %v2495_v42, %v2241_v57  ;;  %v2690_v55 = vadd.f32 %v2495_v42, %v2242_v63  ;;  %v2253_v57 = vmul.f32 %v6770_v14, %v6769_v8 }
 0x315   : > { %2951 = vst [vmem:[%s5576_s23 + $0x2c0] sm:$0xff] %v2823_v54  ;;  %2952 = vst.msk [vmem:[%s5576_s23 + $0x2c8] sm:$0xff] %vm302_vm0, %v2824_v19  ;;  %v2699_v41 = vadd.f32 %v2520_v17, %v2251_v29  ;;  %v2700_v10 = vadd.f32 %v2520_v17, %v2252_v51  ;;  %v2254_v63 = vmul.f32 %v6770_v14, %v6771_v31  ;;  %v6786_v14 = vld [vmem:[#allocation113_spill] sm:$0xff] }
 0x316   : > { %v2817_v15 = vmax.f32 %v2689_v61, 0.0  ;;  %v2818_v11 = vmax.f32 %v2690_v55, 0.0  ;;  %v2263_v29 = vmul.f32 %v5529_v9, %v6772_v45  ;;  %v2264_v51 = vmul.f32 %v5529_v9, %v6773_v32 }
 0x317   : > { %v2827_v20 = vmax.f32 %v2699_v41, 0.0  ;;  %v2828_v49 = vmax.f32 %v2700_v10, 0.0  ;;  %v2505_v36 = vpop.permute.xlu1 %2504  ;;  %v6774_v10 = vld [vmem:[#allocation94_spill] sm:$0xff] }
 0x318   : > { %v2530_v22 = vpop.permute.xlu0 %2529  ;;  %2945 = vst [vmem:[%s5576_s23 + $0x290] sm:$0xff] %v2817_v15  ;;  %2946 = vst.msk [vmem:[%s5576_s23 + $0x298] sm:$0xff] %vm302_vm0, %v2818_v11  ;;  %v2693_v33 = vadd.f32 %v2505_v36, %v2245_v6  ;;  %v2694_v59 = vadd.f32 %v2505_v36, %v2246_v48  ;;  %v2257_v25 = vmul.f32 %v6775_v46, %v6774_v10  ;;  %v6776_v6 = vld [vmem:[#allocation92_spill] sm:$0xff]  ;;  %v6777_v48 = vld [vmem:[#allocation107_spill] sm:$0xff] }
 0x319   : > { %2955 = vst [vmem:[%s5576_s23 + $0x2e0] sm:$0xff] %v2827_v20  ;;  %2956 = vst.msk [vmem:[%s5576_s23 + $0x2e8] sm:$0xff] %vm302_vm0, %v2828_v49  ;;  %v2703_v24 = vadd.f32 %v2530_v22, %v2255_v2  ;;  %v2704_v58 = vadd.f32 %v2530_v22, %v2256_v5  ;;  %v2258_v26 = vmul.f32 %v6775_v46, %v6776_v6  ;;  %v6778_v2 = vld [vmem:[#allocation105_spill] sm:$0xff] }
 0x31a   : > { %v2821_v40 = vmax.f32 %v2693_v33, 0.0  ;;  %v2822_v16 = vmax.f32 %v2694_v59, 0.0  ;;  %v2267_v1 = vmul.f32 %v5537_v4, %v6777_v48  ;;  %v2268_v44 = vmul.f32 %v5537_v4, %v6778_v2 }
 0x31b   : > { %v2831_v34 = vmax.f32 %v2703_v24, 0.0  ;;  %v2832_v52 = vmax.f32 %v2704_v58, 0.0  ;;  %v2515_v38 = vpop.permute.xlu1 %2514  ;;  %v6779_v24 = vld [vmem:[#allocation98_spill] sm:$0xff] }
 0x31c   : > { %v2540_v43 = vpop.permute.xlu0 %2539  ;;  %2949 = vst [vmem:[%s5576_s23 + $0x2b0] sm:$0xff] %v2821_v40  ;;  %2950 = vst.msk [vmem:[%s5576_s23 + $0x2b8] sm:$0xff] %vm302_vm0, %v2822_v16  ;;  %v2697_v60 = vadd.f32 %v2515_v38, %v2249_v18  ;;  %v2698_v21 = vadd.f32 %v2515_v38, %v2250_v56  ;;  %v2261_v58 = vmul.f32 %v5515_v47, %v6779_v24  ;;  %v6781_v18 = vld [vmem:[#allocation111_spill] sm:$0xff]  ;;  %v6782_v56 = vld [vmem:[#allocation109_spill] sm:$0xff] }
 0x31d   : > { %2959 = vst [vmem:[%s5576_s23 + $0x300] sm:$0xff] %v2831_v34  ;;  %2960 = vst.msk [vmem:[%s5576_s23 + $0x308] sm:$0xff] %vm302_vm0, %v2832_v52  ;;  %v2707_v53 = vadd.f32 %v2540_v43, %v2259_v23  ;;  %v2708_v0 = vadd.f32 %v2540_v43, %v2260_v39  ;;  %v2271_v13 = vmul.f32 %v5545_v37, %v6781_v18  ;;  %v6783_v43 = vld [vmem:[#allocation102_spill] sm:$0xff] }
 0x31e   : > { %v2825_v35 = vmax.f32 %v2697_v60, 0.0  ;;  %v2826_v7 = vmax.f32 %v2698_v21, 0.0  ;;  %v2272_v27 = vmul.f32 %v5545_v37, %v6782_v56  ;;  %v2265_v60 = vmul.f32 %v5523_v62, %v6783_v43  ;;  %v6784_v21 = vld [vmem:[#allocation100_spill] sm:$0xff] }
 0x31f   : > { %v2835_v54 = vmax.f32 %v2707_v53, 0.0  ;;  %v2836_v19 = vmax.f32 %v2708_v0, 0.0  ;;  %v2525_v42 = vpop.permute.xlu1 %2524  ;;  %v2266_v53 = vmul.f32 %v5523_v62, %v6784_v21  ;;  %v6785_v0 = vld [vmem:[#allocation115_spill] sm:$0xff] }
 0x320   : > { %v2550_v17 = vpop.permute.xlu0 %2549  ;;  %2953 = vst [vmem:[%s5576_s23 + $0x2d0] sm:$0xff] %v2825_v35  ;;  %2954 = vst.msk [vmem:[%s5576_s23 + $0x2d8] sm:$0xff] %vm302_vm0, %v2826_v7  ;;  %v2701_v61 = vadd.f32 %v2525_v42, %v2253_v57  ;;  %v2702_v55 = vadd.f32 %v2525_v42, %v2254_v63  ;;  %v2275_v8 = vmul.f32 %v5553_v12, %v6785_v0  ;;  %v6788_v42 = vld [vmem:[#allocation104_spill] sm:$0xff] }
 0x321   : > { %2963 = vst [vmem:[%s5576_s23 + $0x320] sm:$0xff] %v2835_v54  ;;  %2964 = vst.msk [vmem:[%s5576_s23 + $0x328] sm:$0xff] %vm302_vm0, %v2836_v19  ;;  %v2711_v41 = vadd.f32 %v2550_v17, %v2263_v29  ;;  %v2712_v9 = vadd.f32 %v2550_v17, %v2264_v51  ;;  %v2276_v57 = vmul.f32 %v5553_v12, %v6786_v14  ;;  %v6787_v54 = vld [vmem:[#allocation106_spill] sm:$0xff]  ;;  %v6802_v14 = vld [vmem:[#allocation133_spill] sm:$0xff] }
 0x322   : > { %v2829_v5 = vmax.f32 %v2701_v61, 0.0  ;;  %v2830_v15 = vmax.f32 %v2702_v55, 0.0  ;;  %v2269_v19 = vmul.f32 %v5531_v30, %v6787_v54  ;;  %v2270_v17 = vmul.f32 %v5531_v30, %v6788_v42  ;;  %v6789_v61 = vld [vmem:[#allocation119_spill] sm:$0xff]  ;;  %v6790_v55 = vld [vmem:[#allocation146_spill] sm:$0xff]  ;;  %v6806_v54 = vld [vmem:[#allocation120_spill] sm:$0xff] }
 0x323   : > { %v2839_v11 = vmax.f32 %v2711_v41, 0.0  ;;  %v2840_v20 = vmax.f32 %v2712_v9, 0.0  ;;  %v2535_v49 = vpop.permute.xlu1 %2534  ;;  %v2279_v41 = vmul.f32 %v6790_v55, %v6789_v61  ;;  %v6791_v9 = vld [vmem:[#allocation117_spill] sm:$0xff] }
 0x324   : > { %v2560_v36 = vpop.permute.xlu0 %2559  ;;  %2957 = vst [vmem:[%s5576_s23 + $0x2f0] sm:$0xff] %v2829_v5  ;;  %2958 = vst.msk [vmem:[%s5576_s23 + $0x2f8] sm:$0xff] %vm302_vm0, %v2830_v15  ;;  %v2705_v22 = vadd.f32 %v2535_v49, %v2257_v25  ;;  %v2706_v33 = vadd.f32 %v2535_v49, %v2258_v26  ;;  %v2280_v10 = vmul.f32 %v6790_v55, %v6791_v9  ;;  %v6792_v15 = vld [vmem:[#allocation110_spill] sm:$0xff]  ;;  %v6794_v49 = vld [vmem:[#allocation108_spill] sm:$0xff] }
 0x325   : > { %2967 = vst [vmem:[%s5576_s23 + $0x340] sm:$0xff] %v2839_v11  ;;  %2968 = vst.msk [vmem:[%s5576_s23 + $0x348] sm:$0xff] %vm302_vm0, %v2840_v20  ;;  %v2715_v59 = vadd.f32 %v2560_v36, %v2267_v1  ;;  %v2716_v4 = vadd.f32 %v2560_v36, %v2268_v44  ;;  %v6793_v11 = vld [vmem:[#allocation145_spill] sm:$0xff] }
 0x326   : > { %v2833_v23 = vmax.f32 %v2705_v22, 0.0  ;;  %v2834_v3 = vmax.f32 %v2706_v33, 0.0  ;;  %v2273_v20 = vmul.f32 %v6793_v11, %v6792_v15  ;;  %v2274_v36 = vmul.f32 %v6793_v11, %v6794_v49  ;;  %v6795_v22 = vld [vmem:[#allocation123_spill] sm:$0xff]  ;;  %v6796_v33 = vld [vmem:[#allocation126_spill] sm:$0xff] }
 0x327   : > { %v2843_v39 = vmax.f32 %v2715_v59, 0.0  ;;  %v2844_v40 = vmax.f32 %v2716_v4, 0.0  ;;  %v2545_v16 = vpop.permute.xlu1 %2544  ;;  %v2283_v59 = vmul.f32 %v6796_v33, %v6795_v22  ;;  %v6797_v4 = vld [vmem:[#allocation121_spill] sm:$0xff] }
 0x328   : > { %v2570_v34 = vpop.permute.xlu0 %2569  ;;  %2961 = vst [vmem:[%s5576_s23 + $0x310] sm:$0xff] %v2833_v23  ;;  %2962 = vst.msk [vmem:[%s5576_s23 + $0x318] sm:$0xff] %vm302_vm0, %v2834_v3  ;;  %v2709_v47 = vadd.f32 %v2545_v16, %v2261_v58  ;;  %v2710_v52 = vadd.f32 %v2545_v16, %v2262_v28  ;;  %v2284_v24 = vmul.f32 %v6796_v33, %v6797_v4  ;;  %v6799_v16 = vld [vmem:[#allocation147_spill] sm:$0xff] }
 0x329   : > { %2971 = vst [vmem:[%s5576_s23 + $0x360] sm:$0xff] %v2843_v39  ;;  %2972 = vst.msk [vmem:[%s5576_s23 + $0x368] sm:$0xff] %vm302_vm0, %v2844_v40  ;;  %v2719_v38 = vadd.f32 %v2570_v34, %v2271_v13  ;;  %v2720_v37 = vadd.f32 %v2570_v34, %v2272_v27  ;;  %v6798_v40 = vld [vmem:[#allocation114_spill] sm:$0xff] }
 0x32a   : > { %v2837_v31 = vmax.f32 %v2709_v47, 0.0  ;;  %v2838_v63 = vmax.f32 %v2710_v52, 0.0  ;;  %v2277_v34 = vmul.f32 %v6799_v16, %v6798_v40  ;;  %v6800_v47 = vld [vmem:[#allocation112_spill] sm:$0xff] }
 0x32b   : > { %v2847_v45 = vmax.f32 %v2719_v38, 0.0  ;;  %v2848_v29 = vmax.f32 %v2720_v37, 0.0  ;;  %v2555_v32 = vpop.permute.xlu1 %2554  ;;  %v2278_v52 = vmul.f32 %v6799_v16, %v6800_v47 }
 0x32c   : > { %v2580_v51 = vpop.permute.xlu0 %2579  ;;  %2965 = vst [vmem:[%s5576_s23 + $0x330] sm:$0xff] %v2837_v31  ;;  %2966 = vst.msk [vmem:[%s5576_s23 + $0x338] sm:$0xff] %vm302_vm0, %v2838_v63  ;;  %v2713_v62 = vadd.f32 %v2555_v32, %v2265_v60  ;;  %v2714_v35 = vadd.f32 %v2555_v32, %v2266_v53  ;;  %v6803_v31 = vld [vmem:[#allocation116_spill] sm:$0xff] }
 0x32d   : > { %2975 = vst [vmem:[%s5576_s23 + $0x380] sm:$0xff] %v2847_v45  ;;  %2976 = vst.msk [vmem:[%s5576_s23 + $0x388] sm:$0xff] %vm302_vm0, %v2848_v29  ;;  %v2723_v7 = vadd.f32 %v2580_v51, %v2275_v8  ;;  %v2724_v12 = vadd.f32 %v2580_v51, %v2276_v57  ;;  %v6801_v8 = vld [vmem:[#allocation118_spill] sm:$0xff]  ;;  %v2282_v63 = vmul.f32 %v6802_v14, %v6803_v31 }
 0x32e   : > { %v2841_v46 = vmax.f32 %v2713_v62, 0.0  ;;  %v2842_v25 = vmax.f32 %v2714_v35, 0.0  ;;  %v2281_v57 = vmul.f32 %v6802_v14, %v6801_v8  ;;  %v6804_v35 = vld [vmem:[#allocation122_spill] sm:$0xff] }
 0x32f   : > { %v2851_v6 = vmax.f32 %v2723_v7, 0.0  ;;  %v2852_v26 = vmax.f32 %v2724_v12, 0.0  ;;  %v2565_v48 = vpop.permute.xlu1 %2564  ;;  %v6805_v7 = vld [vmem:[#allocation130_spill] sm:$0xff] }
 0x330   : > { %v2590_v1 = vpop.permute.xlu0 %2589  ;;  %2969 = vst [vmem:[%s5576_s23 + $0x350] sm:$0xff] %v2841_v46  ;;  %2970 = vst.msk [vmem:[%s5576_s23 + $0x358] sm:$0xff] %vm302_vm0, %v2842_v25  ;;  %v2717_v30 = vadd.f32 %v2565_v48, %v2269_v19  ;;  %v2718_v2 = vadd.f32 %v2565_v48, %v2270_v17  ;;  %v2285_v12 = vmul.f32 %v6805_v7, %v6804_v35 }
 0x331   : > { %2979 = vst [vmem:[%s5576_s23 + $0x3a0] sm:$0xff] %v2851_v6  ;;  %2980 = vst.msk [vmem:[%s5576_s23 + $0x3a8] sm:$0xff] %vm302_vm0, %v2852_v26  ;;  %v2727_v44 = vadd.f32 %v2590_v1, %v2279_v41  ;;  %v2728_v5 = vadd.f32 %v2590_v1, %v2280_v10  ;;  %v2286_v19 = vmul.f32 %v6805_v7, %v6806_v54 }
 0x332   : > { %v2845_v58 = vmax.f32 %v2717_v30, 0.0  ;;  %v2846_v50 = vmax.f32 %v2718_v2, 0.0 }
 0x333   : > { %v2855_v28 = vmax.f32 %v2727_v44, 0.0  ;;  %v2856_v18 = vmax.f32 %v2728_v5, 0.0  ;;  %v2575_v13 = vpop.permute.xlu1 %2574 }
 0x334   : > { %v2600_v56 = vpop.permute.xlu0 %2599  ;;  %2973 = vst [vmem:[%s5576_s23 + $0x370] sm:$0xff] %v2845_v58  ;;  %2974 = vst.msk [vmem:[%s5576_s23 + $0x378] sm:$0xff] %vm302_vm0, %v2846_v50  ;;  %v2721_v27 = vadd.f32 %v2575_v13, %v2273_v20  ;;  %v2722_v23 = vadd.f32 %v2575_v13, %v2274_v36 }
 0x335   : > { %2983 = vst [vmem:[%s5576_s23 + $0x3c0] sm:$0xff] %v2855_v28  ;;  %2984 = vst.msk [vmem:[%s5576_s23 + $0x3c8] sm:$0xff] %vm302_vm0, %v2856_v18  ;;  %v2731_v3 = vadd.f32 %v2600_v56, %v2283_v59  ;;  %v2732_v39 = vadd.f32 %v2600_v56, %v2284_v24 }
 0x336   : > { %v2849_v38 = vmax.f32 %v2721_v27, 0.0  ;;  %v2850_v37 = vmax.f32 %v2722_v23, 0.0 }
 0x337   : > { %v2859_v43 = vmax.f32 %v2731_v3, 0.0  ;;  %v2860_v60 = vmax.f32 %v2732_v39, 0.0  ;;  %v2585_v21 = vpop.permute.xlu1 %2584 }
 0x338   : > { %2977 = vst [vmem:[%s5576_s23 + $0x390] sm:$0xff] %v2849_v38  ;;  %2978 = vst.msk [vmem:[%s5576_s23 + $0x398] sm:$0xff] %vm302_vm0, %v2850_v37  ;;  %v2725_v53 = vadd.f32 %v2585_v21, %v2277_v34  ;;  %v2726_v0 = vadd.f32 %v2585_v21, %v2278_v52 }
 0x339   : > { %2987 = vst [vmem:[%s5576_s23 + $0x3e0] sm:$0xff] %v2859_v43  ;;  %2988 = vst.msk [vmem:[%s5576_s23 + $0x3e8] sm:$0xff] %vm302_vm0, %v2860_v60 }
 0x33a   : > { %v2853_v45 = vmax.f32 %v2725_v53, 0.0  ;;  %v2854_v29 = vmax.f32 %v2726_v0, 0.0 }
 0x33b   : > { %v2595_v32 = vpop.permute.xlu1 %2594 }
 0x33c   : > { %2981 = vst [vmem:[%s5576_s23 + $0x3b0] sm:$0xff] %v2853_v45  ;;  %2982 = vst.msk [vmem:[%s5576_s23 + $0x3b8] sm:$0xff] %vm302_vm0, %v2854_v29  ;;  %v2729_v51 = vadd.f32 %v2595_v32, %v2281_v57  ;;  %v2730_v62 = vadd.f32 %v2595_v32, %v2282_v63 }
 0x33e   : > { %v2857_v42 = vmax.f32 %v2729_v51, 0.0  ;;  %v2858_v17 = vmax.f32 %v2730_v62, 0.0 }
 0x33f   : > { %v2605_v61 = vpop.permute.xlu1 %2604 }
 0x340   : > { %2985 = vst [vmem:[%s5576_s23 + $0x3d0] sm:$0xff] %v2857_v42  ;;  %2986 = vst.msk [vmem:[%s5576_s23 + $0x3d8] sm:$0xff] %vm302_vm0, %v2858_v17  ;;  %v2733_v55 = vadd.f32 %v2605_v61, %v2285_v12  ;;  %v2734_v41 = vadd.f32 %v2605_v61, %v2286_v19 }
 0x342   : > { %v2861_v9 = vmax.f32 %v2733_v55, 0.0  ;;  %v2862_v10 = vmax.f32 %v2734_v41, 0.0 }
 0x344   : > { %2989 = vst [vmem:[%s5576_s23 + $0x3f0] sm:$0xff] %v2861_v9  ;;  %2990 = vst.msk [vmem:[%s5576_s23 + $0x3f8] sm:$0xff] %vm302_vm0, %v2862_v10 }
 0x345 PF: > { %s12_s9 = sadd.s32 1, %s3271_s9  }
 0x346   : > { %p9_p4 = scmp.ge.s32.totalorder %s12_s9, 4  }
 0x348   :  { %11 = sbr.rel (!%p9_p4) target bundleno = 1 (0x1), region = 61 }

</bundles_post_ra>
